<compile_context>
chip_gen: v7x
topology: tpu7x:2x2x1
jax: 0.10.0
libtpu: 0.0.40
codegen_flags: <defaults>
</compile_context>

<pallas_src>
import math
import functools

import numpy as np
import jax
import jax.numpy as jnp
from jax.experimental import pallas as pl
from jax.experimental.pallas import tpu as pltpu


# ----------------------------------------------------------------------------
# small in-kernel math helpers
# ----------------------------------------------------------------------------
def _gelu_tanh(x):
    # tanh-based GELU (EUP-friendly); max abs deviation from erf-GELU ~3e-3,
    # well inside the test tolerance.
    c = math.sqrt(2.0 / math.pi)
    return 0.5 * x * (1.0 + jnp.tanh(c * (x + 0.044715 * x * x * x)))


# ----------------------------------------------------------------------------
# Pallas kernel: full transformer stack, one grid step per (batch block, layer)
# ----------------------------------------------------------------------------
def _layers_kernel(x_ref, ln1w, ln1b, wqkv, bqkv, wp, bp, ln2w, ln2b,
                   w1, b1, w2, b2, o_ref, xs_ref, ycat_ref, *, n_head, num_layers):
    Bb, T, C = x_ref.shape
    H = n_head
    Dh = C // H
    eps = 1e-5
    scale = 1.0 / math.sqrt(Dh)
    layer = pl.program_id(1)

    # layer 0: stage the incoming activations into the VMEM-resident buffer
    @pl.when(layer == 0)
    def _():
        xs_ref[...] = x_ref[...].astype(jnp.float32)

    x = xs_ref[...]                                 # (Bb, T, C) f32 — this layer's input
    xf = x.reshape(Bb * T, C)                       # fold batch into matmul M dim

    # ---- LayerNorm 1 (f32) ----
    mu = jnp.mean(xf, axis=-1, keepdims=True)
    var = jnp.mean(jnp.square(xf - mu), axis=-1, keepdims=True)
    xn = (xf - mu) * jax.lax.rsqrt(var + eps) * ln1w[0] + ln1b[0]

    # ---- fused QKV projection: one (Bb*T, C) x (C, 3C) bf16 matmul, f32 acc ----
    qkv = jnp.dot(xn.astype(jnp.bfloat16), wqkv[0],
                  preferred_element_type=jnp.float32) + bqkv[0]
    q = qkv[:, 0:C].reshape(Bb, T, C)
    k = qkv[:, C:2 * C].reshape(Bb, T, C)
    v = qkv[:, 2 * C:3 * C].reshape(Bb, T, C)

    # causal mask (hoisted out of the head loop)
    row = jax.lax.broadcasted_iota(jnp.int32, (T, T), 0)
    col = jax.lax.broadcasted_iota(jnp.int32, (T, T), 1)
    causal = jnp.broadcast_to((col <= row)[None], (Bb, T, T))

    # ---- per-head scores / softmax / PV (batched dot_generals over Bb) ----
    # score+PV stage is <1% of FLOPs for T<=block_size; heads are a short static loop.
    for h in range(H):
        qh = q[:, :, h * Dh:(h + 1) * Dh].astype(jnp.bfloat16)
        kh = k[:, :, h * Dh:(h + 1) * Dh].astype(jnp.bfloat16)
        vh = v[:, :, h * Dh:(h + 1) * Dh].astype(jnp.bfloat16)
        att = jax.lax.dot_general(qh, kh, (((2,), (2,)), ((0,), (0,))),
                                  preferred_element_type=jnp.float32) * scale
        att = jnp.where(causal, att, -jnp.inf)
        att = att - jnp.max(att, axis=-1, keepdims=True)
        p = jnp.exp(att)
        p = p * pl.reciprocal(jnp.sum(p, axis=-1, keepdims=True), approx=True)
        yh = jax.lax.dot_general(p.astype(jnp.bfloat16), vh,
                                 (((2,), (1,)), ((0,), (0,))),
                                 preferred_element_type=jnp.float32)   # (Bb, T, Dh)
        ycat_ref[:, :, h * Dh:(h + 1) * Dh] = yh                        # concat heads

    # ---- fused output projection: (Bb*T, C) x (C, C) bf16 matmul ----
    ycat = ycat_ref[...].reshape(Bb * T, C).astype(jnp.bfloat16)
    attn_out = jnp.dot(ycat, wp[0], preferred_element_type=jnp.float32) + bp[0]

    x1 = xf + attn_out                              # residual (f32)

    # ---- LayerNorm 2 + MLP ----
    mu2 = jnp.mean(x1, axis=-1, keepdims=True)
    var2 = jnp.mean(jnp.square(x1 - mu2), axis=-1, keepdims=True)
    x2 = (x1 - mu2) * jax.lax.rsqrt(var2 + eps) * ln2w[0] + ln2b[0]
    h1 = jnp.dot(x2.astype(jnp.bfloat16), w1[0],
                 preferred_element_type=jnp.float32) + b1[0]
    h1 = _gelu_tanh(h1)
    h2 = jnp.dot(h1.astype(jnp.bfloat16), w2[0],
                 preferred_element_type=jnp.float32) + b2[0]

    out = (x1 + h2).reshape(Bb, T, C)
    xs_ref[...] = out                               # next layer reads this (VMEM-resident)

    @pl.when(layer == num_layers - 1)
    def _():
        o_ref[...] = out.astype(o_ref.dtype)


def transformer_pallas(x, blk, *, n_head):
    """x: (B, T, C); blk: dict of layer-stacked weights (leading axis = layer)."""
    B, T, C = x.shape
    L = blk['wqkv'].shape[0]

    # choose the batch block so Bb*T rows fill the MXU M dim but cap activation VMEM
    max_rows = 512
    Bb = 1
    for cand in range(min(B, max(1, max_rows // T)), 0, -1):
        if B % cand == 0:
            Bb = cand
            break

    weights = [blk['ln1_w'], blk['ln1_b'], blk['wqkv'], blk['bqkv'], blk['wp'], blk['bp'],
               blk['ln2_w'], blk['ln2_b'], blk['w1'], blk['b1'], blk['w2'], blk['b2']]

    def w_spec(a):
        n_rest = a.ndim - 1
        return pl.BlockSpec((1,) + a.shape[1:],
                            lambda i, l, _n=n_rest: (l,) + (0,) * _n)

    kernel = functools.partial(_layers_kernel, n_head=n_head, num_layers=L)
    return pl.pallas_call(
        kernel,
        out_shape=jax.ShapeDtypeStruct((B, T, C), x.dtype),
        grid_spec=pltpu.PrefetchScalarGridSpec(
            num_scalar_prefetch=0,
            grid=(B // Bb, L),                        # layer axis innermost (sequential dep)
            in_specs=[pl.BlockSpec((Bb, T, C), lambda i, l: (i, 0, 0))]
                     + [w_spec(a) for a in weights],
            out_specs=pl.BlockSpec((Bb, T, C), lambda i, l: (i, 0, 0)),
            scratch_shapes=[pltpu.VMEM((Bb, T, C), jnp.float32),   # resident activations
                            pltpu.VMEM((Bb, T, C), jnp.float32)],  # concat(y_heads)
        ),
        compiler_params=pltpu.CompilerParams(
            dimension_semantics=("parallel", "arbitrary"),
            vmem_limit_bytes=64 * 1024 * 1024),
    )(x, *weights)


# ----------------------------------------------------------------------------
# parameter construction (deterministic, mirrors the torch __init__ / _init_weights)
# ----------------------------------------------------------------------------
def sinusoidal_pos_encoding(length, channels):
    # tensor2tensor get_timing_signal_1d, as used by pos_encoding.PositionEmbedding
    position = np.arange(length, dtype=np.float32)
    num_timescales = channels // 2
    log_inc = math.log(1.0e4) / max(num_timescales - 1, 1)
    inv_ts = np.exp(np.arange(num_timescales, dtype=np.float32) * -log_inc)
    scaled = position[:, None] * inv_ts[None, :]
    signal = np.concatenate([np.sin(scaled), np.cos(scaled)], axis=1)
    if channels % 2:
        signal = np.pad(signal, [[0, 0], [0, 1]])
    return jnp.asarray(signal, jnp.float32)                 # (length, channels)


def init_params(key, *, num_vq, embed_dim, clip_dim, block_size,
                num_layers, n_head, fc_rate, num_parts):
    C = embed_dim
    std = 0.02
    keys = jax.random.split(key, 2 + num_layers)

    def normal(k, shape):
        return std * jax.random.normal(k, shape, jnp.float32)

    tok_keys = jax.random.split(keys[0], num_parts)
    tok_emb = jnp.stack([normal(tok_keys[i], (num_vq + 3, C))
                         for i in range(num_parts)])        # (P, num_vq+3, C)

    cond_w = normal(keys[1], (C, clip_dim)).T               # stored as (clip_dim, C)
    cond_b = jnp.zeros((1, C), jnp.float32)

    per_layer = []
    for l in range(num_layers):
        bkeys = jax.random.split(keys[2 + l], 6)
        wq_t = normal(bkeys[0], (C, C)).T                   # x @ W^T layouts (in, out)
        wk_t = normal(bkeys[1], (C, C)).T
        wv_t = normal(bkeys[2], (C, C)).T
        wp_t = normal(bkeys[3], (C, C)).T
        w1_t = normal(bkeys[4], (fc_rate * C, C)).T
        w2_t = normal(bkeys[5], (C, fc_rate * C)).T
        per_layer.append(dict(
            ln1_w=jnp.ones((1, C), jnp.float32),
            ln1_b=jnp.zeros((1, C), jnp.float32),
            # fused QKV weight (C, 3C): [Q | K | V], each split per-head along its C cols
            wqkv=jnp.concatenate([wq_t, wk_t, wv_t], axis=1).astype(jnp.bfloat16),
            bqkv=jnp.zeros((1, 3 * C), jnp.float32),
            wp=wp_t.astype(jnp.bfloat16),                   # (C, C)
            bp=jnp.zeros((1, C), jnp.float32),
            ln2_w=jnp.ones((1, C), jnp.float32),
            ln2_b=jnp.zeros((1, C), jnp.float32),
            w1=w1_t.astype(jnp.bfloat16),
            b1=jnp.zeros((1, fc_rate * C), jnp.float32),
            w2=w2_t.astype(jnp.bfloat16),
            b2=jnp.zeros((1, C), jnp.float32),
        ))
    # stack every weight along a leading layer axis for the fused-layer kernel
    blocks = {k: jnp.stack([pl_[k] for pl_ in per_layer], axis=0) for k in per_layer[0]}

    pe = sinusoidal_pos_encoding(block_size, C)
    return dict(tok_emb=tok_emb, cond_w=cond_w, cond_b=cond_b,
                blocks=blocks, pe=pe)


# ----------------------------------------------------------------------------
# forward (glue + Pallas kernel)
# ----------------------------------------------------------------------------
def cross_cond_trans_base_forward(params, idx, clip_feature, *, n_head):
    # TODO(synk): len(idx)==0 branch (cond-only prompt) not implemented; idx is always given here.
    B, P, t = idx.shape
    C = params['cond_w'].shape[1]
    # token embeddings summed over body parts (data-dependent gather stays in glue)
    tok = jnp.zeros((B, t, C), jnp.float32)
    for i in range(P):
        tok = tok + jnp.take(params['tok_emb'][i], idx[:, i, :], axis=0)
    # cond_emb: tiny GEMV-scale linear — leave to XLA
    cond = clip_feature @ params['cond_w'] + params['cond_b']
    x = jnp.concatenate([cond[:, None, :], tok], axis=1)    # (B, t+1, C)
    T = x.shape[1]
    x = x + params['pe'][:T][None, :, :]                    # PositionEmbedding (dropout=0)

    # pad T to a multiple of 16 for dense sublane tiles; causal mask keeps padded
    # rows finite (each row attends at least to itself) and they are sliced away.
    T_pad = ((T + 15) // 16) * 16
    if T_pad != T:
        x = jnp.pad(x, ((0, 0), (0, T_pad - T), (0, 0)))

    x = transformer_pallas(x, params['blocks'], n_head=n_head)
    return x[:, :T, :]


# ----------------------------------------------------------------------------
# pure-JAX reference (for numerical sanity check)
# ----------------------------------------------------------------------------
def _reference_block(x, blk, l, *, n_head):
    B, T, C = x.shape
    H, Dh = n_head, C // n_head
    f32 = lambda a: a.astype(jnp.float32)

    def ln(v, w, b):
        mu = jnp.mean(v, -1, keepdims=True)
        var = jnp.mean(jnp.square(v - mu), -1, keepdims=True)
        return (v - mu) / jnp.sqrt(var + 1e-5) * w + b

    xn = ln(x, blk['ln1_w'][l], blk['ln1_b'][l])
    qkv = xn @ f32(blk['wqkv'][l]) + blk['bqkv'][l]
    q, k, v = jnp.split(qkv, 3, axis=-1)

    def split_heads(a):
        return a.reshape(B, T, H, Dh).transpose(0, 2, 1, 3)

    q, k, v = split_heads(q), split_heads(k), split_heads(v)
    att = jnp.einsum('bhtd,bhsd->bhts', q, k) / math.sqrt(Dh)
    mask = jnp.tril(jnp.ones((T, T), bool))
    att = jnp.where(mask[None, None], att, -jnp.inf)
    att = jax.nn.softmax(att, axis=-1)
    y = jnp.einsum('bhts,bhsd->bhtd', att, v)
    y = y.transpose(0, 2, 1, 3).reshape(B, T, C)
    y = y @ f32(blk['wp'][l]) + blk['bp'][l]
    x = x + y
    xn2 = ln(x, blk['ln2_w'][l], blk['ln2_b'][l])
    h = jax.nn.gelu(xn2 @ f32(blk['w1'][l]) + blk['b1'][l], approximate=False)
    h = h @ f32(blk['w2'][l]) + blk['b2'][l]
    return x + h


def reference_forward(params, idx, clip_feature, *, n_head):
    B, P, t = idx.shape
    C = params['cond_w'].shape[1]
    tok = jnp.zeros((B, t, C), jnp.float32)
    for i in range(P):
        tok = tok + jnp.take(params['tok_emb'][i], idx[:, i, :], axis=0)
    cond = clip_feature @ params['cond_w'] + params['cond_b']
    x = jnp.concatenate([cond[:, None, :], tok], axis=1)
    T = x.shape[1]
    x = x + params['pe'][:T][None]
    L = params['blocks']['wqkv'].shape[0]
    for l in range(L):
        x = _reference_block(x, params['blocks'], l, n_head=n_head)
    return x


# ----------------------------------------------------------------------------
if __name__ == "__main__":
    # small shapes consistent with the module
    B, num_parts, t = 2, 6, 8
    num_vq, embed_dim, clip_dim = 64, 64, 32
    block_size, num_layers, n_head, fc_rate = 16, 2, 8, 4

    root = jax.random.PRNGKey(0)
    kparam, kidx, kclip = jax.random.split(root, 3)

    params = init_params(kparam, num_vq=num_vq, embed_dim=embed_dim,
                         clip_dim=clip_dim, block_size=block_size,
                         num_layers=num_layers, n_head=n_head,
                         fc_rate=fc_rate, num_parts=num_parts)

    idx = jax.random.randint(kidx, (B, num_parts, t), 0, num_vq + 3, jnp.int32)
    clip_feature = jax.random.normal(kclip, (B, clip_dim), jnp.float32)

    out = cross_cond_trans_base_forward(params, idx, clip_feature, n_head=n_head)
    out = jax.block_until_ready(out)

    assert out.shape == (B, t + 1, embed_dim), out.shape
    assert bool(jnp.all(jnp.isfinite(out)))

    ref = reference_forward(params, idx, clip_feature, n_head=n_head)
    max_err = float(jnp.max(jnp.abs(out - ref)))
    assert max_err < 2e-2, f"max abs err vs reference: {max_err}"

    print("KERNEL_OK")
</pallas_src>

<mosaic_0001>
module attributes {stable_mosaic.version = 11 : i64} {
  func.func @_layers_kernel(%arg0: i32, %arg1: i32, %arg2: memref<2x16x64xf32, #tpu.memory_space<vmem>>, %arg3: memref<1x1x64xf32, #tpu.memory_space<vmem>>, %arg4: memref<1x1x64xf32, #tpu.memory_space<vmem>>, %arg5: memref<1x64x192xbf16, #tpu.memory_space<vmem>>, %arg6: memref<1x1x192xf32, #tpu.memory_space<vmem>>, %arg7: memref<1x64x64xbf16, #tpu.memory_space<vmem>>, %arg8: memref<1x1x64xf32, #tpu.memory_space<vmem>>, %arg9: memref<1x1x64xf32, #tpu.memory_space<vmem>>, %arg10: memref<1x1x64xf32, #tpu.memory_space<vmem>>, %arg11: memref<1x64x256xbf16, #tpu.memory_space<vmem>>, %arg12: memref<1x1x256xf32, #tpu.memory_space<vmem>>, %arg13: memref<1x256x64xbf16, #tpu.memory_space<vmem>>, %arg14: memref<1x1x64xf32, #tpu.memory_space<vmem>>, %arg15: memref<2x16x64xf32, #tpu.memory_space<vmem>>, %arg16: memref<2x16x64xf32, #tpu.memory_space<vmem>>, %arg17: memref<2x16x64xf32, #tpu.memory_space<vmem>>) attributes {dimension_semantics = [#tpu.dimension_semantics<parallel>, #tpu.dimension_semantics<arbitrary>], iteration_bounds = array<i64: 1, 2>, scalar_prefetch = 0 : i64, scratch_operands = 2 : i64, tpu.core_type = #tpu.core_type<tc>, window_params = [{transform_indices = @transform_0, window_bounds = array<i64: 2, 16, 64>}, {transform_indices = @transform_1, window_bounds = array<i64: 1, 1, 64>}, {transform_indices = @transform_2, window_bounds = array<i64: 1, 1, 64>}, {transform_indices = @transform_3, window_bounds = array<i64: 1, 64, 192>}, {transform_indices = @transform_4, window_bounds = array<i64: 1, 1, 192>}, {transform_indices = @transform_5, window_bounds = array<i64: 1, 64, 64>}, {transform_indices = @transform_6, window_bounds = array<i64: 1, 1, 64>}, {transform_indices = @transform_7, window_bounds = array<i64: 1, 1, 64>}, {transform_indices = @transform_8, window_bounds = array<i64: 1, 1, 64>}, {transform_indices = @transform_9, window_bounds = array<i64: 1, 64, 256>}, {transform_indices = @transform_10, window_bounds = array<i64: 1, 1, 256>}, {transform_indices = @transform_11, window_bounds = array<i64: 1, 256, 64>}, {transform_indices = @transform_12, window_bounds = array<i64: 1, 1, 64>}, {transform_indices = @transform_13, window_bounds = array<i64: 2, 16, 64>}]} {
    %c0_i32 = arith.constant 0 : i32
    %0 = arith.cmpi eq, %arg1, %c0_i32 : i32
    %1 = arith.extui %0 : i1 to i32
    %c0_i32_0 = arith.constant 0 : i32
    %2 = arith.cmpi ne, %1, %c0_i32_0 : i32
    scf.if %2 {
      %c0_128 = arith.constant 0 : index
      %c0_129 = arith.constant 0 : index
      %c0_130 = arith.constant 0 : index
      %315 = vector.load %arg2[%c0_128, %c0_129, %c0_130] : memref<2x16x64xf32, #tpu.memory_space<vmem>>, vector<2x16x64xf32>
      %c0_131 = arith.constant 0 : index
      %c0_132 = arith.constant 0 : index
      %c0_133 = arith.constant 0 : index
      %316 = vector.load %arg16[%c0_131, %c0_132, %c0_133] : memref<2x16x64xf32, #tpu.memory_space<vmem>>, vector<2x16x64xf32>
      tpu.vector_store %arg16[%c0_131, %c0_132, %c0_133], %315 {strides = array<i32>} : memref<2x16x64xf32, #tpu.memory_space<vmem>>, vector<2x16x64xf32>,
    } else {
    }
    %c0 = arith.constant 0 : index
    %c0_1 = arith.constant 0 : index
    %c0_2 = arith.constant 0 : index
    %3 = vector.load %arg16[%c0, %c0_1, %c0_2] : memref<2x16x64xf32, #tpu.memory_space<vmem>>, vector<2x16x64xf32>
    %4 = vector.shape_cast %3 : vector<2x16x64xf32> to vector<32x64xf32>
    %cst = arith.constant dense<0.000000e+00> : vector<32xf32>
    %5 = vector.multi_reduction <add>, %4, %cst [1] : vector<32x64xf32> to vector<32xf32>
    %6 = vector.shape_cast %5 : vector<32xf32> to vector<32x1xf32>
    %cst_3 = arith.constant 6.400000e+01 : f32
    %7 = vector.broadcast %cst_3 : f32 to vector<32x1xf32>
    %8 = arith.divf %6, %7 : vector<32x1xf32>
    %9 = vector.broadcast %8 : vector<32x1xf32> to vector<32x64xf32>
    %10 = arith.subf %4, %9 : vector<32x64xf32>
    %11 = arith.mulf %10, %10 : vector<32x64xf32>
    %cst_4 = arith.constant dense<0.000000e+00> : vector<32xf32>
    %12 = vector.multi_reduction <add>, %11, %cst_4 [1] : vector<32x64xf32> to vector<32xf32>
    %13 = vector.shape_cast %12 : vector<32xf32> to vector<32x1xf32>
    %cst_5 = arith.constant 6.400000e+01 : f32
    %14 = vector.broadcast %cst_5 : f32 to vector<32x1xf32>
    %15 = arith.divf %13, %14 : vector<32x1xf32>
    %16 = vector.broadcast %8 : vector<32x1xf32> to vector<32x64xf32>
    %17 = arith.subf %4, %16 : vector<32x64xf32>
    %cst_6 = arith.constant 9.99999974E-6 : f32
    %18 = vector.broadcast %cst_6 : f32 to vector<32x1xf32>
    %19 = arith.addf %15, %18 : vector<32x1xf32>
    %20 = math.rsqrt %19 : vector<32x1xf32>
    %21 = vector.broadcast %20 : vector<32x1xf32> to vector<32x64xf32>
    %22 = arith.mulf %17, %21 : vector<32x64xf32>
    %c0_7 = arith.constant 0 : index
    %c0_8 = arith.constant 0 : index
    %c0_9 = arith.constant 0 : index
    %23 = vector.load %arg3[%c0_7, %c0_8, %c0_9] : memref<1x1x64xf32, #tpu.memory_space<vmem>>, vector<1x1x64xf32>
    %24 = vector.shape_cast %23 : vector<1x1x64xf32> to vector<1x64xf32>
    %25 = vector.broadcast %24 : vector<1x64xf32> to vector<32x64xf32>
    %26 = arith.mulf %22, %25 : vector<32x64xf32>
    %c0_10 = arith.constant 0 : index
    %c0_11 = arith.constant 0 : index
    %c0_12 = arith.constant 0 : index
    %27 = vector.load %arg4[%c0_10, %c0_11, %c0_12] : memref<1x1x64xf32, #tpu.memory_space<vmem>>, vector<1x1x64xf32>
    %28 = vector.shape_cast %27 : vector<1x1x64xf32> to vector<1x64xf32>
    %29 = vector.broadcast %28 : vector<1x64xf32> to vector<32x64xf32>
    %30 = arith.addf %26, %29 : vector<32x64xf32>
    %31 = arith.truncf %30 : vector<32x64xf32> to vector<32x64xbf16>
    %c0_13 = arith.constant 0 : index
    %c0_14 = arith.constant 0 : index
    %c0_15 = arith.constant 0 : index
    %32 = vector.load %arg5[%c0_13, %c0_14, %c0_15] : memref<1x64x192xbf16, #tpu.memory_space<vmem>>, vector<1x64x192xbf16>
    %33 = vector.shape_cast %32 : vector<1x64x192xbf16> to vector<64x192xbf16>
    %cst_16 = arith.constant dense<0.000000e+00> : vector<32x192xf32>
    %34 = tpu.matmul %31, %33, %cst_16 {dimension_numbers = #tpu.dot_dimension_numbers<[1], [0], [0], [1], [0, 0, 1, 1], [], []>} : vector<32x64xbf16>, vector<64x192xbf16>, vector<32x192xf32> -> vector<32x192xf32>
    %c0_17 = arith.constant 0 : index
    %c0_18 = arith.constant 0 : index
    %c0_19 = arith.constant 0 : index
    %35 = vector.load %arg6[%c0_17, %c0_18, %c0_19] : memref<1x1x192xf32, #tpu.memory_space<vmem>>, vector<1x1x192xf32>
    %36 = vector.shape_cast %35 : vector<1x1x192xf32> to vector<1x192xf32>
    %37 = vector.broadcast %36 : vector<1x192xf32> to vector<32x192xf32>
    %38 = arith.addf %34, %37 : vector<32x192xf32>
    %39 = vector.extract_strided_slice %38 {offsets = [0, 0], sizes = [32, 64], strides = [1, 1]} : vector<32x192xf32> to vector<32x64xf32>
    %40 = vector.shape_cast %39 : vector<32x64xf32> to vector<2x16x64xf32>
    %41 = vector.extract_strided_slice %38 {offsets = [0, 64], sizes = [32, 64], strides = [1, 1]} : vector<32x192xf32> to vector<32x64xf32>
    %42 = vector.shape_cast %41 : vector<32x64xf32> to vector<2x16x64xf32>
    %43 = vector.extract_strided_slice %38 {offsets = [0, 128], sizes = [32, 64], strides = [1, 1]} : vector<32x192xf32> to vector<32x64xf32>
    %44 = vector.shape_cast %43 : vector<32x64xf32> to vector<2x16x64xf32>
    %45 = tpu.iota {dimensions = array<i32: 0>} : vector<16x16xi32>
    %46 = tpu.iota {dimensions = array<i32: 1>} : vector<16x16xi32>
    %47 = arith.cmpi sle, %46, %45 : vector<16x16xi32>
    %48 = vector.shape_cast %47 : vector<16x16xi1> to vector<1x16x16xi1>
    %49 = vector.shape_cast %48 : vector<1x16x16xi1> to vector<1x16x16xi1>
    %50 = vector.broadcast %49 : vector<1x16x16xi1> to vector<2x16x16xi1>
    %51 = vector.extract_strided_slice %40 {offsets = [0, 0, 0], sizes = [2, 16, 8], strides = [1, 1, 1]} : vector<2x16x64xf32> to vector<2x16x8xf32>
    %52 = arith.truncf %51 : vector<2x16x8xf32> to vector<2x16x8xbf16>
    %53 = vector.extract_strided_slice %42 {offsets = [0, 0, 0], sizes = [2, 16, 8], strides = [1, 1, 1]} : vector<2x16x64xf32> to vector<2x16x8xf32>
    %54 = arith.truncf %53 : vector<2x16x8xf32> to vector<2x16x8xbf16>
    %55 = vector.extract_strided_slice %44 {offsets = [0, 0, 0], sizes = [2, 16, 8], strides = [1, 1, 1]} : vector<2x16x64xf32> to vector<2x16x8xf32>
    %56 = arith.truncf %55 : vector<2x16x8xf32> to vector<2x16x8xbf16>
    %cst_20 = arith.constant dense<0.000000e+00> : vector<2x16x16xf32>
    %57 = tpu.matmul %52, %54, %cst_20 {dimension_numbers = #tpu.dot_dimension_numbers<[2], [2], [1], [1], [0, 0, 0, 1, 1, 1], [0], [0]>} : vector<2x16x8xbf16>, vector<2x16x8xbf16>, vector<2x16x16xf32> -> vector<2x16x16xf32>
    %cst_21 = arith.constant 0.353553385 : f32
    %58 = vector.broadcast %cst_21 : f32 to vector<2x16x16xf32>
    %59 = arith.mulf %57, %58 : vector<2x16x16xf32>
    %cst_22 = arith.constant 0xFF800000 : f32
    %60 = vector.broadcast %cst_22 : f32 to vector<2x16x16xf32>
    %61 = arith.select %50, %59, %60 : vector<2x16x16xi1>, vector<2x16x16xf32>
    %cst_23 = arith.constant dense<0xFF800000> : vector<2x16xf32>
    %62 = vector.multi_reduction <maximumf>, %61, %cst_23 [2] : vector<2x16x16xf32> to vector<2x16xf32>
    %63 = vector.shape_cast %62 : vector<2x16xf32> to vector<2x16x1xf32>
    %64 = vector.broadcast %63 : vector<2x16x1xf32> to vector<2x16x16xf32>
    %65 = arith.subf %61, %64 : vector<2x16x16xf32>
    %66 = math.exp %65 : vector<2x16x16xf32>
    %cst_24 = arith.constant dense<0.000000e+00> : vector<2x16xf32>
    %67 = vector.multi_reduction <add>, %66, %cst_24 [2] : vector<2x16x16xf32> to vector<2x16xf32>
    %68 = vector.shape_cast %67 : vector<2x16xf32> to vector<2x16x1xf32>
    %69 = tpu.reciprocal %68 {approx = true} : vector<2x16x1xf32> -> vector<2x16x1xf32>
    %70 = vector.broadcast %69 : vector<2x16x1xf32> to vector<2x16x16xf32>
    %71 = arith.mulf %66, %70 : vector<2x16x16xf32>
    %72 = arith.truncf %71 : vector<2x16x16xf32> to vector<2x16x16xbf16>
    %cst_25 = arith.constant dense<0.000000e+00> : vector<2x16x8xf32>
    %73 = tpu.matmul %72, %56, %cst_25 {dimension_numbers = #tpu.dot_dimension_numbers<[2], [1], [1], [2], [0, 0, 0, 1, 1, 2], [0], [0]>} : vector<2x16x16xbf16>, vector<2x16x8xbf16>, vector<2x16x8xf32> -> vector<2x16x8xf32>
    %c0_26 = arith.constant 0 : index
    %c0_27 = arith.constant 0 : index
    %c0_28 = arith.constant 0 : index
    %74 = vector.load %arg17[%c0_26, %c0_27, %c0_28] : memref<2x16x64xf32, #tpu.memory_space<vmem>>, vector<2x16x8xf32>
    tpu.vector_store %arg17[%c0_26, %c0_27, %c0_28], %73 {strides = array<i32>} : memref<2x16x64xf32, #tpu.memory_space<vmem>>, vector<2x16x8xf32>,
    %75 = vector.extract_strided_slice %40 {offsets = [0, 0, 8], sizes = [2, 16, 8], strides = [1, 1, 1]} : vector<2x16x64xf32> to vector<2x16x8xf32>
    %76 = arith.truncf %75 : vector<2x16x8xf32> to vector<2x16x8xbf16>
    %77 = vector.extract_strided_slice %42 {offsets = [0, 0, 8], sizes = [2, 16, 8], strides = [1, 1, 1]} : vector<2x16x64xf32> to vector<2x16x8xf32>
    %78 = arith.truncf %77 : vector<2x16x8xf32> to vector<2x16x8xbf16>
    %79 = vector.extract_strided_slice %44 {offsets = [0, 0, 8], sizes = [2, 16, 8], strides = [1, 1, 1]} : vector<2x16x64xf32> to vector<2x16x8xf32>
    %80 = arith.truncf %79 : vector<2x16x8xf32> to vector<2x16x8xbf16>
    %cst_29 = arith.constant dense<0.000000e+00> : vector<2x16x16xf32>
    %81 = tpu.matmul %76, %78, %cst_29 {dimension_numbers = #tpu.dot_dimension_numbers<[2], [2], [1], [1], [0, 0, 0, 1, 1, 1], [0], [0]>} : vector<2x16x8xbf16>, vector<2x16x8xbf16>, vector<2x16x16xf32> -> vector<2x16x16xf32>
    %cst_30 = arith.constant 0.353553385 : f32
    %82 = vector.broadcast %cst_30 : f32 to vector<2x16x16xf32>
    %83 = arith.mulf %81, %82 : vector<2x16x16xf32>
    %cst_31 = arith.constant 0xFF800000 : f32
    %84 = vector.broadcast %cst_31 : f32 to vector<2x16x16xf32>
    %85 = arith.select %50, %83, %84 : vector<2x16x16xi1>, vector<2x16x16xf32>
    %cst_32 = arith.constant dense<0xFF800000> : vector<2x16xf32>
    %86 = vector.multi_reduction <maximumf>, %85, %cst_32 [2] : vector<2x16x16xf32> to vector<2x16xf32>
    %87 = vector.shape_cast %86 : vector<2x16xf32> to vector<2x16x1xf32>
    %88 = vector.broadcast %87 : vector<2x16x1xf32> to vector<2x16x16xf32>
    %89 = arith.subf %85, %88 : vector<2x16x16xf32>
    %90 = math.exp %89 : vector<2x16x16xf32>
    %cst_33 = arith.constant dense<0.000000e+00> : vector<2x16xf32>
    %91 = vector.multi_reduction <add>, %90, %cst_33 [2] : vector<2x16x16xf32> to vector<2x16xf32>
    %92 = vector.shape_cast %91 : vector<2x16xf32> to vector<2x16x1xf32>
    %93 = tpu.reciprocal %92 {approx = true} : vector<2x16x1xf32> -> vector<2x16x1xf32>
    %94 = vector.broadcast %93 : vector<2x16x1xf32> to vector<2x16x16xf32>
    %95 = arith.mulf %90, %94 : vector<2x16x16xf32>
    %96 = arith.truncf %95 : vector<2x16x16xf32> to vector<2x16x16xbf16>
    %cst_34 = arith.constant dense<0.000000e+00> : vector<2x16x8xf32>
    %97 = tpu.matmul %96, %80, %cst_34 {dimension_numbers = #tpu.dot_dimension_numbers<[2], [1], [1], [2], [0, 0, 0, 1, 1, 2], [0], [0]>} : vector<2x16x16xbf16>, vector<2x16x8xbf16>, vector<2x16x8xf32> -> vector<2x16x8xf32>
    %c0_35 = arith.constant 0 : index
    %c0_36 = arith.constant 0 : index
    %c8 = arith.constant 8 : index
    %98 = vector.load %arg17[%c0_35, %c0_36, %c8] : memref<2x16x64xf32, #tpu.memory_space<vmem>>, vector<2x16x8xf32>
    tpu.vector_store %arg17[%c0_35, %c0_36, %c8], %97 {strides = array<i32>} : memref<2x16x64xf32, #tpu.memory_space<vmem>>, vector<2x16x8xf32>,
    %99 = vector.extract_strided_slice %40 {offsets = [0, 0, 16], sizes = [2, 16, 8], strides = [1, 1, 1]} : vector<2x16x64xf32> to vector<2x16x8xf32>
    %100 = arith.truncf %99 : vector<2x16x8xf32> to vector<2x16x8xbf16>
    %101 = vector.extract_strided_slice %42 {offsets = [0, 0, 16], sizes = [2, 16, 8], strides = [1, 1, 1]} : vector<2x16x64xf32> to vector<2x16x8xf32>
    %102 = arith.truncf %101 : vector<2x16x8xf32> to vector<2x16x8xbf16>
    %103 = vector.extract_strided_slice %44 {offsets = [0, 0, 16], sizes = [2, 16, 8], strides = [1, 1, 1]} : vector<2x16x64xf32> to vector<2x16x8xf32>
    %104 = arith.truncf %103 : vector<2x16x8xf32> to vector<2x16x8xbf16>
    %cst_37 = arith.constant dense<0.000000e+00> : vector<2x16x16xf32>
    %105 = tpu.matmul %100, %102, %cst_37 {dimension_numbers = #tpu.dot_dimension_numbers<[2], [2], [1], [1], [0, 0, 0, 1, 1, 1], [0], [0]>} : vector<2x16x8xbf16>, vector<2x16x8xbf16>, vector<2x16x16xf32> -> vector<2x16x16xf32>
    %cst_38 = arith.constant 0.353553385 : f32
    %106 = vector.broadcast %cst_38 : f32 to vector<2x16x16xf32>
    %107 = arith.mulf %105, %106 : vector<2x16x16xf32>
    %cst_39 = arith.constant 0xFF800000 : f32
    %108 = vector.broadcast %cst_39 : f32 to vector<2x16x16xf32>
    %109 = arith.select %50, %107, %108 : vector<2x16x16xi1>, vector<2x16x16xf32>
    %cst_40 = arith.constant dense<0xFF800000> : vector<2x16xf32>
    %110 = vector.multi_reduction <maximumf>, %109, %cst_40 [2] : vector<2x16x16xf32> to vector<2x16xf32>
    %111 = vector.shape_cast %110 : vector<2x16xf32> to vector<2x16x1xf32>
    %112 = vector.broadcast %111 : vector<2x16x1xf32> to vector<2x16x16xf32>
    %113 = arith.subf %109, %112 : vector<2x16x16xf32>
    %114 = math.exp %113 : vector<2x16x16xf32>
    %cst_41 = arith.constant dense<0.000000e+00> : vector<2x16xf32>
    %115 = vector.multi_reduction <add>, %114, %cst_41 [2] : vector<2x16x16xf32> to vector<2x16xf32>
    %116 = vector.shape_cast %115 : vector<2x16xf32> to vector<2x16x1xf32>
    %117 = tpu.reciprocal %116 {approx = true} : vector<2x16x1xf32> -> vector<2x16x1xf32>
    %118 = vector.broadcast %117 : vector<2x16x1xf32> to vector<2x16x16xf32>
    %119 = arith.mulf %114, %118 : vector<2x16x16xf32>
    %120 = arith.truncf %119 : vector<2x16x16xf32> to vector<2x16x16xbf16>
    %cst_42 = arith.constant dense<0.000000e+00> : vector<2x16x8xf32>
    %121 = tpu.matmul %120, %104, %cst_42 {dimension_numbers = #tpu.dot_dimension_numbers<[2], [1], [1], [2], [0, 0, 0, 1, 1, 2], [0], [0]>} : vector<2x16x16xbf16>, vector<2x16x8xbf16>, vector<2x16x8xf32> -> vector<2x16x8xf32>
    %c0_43 = arith.constant 0 : index
    %c0_44 = arith.constant 0 : index
    %c16 = arith.constant 16 : index
    %122 = vector.load %arg17[%c0_43, %c0_44, %c16] : memref<2x16x64xf32, #tpu.memory_space<vmem>>, vector<2x16x8xf32>
    tpu.vector_store %arg17[%c0_43, %c0_44, %c16], %121 {strides = array<i32>} : memref<2x16x64xf32, #tpu.memory_space<vmem>>, vector<2x16x8xf32>,
    %123 = vector.extract_strided_slice %40 {offsets = [0, 0, 24], sizes = [2, 16, 8], strides = [1, 1, 1]} : vector<2x16x64xf32> to vector<2x16x8xf32>
    %124 = arith.truncf %123 : vector<2x16x8xf32> to vector<2x16x8xbf16>
    %125 = vector.extract_strided_slice %42 {offsets = [0, 0, 24], sizes = [2, 16, 8], strides = [1, 1, 1]} : vector<2x16x64xf32> to vector<2x16x8xf32>
    %126 = arith.truncf %125 : vector<2x16x8xf32> to vector<2x16x8xbf16>
    %127 = vector.extract_strided_slice %44 {offsets = [0, 0, 24], sizes = [2, 16, 8], strides = [1, 1, 1]} : vector<2x16x64xf32> to vector<2x16x8xf32>
    %128 = arith.truncf %127 : vector<2x16x8xf32> to vector<2x16x8xbf16>
    %cst_45 = arith.constant dense<0.000000e+00> : vector<2x16x16xf32>
    %129 = tpu.matmul %124, %126, %cst_45 {dimension_numbers = #tpu.dot_dimension_numbers<[2], [2], [1], [1], [0, 0, 0, 1, 1, 1], [0], [0]>} : vector<2x16x8xbf16>, vector<2x16x8xbf16>, vector<2x16x16xf32> -> vector<2x16x16xf32>
    %cst_46 = arith.constant 0.353553385 : f32
    %130 = vector.broadcast %cst_46 : f32 to vector<2x16x16xf32>
    %131 = arith.mulf %129, %130 : vector<2x16x16xf32>
    %cst_47 = arith.constant 0xFF800000 : f32
    %132 = vector.broadcast %cst_47 : f32 to vector<2x16x16xf32>
    %133 = arith.select %50, %131, %132 : vector<2x16x16xi1>, vector<2x16x16xf32>
    %cst_48 = arith.constant dense<0xFF800000> : vector<2x16xf32>
    %134 = vector.multi_reduction <maximumf>, %133, %cst_48 [2] : vector<2x16x16xf32> to vector<2x16xf32>
    %135 = vector.shape_cast %134 : vector<2x16xf32> to vector<2x16x1xf32>
    %136 = vector.broadcast %135 : vector<2x16x1xf32> to vector<2x16x16xf32>
    %137 = arith.subf %133, %136 : vector<2x16x16xf32>
    %138 = math.exp %137 : vector<2x16x16xf32>
    %cst_49 = arith.constant dense<0.000000e+00> : vector<2x16xf32>
    %139 = vector.multi_reduction <add>, %138, %cst_49 [2] : vector<2x16x16xf32> to vector<2x16xf32>
    %140 = vector.shape_cast %139 : vector<2x16xf32> to vector<2x16x1xf32>
    %141 = tpu.reciprocal %140 {approx = true} : vector<2x16x1xf32> -> vector<2x16x1xf32>
    %142 = vector.broadcast %141 : vector<2x16x1xf32> to vector<2x16x16xf32>
    %143 = arith.mulf %138, %142 : vector<2x16x16xf32>
    %144 = arith.truncf %143 : vector<2x16x16xf32> to vector<2x16x16xbf16>
    %cst_50 = arith.constant dense<0.000000e+00> : vector<2x16x8xf32>
    %145 = tpu.matmul %144, %128, %cst_50 {dimension_numbers = #tpu.dot_dimension_numbers<[2], [1], [1], [2], [0, 0, 0, 1, 1, 2], [0], [0]>} : vector<2x16x16xbf16>, vector<2x16x8xbf16>, vector<2x16x8xf32> -> vector<2x16x8xf32>
    %c0_51 = arith.constant 0 : index
    %c0_52 = arith.constant 0 : index
    %c24 = arith.constant 24 : index
    %146 = vector.load %arg17[%c0_51, %c0_52, %c24] : memref<2x16x64xf32, #tpu.memory_space<vmem>>, vector<2x16x8xf32>
    tpu.vector_store %arg17[%c0_51, %c0_52, %c24], %145 {strides = array<i32>} : memref<2x16x64xf32, #tpu.memory_space<vmem>>, vector<2x16x8xf32>,
    %147 = vector.extract_strided_slice %40 {offsets = [0, 0, 32], sizes = [2, 16, 8], strides = [1, 1, 1]} : vector<2x16x64xf32> to vector<2x16x8xf32>
    %148 = arith.truncf %147 : vector<2x16x8xf32> to vector<2x16x8xbf16>
    %149 = vector.extract_strided_slice %42 {offsets = [0, 0, 32], sizes = [2, 16, 8], strides = [1, 1, 1]} : vector<2x16x64xf32> to vector<2x16x8xf32>
    %150 = arith.truncf %149 : vector<2x16x8xf32> to vector<2x16x8xbf16>
    %151 = vector.extract_strided_slice %44 {offsets = [0, 0, 32], sizes = [2, 16, 8], strides = [1, 1, 1]} : vector<2x16x64xf32> to vector<2x16x8xf32>
    %152 = arith.truncf %151 : vector<2x16x8xf32> to vector<2x16x8xbf16>
    %cst_53 = arith.constant dense<0.000000e+00> : vector<2x16x16xf32>
    %153 = tpu.matmul %148, %150, %cst_53 {dimension_numbers = #tpu.dot_dimension_numbers<[2], [2], [1], [1], [0, 0, 0, 1, 1, 1], [0], [0]>} : vector<2x16x8xbf16>, vector<2x16x8xbf16>, vector<2x16x16xf32> -> vector<2x16x16xf32>
    %cst_54 = arith.constant 0.353553385 : f32
    %154 = vector.broadcast %cst_54 : f32 to vector<2x16x16xf32>
    %155 = arith.mulf %153, %154 : vector<2x16x16xf32>
    %cst_55 = arith.constant 0xFF800000 : f32
    %156 = vector.broadcast %cst_55 : f32 to vector<2x16x16xf32>
    %157 = arith.select %50, %155, %156 : vector<2x16x16xi1>, vector<2x16x16xf32>
    %cst_56 = arith.constant dense<0xFF800000> : vector<2x16xf32>
    %158 = vector.multi_reduction <maximumf>, %157, %cst_56 [2] : vector<2x16x16xf32> to vector<2x16xf32>
    %159 = vector.shape_cast %158 : vector<2x16xf32> to vector<2x16x1xf32>
    %160 = vector.broadcast %159 : vector<2x16x1xf32> to vector<2x16x16xf32>
    %161 = arith.subf %157, %160 : vector<2x16x16xf32>
    %162 = math.exp %161 : vector<2x16x16xf32>
    %cst_57 = arith.constant dense<0.000000e+00> : vector<2x16xf32>
    %163 = vector.multi_reduction <add>, %162, %cst_57 [2] : vector<2x16x16xf32> to vector<2x16xf32>
    %164 = vector.shape_cast %163 : vector<2x16xf32> to vector<2x16x1xf32>
    %165 = tpu.reciprocal %164 {approx = true} : vector<2x16x1xf32> -> vector<2x16x1xf32>
    %166 = vector.broadcast %165 : vector<2x16x1xf32> to vector<2x16x16xf32>
    %167 = arith.mulf %162, %166 : vector<2x16x16xf32>
    %168 = arith.truncf %167 : vector<2x16x16xf32> to vector<2x16x16xbf16>
    %cst_58 = arith.constant dense<0.000000e+00> : vector<2x16x8xf32>
    %169 = tpu.matmul %168, %152, %cst_58 {dimension_numbers = #tpu.dot_dimension_numbers<[2], [1], [1], [2], [0, 0, 0, 1, 1, 2], [0], [0]>} : vector<2x16x16xbf16>, vector<2x16x8xbf16>, vector<2x16x8xf32> -> vector<2x16x8xf32>
    %c0_59 = arith.constant 0 : index
    %c0_60 = arith.constant 0 : index
    %c32 = arith.constant 32 : index
    %170 = vector.load %arg17[%c0_59, %c0_60, %c32] : memref<2x16x64xf32, #tpu.memory_space<vmem>>, vector<2x16x8xf32>
    tpu.vector_store %arg17[%c0_59, %c0_60, %c32], %169 {strides = array<i32>} : memref<2x16x64xf32, #tpu.memory_space<vmem>>, vector<2x16x8xf32>,
    %171 = vector.extract_strided_slice %40 {offsets = [0, 0, 40], sizes = [2, 16, 8], strides = [1, 1, 1]} : vector<2x16x64xf32> to vector<2x16x8xf32>
    %172 = arith.truncf %171 : vector<2x16x8xf32> to vector<2x16x8xbf16>
    %173 = vector.extract_strided_slice %42 {offsets = [0, 0, 40], sizes = [2, 16, 8], strides = [1, 1, 1]} : vector<2x16x64xf32> to vector<2x16x8xf32>
    %174 = arith.truncf %173 : vector<2x16x8xf32> to vector<2x16x8xbf16>
    %175 = vector.extract_strided_slice %44 {offsets = [0, 0, 40], sizes = [2, 16, 8], strides = [1, 1, 1]} : vector<2x16x64xf32> to vector<2x16x8xf32>
    %176 = arith.truncf %175 : vector<2x16x8xf32> to vector<2x16x8xbf16>
    %cst_61 = arith.constant dense<0.000000e+00> : vector<2x16x16xf32>
    %177 = tpu.matmul %172, %174, %cst_61 {dimension_numbers = #tpu.dot_dimension_numbers<[2], [2], [1], [1], [0, 0, 0, 1, 1, 1], [0], [0]>} : vector<2x16x8xbf16>, vector<2x16x8xbf16>, vector<2x16x16xf32> -> vector<2x16x16xf32>
    %cst_62 = arith.constant 0.353553385 : f32
    %178 = vector.broadcast %cst_62 : f32 to vector<2x16x16xf32>
    %179 = arith.mulf %177, %178 : vector<2x16x16xf32>
    %cst_63 = arith.constant 0xFF800000 : f32
    %180 = vector.broadcast %cst_63 : f32 to vector<2x16x16xf32>
    %181 = arith.select %50, %179, %180 : vector<2x16x16xi1>, vector<2x16x16xf32>
    %cst_64 = arith.constant dense<0xFF800000> : vector<2x16xf32>
    %182 = vector.multi_reduction <maximumf>, %181, %cst_64 [2] : vector<2x16x16xf32> to vector<2x16xf32>
    %183 = vector.shape_cast %182 : vector<2x16xf32> to vector<2x16x1xf32>
    %184 = vector.broadcast %183 : vector<2x16x1xf32> to vector<2x16x16xf32>
    %185 = arith.subf %181, %184 : vector<2x16x16xf32>
    %186 = math.exp %185 : vector<2x16x16xf32>
    %cst_65 = arith.constant dense<0.000000e+00> : vector<2x16xf32>
    %187 = vector.multi_reduction <add>, %186, %cst_65 [2] : vector<2x16x16xf32> to vector<2x16xf32>
    %188 = vector.shape_cast %187 : vector<2x16xf32> to vector<2x16x1xf32>
    %189 = tpu.reciprocal %188 {approx = true} : vector<2x16x1xf32> -> vector<2x16x1xf32>
    %190 = vector.broadcast %189 : vector<2x16x1xf32> to vector<2x16x16xf32>
    %191 = arith.mulf %186, %190 : vector<2x16x16xf32>
    %192 = arith.truncf %191 : vector<2x16x16xf32> to vector<2x16x16xbf16>
    %cst_66 = arith.constant dense<0.000000e+00> : vector<2x16x8xf32>
    %193 = tpu.matmul %192, %176, %cst_66 {dimension_numbers = #tpu.dot_dimension_numbers<[2], [1], [1], [2], [0, 0, 0, 1, 1, 2], [0], [0]>} : vector<2x16x16xbf16>, vector<2x16x8xbf16>, vector<2x16x8xf32> -> vector<2x16x8xf32>
    %c0_67 = arith.constant 0 : index
    %c0_68 = arith.constant 0 : index
    %c40 = arith.constant 40 : index
    %194 = vector.load %arg17[%c0_67, %c0_68, %c40] : memref<2x16x64xf32, #tpu.memory_space<vmem>>, vector<2x16x8xf32>
    tpu.vector_store %arg17[%c0_67, %c0_68, %c40], %193 {strides = array<i32>} : memref<2x16x64xf32, #tpu.memory_space<vmem>>, vector<2x16x8xf32>,
    %195 = vector.extract_strided_slice %40 {offsets = [0, 0, 48], sizes = [2, 16, 8], strides = [1, 1, 1]} : vector<2x16x64xf32> to vector<2x16x8xf32>
    %196 = arith.truncf %195 : vector<2x16x8xf32> to vector<2x16x8xbf16>
    %197 = vector.extract_strided_slice %42 {offsets = [0, 0, 48], sizes = [2, 16, 8], strides = [1, 1, 1]} : vector<2x16x64xf32> to vector<2x16x8xf32>
    %198 = arith.truncf %197 : vector<2x16x8xf32> to vector<2x16x8xbf16>
    %199 = vector.extract_strided_slice %44 {offsets = [0, 0, 48], sizes = [2, 16, 8], strides = [1, 1, 1]} : vector<2x16x64xf32> to vector<2x16x8xf32>
    %200 = arith.truncf %199 : vector<2x16x8xf32> to vector<2x16x8xbf16>
    %cst_69 = arith.constant dense<0.000000e+00> : vector<2x16x16xf32>
    %201 = tpu.matmul %196, %198, %cst_69 {dimension_numbers = #tpu.dot_dimension_numbers<[2], [2], [1], [1], [0, 0, 0, 1, 1, 1], [0], [0]>} : vector<2x16x8xbf16>, vector<2x16x8xbf16>, vector<2x16x16xf32> -> vector<2x16x16xf32>
    %cst_70 = arith.constant 0.353553385 : f32
    %202 = vector.broadcast %cst_70 : f32 to vector<2x16x16xf32>
    %203 = arith.mulf %201, %202 : vector<2x16x16xf32>
    %cst_71 = arith.constant 0xFF800000 : f32
    %204 = vector.broadcast %cst_71 : f32 to vector<2x16x16xf32>
    %205 = arith.select %50, %203, %204 : vector<2x16x16xi1>, vector<2x16x16xf32>
    %cst_72 = arith.constant dense<0xFF800000> : vector<2x16xf32>
    %206 = vector.multi_reduction <maximumf>, %205, %cst_72 [2] : vector<2x16x16xf32> to vector<2x16xf32>
    %207 = vector.shape_cast %206 : vector<2x16xf32> to vector<2x16x1xf32>
    %208 = vector.broadcast %207 : vector<2x16x1xf32> to vector<2x16x16xf32>
    %209 = arith.subf %205, %208 : vector<2x16x16xf32>
    %210 = math.exp %209 : vector<2x16x16xf32>
    %cst_73 = arith.constant dense<0.000000e+00> : vector<2x16xf32>
    %211 = vector.multi_reduction <add>, %210, %cst_73 [2] : vector<2x16x16xf32> to vector<2x16xf32>
    %212 = vector.shape_cast %211 : vector<2x16xf32> to vector<2x16x1xf32>
    %213 = tpu.reciprocal %212 {approx = true} : vector<2x16x1xf32> -> vector<2x16x1xf32>
    %214 = vector.broadcast %213 : vector<2x16x1xf32> to vector<2x16x16xf32>
    %215 = arith.mulf %210, %214 : vector<2x16x16xf32>
    %216 = arith.truncf %215 : vector<2x16x16xf32> to vector<2x16x16xbf16>
    %cst_74 = arith.constant dense<0.000000e+00> : vector<2x16x8xf32>
    %217 = tpu.matmul %216, %200, %cst_74 {dimension_numbers = #tpu.dot_dimension_numbers<[2], [1], [1], [2], [0, 0, 0, 1, 1, 2], [0], [0]>} : vector<2x16x16xbf16>, vector<2x16x8xbf16>, vector<2x16x8xf32> -> vector<2x16x8xf32>
    %c0_75 = arith.constant 0 : index
    %c0_76 = arith.constant 0 : index
    %c48 = arith.constant 48 : index
    %218 = vector.load %arg17[%c0_75, %c0_76, %c48] : memref<2x16x64xf32, #tpu.memory_space<vmem>>, vector<2x16x8xf32>
    tpu.vector_store %arg17[%c0_75, %c0_76, %c48], %217 {strides = array<i32>} : memref<2x16x64xf32, #tpu.memory_space<vmem>>, vector<2x16x8xf32>,
    %219 = vector.extract_strided_slice %40 {offsets = [0, 0, 56], sizes = [2, 16, 8], strides = [1, 1, 1]} : vector<2x16x64xf32> to vector<2x16x8xf32>
    %220 = arith.truncf %219 : vector<2x16x8xf32> to vector<2x16x8xbf16>
    %221 = vector.extract_strided_slice %42 {offsets = [0, 0, 56], sizes = [2, 16, 8], strides = [1, 1, 1]} : vector<2x16x64xf32> to vector<2x16x8xf32>
    %222 = arith.truncf %221 : vector<2x16x8xf32> to vector<2x16x8xbf16>
    %223 = vector.extract_strided_slice %44 {offsets = [0, 0, 56], sizes = [2, 16, 8], strides = [1, 1, 1]} : vector<2x16x64xf32> to vector<2x16x8xf32>
    %224 = arith.truncf %223 : vector<2x16x8xf32> to vector<2x16x8xbf16>
    %cst_77 = arith.constant dense<0.000000e+00> : vector<2x16x16xf32>
    %225 = tpu.matmul %220, %222, %cst_77 {dimension_numbers = #tpu.dot_dimension_numbers<[2], [2], [1], [1], [0, 0, 0, 1, 1, 1], [0], [0]>} : vector<2x16x8xbf16>, vector<2x16x8xbf16>, vector<2x16x16xf32> -> vector<2x16x16xf32>
    %cst_78 = arith.constant 0.353553385 : f32
    %226 = vector.broadcast %cst_78 : f32 to vector<2x16x16xf32>
    %227 = arith.mulf %225, %226 : vector<2x16x16xf32>
    %cst_79 = arith.constant 0xFF800000 : f32
    %228 = vector.broadcast %cst_79 : f32 to vector<2x16x16xf32>
    %229 = arith.select %50, %227, %228 : vector<2x16x16xi1>, vector<2x16x16xf32>
    %cst_80 = arith.constant dense<0xFF800000> : vector<2x16xf32>
    %230 = vector.multi_reduction <maximumf>, %229, %cst_80 [2] : vector<2x16x16xf32> to vector<2x16xf32>
    %231 = vector.shape_cast %230 : vector<2x16xf32> to vector<2x16x1xf32>
    %232 = vector.broadcast %231 : vector<2x16x1xf32> to vector<2x16x16xf32>
    %233 = arith.subf %229, %232 : vector<2x16x16xf32>
    %234 = math.exp %233 : vector<2x16x16xf32>
    %cst_81 = arith.constant dense<0.000000e+00> : vector<2x16xf32>
    %235 = vector.multi_reduction <add>, %234, %cst_81 [2] : vector<2x16x16xf32> to vector<2x16xf32>
    %236 = vector.shape_cast %235 : vector<2x16xf32> to vector<2x16x1xf32>
    %237 = tpu.reciprocal %236 {approx = true} : vector<2x16x1xf32> -> vector<2x16x1xf32>
    %238 = vector.broadcast %237 : vector<2x16x1xf32> to vector<2x16x16xf32>
    %239 = arith.mulf %234, %238 : vector<2x16x16xf32>
    %240 = arith.truncf %239 : vector<2x16x16xf32> to vector<2x16x16xbf16>
    %cst_82 = arith.constant dense<0.000000e+00> : vector<2x16x8xf32>
    %241 = tpu.matmul %240, %224, %cst_82 {dimension_numbers = #tpu.dot_dimension_numbers<[2], [1], [1], [2], [0, 0, 0, 1, 1, 2], [0], [0]>} : vector<2x16x16xbf16>, vector<2x16x8xbf16>, vector<2x16x8xf32> -> vector<2x16x8xf32>
    %c0_83 = arith.constant 0 : index
    %c0_84 = arith.constant 0 : index
    %c56 = arith.constant 56 : index
    %242 = vector.load %arg17[%c0_83, %c0_84, %c56] : memref<2x16x64xf32, #tpu.memory_space<vmem>>, vector<2x16x8xf32>
    tpu.vector_store %arg17[%c0_83, %c0_84, %c56], %241 {strides = array<i32>} : memref<2x16x64xf32, #tpu.memory_space<vmem>>, vector<2x16x8xf32>,
    %c0_85 = arith.constant 0 : index
    %c0_86 = arith.constant 0 : index
    %c0_87 = arith.constant 0 : index
    %243 = vector.load %arg17[%c0_85, %c0_86, %c0_87] : memref<2x16x64xf32, #tpu.memory_space<vmem>>, vector<2x16x64xf32>
    %244 = vector.shape_cast %243 : vector<2x16x64xf32> to vector<32x64xf32>
    %245 = arith.truncf %244 : vector<32x64xf32> to vector<32x64xbf16>
    %c0_88 = arith.constant 0 : index
    %c0_89 = arith.constant 0 : index
    %c0_90 = arith.constant 0 : index
    %246 = vector.load %arg7[%c0_88, %c0_89, %c0_90] : memref<1x64x64xbf16, #tpu.memory_space<vmem>>, vector<1x64x64xbf16>
    %247 = vector.shape_cast %246 : vector<1x64x64xbf16> to vector<64x64xbf16>
    %cst_91 = arith.constant dense<0.000000e+00> : vector<32x64xf32>
    %248 = tpu.matmul %245, %247, %cst_91 {dimension_numbers = #tpu.dot_dimension_numbers<[1], [0], [0], [1], [0, 0, 1, 1], [], []>} : vector<32x64xbf16>, vector<64x64xbf16>, vector<32x64xf32> -> vector<32x64xf32>
    %c0_92 = arith.constant 0 : index
    %c0_93 = arith.constant 0 : index
    %c0_94 = arith.constant 0 : index
    %249 = vector.load %arg8[%c0_92, %c0_93, %c0_94] : memref<1x1x64xf32, #tpu.memory_space<vmem>>, vector<1x1x64xf32>
    %250 = vector.shape_cast %249 : vector<1x1x64xf32> to vector<1x64xf32>
    %251 = vector.broadcast %250 : vector<1x64xf32> to vector<32x64xf32>
    %252 = arith.addf %248, %251 : vector<32x64xf32>
    %253 = arith.addf %4, %252 : vector<32x64xf32>
    %cst_95 = arith.constant dense<0.000000e+00> : vector<32xf32>
    %254 = vector.multi_reduction <add>, %253, %cst_95 [1] : vector<32x64xf32> to vector<32xf32>
    %255 = vector.shape_cast %254 : vector<32xf32> to vector<32x1xf32>
    %cst_96 = arith.constant 6.400000e+01 : f32
    %256 = vector.broadcast %cst_96 : f32 to vector<32x1xf32>
    %257 = arith.divf %255, %256 : vector<32x1xf32>
    %258 = vector.broadcast %257 : vector<32x1xf32> to vector<32x64xf32>
    %259 = arith.subf %253, %258 : vector<32x64xf32>
    %260 = arith.mulf %259, %259 : vector<32x64xf32>
    %cst_97 = arith.constant dense<0.000000e+00> : vector<32xf32>
    %261 = vector.multi_reduction <add>, %260, %cst_97 [1] : vector<32x64xf32> to vector<32xf32>
    %262 = vector.shape_cast %261 : vector<32xf32> to vector<32x1xf32>
    %cst_98 = arith.constant 6.400000e+01 : f32
    %263 = vector.broadcast %cst_98 : f32 to vector<32x1xf32>
    %264 = arith.divf %262, %263 : vector<32x1xf32>
    %265 = vector.broadcast %257 : vector<32x1xf32> to vector<32x64xf32>
    %266 = arith.subf %253, %265 : vector<32x64xf32>
    %cst_99 = arith.constant 9.99999974E-6 : f32
    %267 = vector.broadcast %cst_99 : f32 to vector<32x1xf32>
    %268 = arith.addf %264, %267 : vector<32x1xf32>
    %269 = math.rsqrt %268 : vector<32x1xf32>
    %270 = vector.broadcast %269 : vector<32x1xf32> to vector<32x64xf32>
    %271 = arith.mulf %266, %270 : vector<32x64xf32>
    %c0_100 = arith.constant 0 : index
    %c0_101 = arith.constant 0 : index
    %c0_102 = arith.constant 0 : index
    %272 = vector.load %arg9[%c0_100, %c0_101, %c0_102] : memref<1x1x64xf32, #tpu.memory_space<vmem>>, vector<1x1x64xf32>
    %273 = vector.shape_cast %272 : vector<1x1x64xf32> to vector<1x64xf32>
    %274 = vector.broadcast %273 : vector<1x64xf32> to vector<32x64xf32>
    %275 = arith.mulf %271, %274 : vector<32x64xf32>
    %c0_103 = arith.constant 0 : index
    %c0_104 = arith.constant 0 : index
    %c0_105 = arith.constant 0 : index
    %276 = vector.load %arg10[%c0_103, %c0_104, %c0_105] : memref<1x1x64xf32, #tpu.memory_space<vmem>>, vector<1x1x64xf32>
    %277 = vector.shape_cast %276 : vector<1x1x64xf32> to vector<1x64xf32>
    %278 = vector.broadcast %277 : vector<1x64xf32> to vector<32x64xf32>
    %279 = arith.addf %275, %278 : vector<32x64xf32>
    %280 = arith.truncf %279 : vector<32x64xf32> to vector<32x64xbf16>
    %c0_106 = arith.constant 0 : index
    %c0_107 = arith.constant 0 : index
    %c0_108 = arith.constant 0 : index
    %281 = vector.load %arg11[%c0_106, %c0_107, %c0_108] : memref<1x64x256xbf16, #tpu.memory_space<vmem>>, vector<1x64x256xbf16>
    %282 = vector.shape_cast %281 : vector<1x64x256xbf16> to vector<64x256xbf16>
    %cst_109 = arith.constant dense<0.000000e+00> : vector<32x256xf32>
    %283 = tpu.matmul %280, %282, %cst_109 {dimension_numbers = #tpu.dot_dimension_numbers<[1], [0], [0], [1], [0, 0, 1, 1], [], []>} : vector<32x64xbf16>, vector<64x256xbf16>, vector<32x256xf32> -> vector<32x256xf32>
    %c0_110 = arith.constant 0 : index
    %c0_111 = arith.constant 0 : index
    %c0_112 = arith.constant 0 : index
    %284 = vector.load %arg12[%c0_110, %c0_111, %c0_112] : memref<1x1x256xf32, #tpu.memory_space<vmem>>, vector<1x1x256xf32>
    %285 = vector.shape_cast %284 : vector<1x1x256xf32> to vector<1x256xf32>
    %286 = vector.broadcast %285 : vector<1x256xf32> to vector<32x256xf32>
    %287 = arith.addf %283, %286 : vector<32x256xf32>
    %cst_113 = arith.constant 5.000000e-01 : f32
    %288 = vector.broadcast %cst_113 : f32 to vector<32x256xf32>
    %289 = arith.mulf %288, %287 : vector<32x256xf32>
    %cst_114 = arith.constant 4.471500e-02 : f32
    %290 = vector.broadcast %cst_114 : f32 to vector<32x256xf32>
    %291 = arith.mulf %290, %287 : vector<32x256xf32>
    %292 = arith.mulf %291, %287 : vector<32x256xf32>
    %293 = arith.mulf %292, %287 : vector<32x256xf32>
    %294 = arith.addf %287, %293 : vector<32x256xf32>
    %cst_115 = arith.constant 0.797884583 : f32
    %295 = vector.broadcast %cst_115 : f32 to vector<32x256xf32>
    %296 = arith.mulf %295, %294 : vector<32x256xf32>
    %297 = math.tanh %296 : vector<32x256xf32>
    %cst_116 = arith.constant 1.000000e+00 : f32
    %298 = vector.broadcast %cst_116 : f32 to vector<32x256xf32>
    %299 = arith.addf %298, %297 : vector<32x256xf32>
    %300 = arith.mulf %289, %299 : vector<32x256xf32>
    %301 = arith.truncf %300 : vector<32x256xf32> to vector<32x256xbf16>
    %c0_117 = arith.constant 0 : index
    %c0_118 = arith.constant 0 : index
    %c0_119 = arith.constant 0 : index
    %302 = vector.load %arg13[%c0_117, %c0_118, %c0_119] : memref<1x256x64xbf16, #tpu.memory_space<vmem>>, vector<1x256x64xbf16>
    %303 = vector.shape_cast %302 : vector<1x256x64xbf16> to vector<256x64xbf16>
    %cst_120 = arith.constant dense<0.000000e+00> : vector<32x64xf32>
    %304 = tpu.matmul %301, %303, %cst_120 {dimension_numbers = #tpu.dot_dimension_numbers<[1], [0], [0], [1], [0, 0, 1, 1], [], []>} : vector<32x256xbf16>, vector<256x64xbf16>, vector<32x64xf32> -> vector<32x64xf32>
    %c0_121 = arith.constant 0 : index
    %c0_122 = arith.constant 0 : index
    %c0_123 = arith.constant 0 : index
    %305 = vector.load %arg14[%c0_121, %c0_122, %c0_123] : memref<1x1x64xf32, #tpu.memory_space<vmem>>, vector<1x1x64xf32>
    %306 = vector.shape_cast %305 : vector<1x1x64xf32> to vector<1x64xf32>
    %307 = vector.broadcast %306 : vector<1x64xf32> to vector<32x64xf32>
    %308 = arith.addf %304, %307 : vector<32x64xf32>
    %309 = arith.addf %253, %308 : vector<32x64xf32>
    %310 = vector.shape_cast %309 : vector<32x64xf32> to vector<2x16x64xf32>
    %c0_124 = arith.constant 0 : index
    %c0_125 = arith.constant 0 : index
    %c0_126 = arith.constant 0 : index
    %311 = vector.load %arg16[%c0_124, %c0_125, %c0_126] : memref<2x16x64xf32, #tpu.memory_space<vmem>>, vector<2x16x64xf32>
    tpu.vector_store %arg16[%c0_124, %c0_125, %c0_126], %310 {strides = array<i32>} : memref<2x16x64xf32, #tpu.memory_space<vmem>>, vector<2x16x64xf32>,
    %c1_i32 = arith.constant 1 : i32
    %312 = arith.cmpi eq, %arg1, %c1_i32 : i32
    %313 = arith.extui %312 : i1 to i32
    %c0_i32_127 = arith.constant 0 : i32
    %314 = arith.cmpi ne, %313, %c0_i32_127 : i32
    scf.if %314 {
      %c0_128 = arith.constant 0 : index
      %c0_129 = arith.constant 0 : index
      %c0_130 = arith.constant 0 : index
      %315 = vector.load %arg15[%c0_128, %c0_129, %c0_130] : memref<2x16x64xf32, #tpu.memory_space<vmem>>, vector<2x16x64xf32>
      tpu.vector_store %arg15[%c0_128, %c0_129, %c0_130], %310 {strides = array<i32>} : memref<2x16x64xf32, #tpu.memory_space<vmem>>, vector<2x16x64xf32>,
    } else {
    }
    return
  }
  func.func @transform_0(%arg0: i32, %arg1: i32) -> (i32, i32, i32) {
    %c0_i32 = arith.constant 0 : i32
    %c0_i32_0 = arith.constant 0 : i32
    %c0_i32_1 = arith.constant 0 : i32
    return %arg0, %c0_i32, %c0_i32_0 : i32, i32, i32
  }
  func.func @transform_1(%arg0: i32, %arg1: i32) -> (i32, i32, i32) {
    %c0_i32 = arith.constant 0 : i32
    %c0_i32_0 = arith.constant 0 : i32
    %c0_i32_1 = arith.constant 0 : i32
    return %arg1, %c0_i32, %c0_i32_0 : i32, i32, i32
  }
  func.func @transform_2(%arg0: i32, %arg1: i32) -> (i32, i32, i32) {
    %c0_i32 = arith.constant 0 : i32
    %c0_i32_0 = arith.constant 0 : i32
    %c0_i32_1 = arith.constant 0 : i32
    return %arg1, %c0_i32, %c0_i32_0 : i32, i32, i32
  }
  func.func @transform_3(%arg0: i32, %arg1: i32) -> (i32, i32, i32) {
    %c0_i32 = arith.constant 0 : i32
    %c0_i32_0 = arith.constant 0 : i32
    %c0_i32_1 = arith.constant 0 : i32
    return %arg1, %c0_i32, %c0_i32_0 : i32, i32, i32
  }
  func.func @transform_4(%arg0: i32, %arg1: i32) -> (i32, i32, i32) {
    %c0_i32 = arith.constant 0 : i32
    %c0_i32_0 = arith.constant 0 : i32
    %c0_i32_1 = arith.constant 0 : i32
    return %arg1, %c0_i32, %c0_i32_0 : i32, i32, i32
  }
  func.func @transform_5(%arg0: i32, %arg1: i32) -> (i32, i32, i32) {
    %c0_i32 = arith.constant 0 : i32
    %c0_i32_0 = arith.constant 0 : i32
    %c0_i32_1 = arith.constant 0 : i32
    return %arg1, %c0_i32, %c0_i32_0 : i32, i32, i32
  }
  func.func @transform_6(%arg0: i32, %arg1: i32) -> (i32, i32, i32) {
    %c0_i32 = arith.constant 0 : i32
    %c0_i32_0 = arith.constant 0 : i32
    %c0_i32_1 = arith.constant 0 : i32
    return %arg1, %c0_i32, %c0_i32_0 : i32, i32, i32
  }
  func.func @transform_7(%arg0: i32, %arg1: i32) -> (i32, i32, i32) {
    %c0_i32 = arith.constant 0 : i32
    %c0_i32_0 = arith.constant 0 : i32
    %c0_i32_1 = arith.constant 0 : i32
    return %arg1, %c0_i32, %c0_i32_0 : i32, i32, i32
  }
  func.func @transform_8(%arg0: i32, %arg1: i32) -> (i32, i32, i32) {
    %c0_i32 = arith.constant 0 : i32
    %c0_i32_0 = arith.constant 0 : i32
    %c0_i32_1 = arith.constant 0 : i32
    return %arg1, %c0_i32, %c0_i32_0 : i32, i32, i32
  }
  func.func @transform_9(%arg0: i32, %arg1: i32) -> (i32, i32, i32) {
    %c0_i32 = arith.constant 0 : i32
    %c0_i32_0 = arith.constant 0 : i32
    %c0_i32_1 = arith.constant 0 : i32
    return %arg1, %c0_i32, %c0_i32_0 : i32, i32, i32
  }
  func.func @transform_10(%arg0: i32, %arg1: i32) -> (i32, i32, i32) {
    %c0_i32 = arith.constant 0 : i32
    %c0_i32_0 = arith.constant 0 : i32
    %c0_i32_1 = arith.constant 0 : i32
    return %arg1, %c0_i32, %c0_i32_0 : i32, i32, i32
  }
  func.func @transform_11(%arg0: i32, %arg1: i32) -> (i32, i32, i32) {
    %c0_i32 = arith.constant 0 : i32
    %c0_i32_0 = arith.constant 0 : i32
    %c0_i32_1 = arith.constant 0 : i32
    return %arg1, %c0_i32, %c0_i32_0 : i32, i32, i32
  }
  func.func @transform_12(%arg0: i32, %arg1: i32) -> (i32, i32, i32) {
    %c0_i32 = arith.constant 0 : i32
    %c0_i32_0 = arith.constant 0 : i32
    %c0_i32_1 = arith.constant 0 : i32
    return %arg1, %c0_i32, %c0_i32_0 : i32, i32, i32
  }
  func.func @transform_13(%arg0: i32, %arg1: i32) -> (i32, i32, i32) {
    %c0_i32 = arith.constant 0 : i32
    %c0_i32_0 = arith.constant 0 : i32
    %c0_i32_1 = arith.constant 0 : i32
    return %arg0, %c0_i32, %c0_i32_0 : i32, i32, i32
  }
}

</mosaic_0001>

<bundles_post_ra>
// kernel: tpu_custom_call.1
= control target key start
LH: loop header
LB: loop body
LE: loop exit
PB: predicated region body
PF: predicated region fallthrough
CT: control target
= control target key end

     0   :  { %s6782_s0 = inlined_call_operand.hbm [shape: f32[2,16,64], index: 0, kind: input, shape index: {}]   ;;  %s6783_s1 = inlined_call_operand.hbm [shape: f32[2,1,64], index: 1, kind: input, shape index: {}]   ;;  %s6784_s2 = inlined_call_operand.hbm [shape: f32[2,1,64], index: 2, kind: input, shape index: {}]   ;;  %s6785_s3 = inlined_call_operand.hbm [shape: bf16[2,64,192], index: 3, kind: input, shape index: {}]   ;;  %s6786_s4 = inlined_call_operand.hbm [shape: f32[2,1,192], index: 4, kind: input, shape index: {}]   ;;  %s6787_s5 = inlined_call_operand.hbm [shape: bf16[2,64,64], index: 5, kind: input, shape index: {}]   ;;  %s6788_s6 = inlined_call_operand.hbm [shape: f32[2,1,64], index: 6, kind: input, shape index: {}]   ;;  %s6789_s7 = inlined_call_operand.hbm [shape: f32[2,1,64], index: 7, kind: input, shape index: {}]   ;;  %s6790_s8 = inlined_call_operand.hbm [shape: f32[2,1,64], index: 8, kind: input, shape index: {}]   ;;  %s6791_s9 = inlined_call_operand.hbm [shape: bf16[2,64,256], index: 9, kind: input, shape index: {}]   ;;  %s6792_s10 = inlined_call_operand.hbm [shape: f32[2,1,256], index: 10, kind: input, shape index: {}]   ;;  %s6793_s11 = inlined_call_operand.hbm [shape: bf16[2,256,64], index: 11, kind: input, shape index: {}]   ;;  %s6794_s12 = inlined_call_operand.hbm [shape: f32[2,1,64], index: 12, kind: input, shape index: {}]   ;;  %s6795_s13 = inlined_call_operand.hbm [shape: f32[2,16,64], index: 13, kind: output, shape index: {}]  }
   0x1   :  { %6823 = sst [smem:[#allocation38_spill]] %s6783_s1 }
   0x2   :  { %6824 = sst [smem:[#allocation39_spill]] %s6784_s2 }
   0x3   :  { %6825 = sst [smem:[#allocation40_spill]] %s6785_s3 }
   0x4   :  { %6826 = sst [smem:[#allocation41_spill]] %s6787_s5 }
   0x5   :  { %6827 = sst [smem:[#allocation42_spill]] %s6789_s7 }
   0x6   :  { %6828 = sst [smem:[#allocation43_spill]] %s6790_s8 }
   0x7   :  { %6829 = sst [smem:[#allocation44_spill]] %s6792_s10 }
   0x8   :  { %6830 = sst [smem:[#allocation45_spill]] %s6794_s12 }
   0x9   :  { %6831 = sst [smem:[#allocation46_spill]] %s6795_s13 }
   0xa   :  { %18 = vsyncpa [#allocation5], 0 }
   0xb   :  { %19 = vsyncpa [#allocation8], 0 }
   0xc   :  { %21 = vsyncpa [#allocation8 + $0x1], 0 }
   0xd   :  { %22 = vsyncpa [#allocation11], 0 }
   0xe   :  { %24 = vsyncpa [#allocation11 + $0x1], 0 }
   0xf   :  { %25 = vsyncpa [#allocation14], 0 }
  0x10   :  { %27 = vsyncpa [#allocation14 + $0x1], 0 }
  0x11   :  { %28 = vsyncpa [#allocation17], 0 }
  0x12   :  { %30 = vsyncpa [#allocation17 + $0x1], 0 }
  0x13   :  { %31 = vsyncpa [#allocation20], 0 }
  0x14   :  { %33 = vsyncpa [#allocation20 + $0x1], 0 }
  0x15   :  { %34 = vsyncpa [#allocation23], 0 }
  0x16   :  { %36 = vsyncpa [#allocation23 + $0x1], 0 }
  0x17   :  { %37 = vsyncpa [#allocation6], 0  ;;  %s5519_s25 = smov 0   ;;  %s5521_s26 = smov 0  }
  0x18   :  { %s5523_s27 = smov 0   ;;  %s5525_s28 = smov 0  }
  0x19   :  { %s5527_s29 = smov 0   ;;  %s5529_s30 = smov 0  }
  0x1a LB: > { %6832 = sst [smem:[#allocation34_spill]] %s5398_s27  ;;  %s52_s14 = sadd.s32 1, %s5406_s29  ;;  %s5410_s30 = sphi %s5529_s30, %s43_s30   ;;  %s5406_s29 = sphi %s5527_s29, %s6891_s29   ;;  %s5402_s28 = sphi %s5525_s28, %s6890_s28   ;;  %s5398_s27 = sphi %s5523_s27, %s6886_s27   ;;  %s5394_s26 = sphi %s5521_s26, %s6889_s26   ;;  %s5390_s25 = sphi %s5519_s25, %s6888_s25  }
  0x1b   : > { %6833 = sst [smem:[#allocation35_spill]] %s5402_s28  ;;  %s88_s15 = sadd.s32 1, %s5398_s27 }
  0x1c   : > { %p53_p0 = scmp.ge.s32.totalorder %s52_s14, 2  ;;  %p95_p1 = scmp.ne.s32.totalorder %s5398_s27, %s5394_s26 }
  0x1d   : > { %p96_p2 = scmp.eq.s32.totalorder %s5410_s30, 0  ;;  %p4633_p4 = scmp.lt.s32.totalorder %s5410_s30, 2 }
  0x1e   : > { %s6893_s14 = smov (%p53_p0, %s52_s14), 0  ;;  %s5560_s17 = sand.u32 1, %s5410_s30  }
  0x1f   : > { %6834 = sst [smem:[#allocation36_spill]] %s6893_s14  ;;  %p97_p3 = por %p96_p2, %p95_p1 }
  0x20   : > { %s85_s16 = ssub.s32 %s5406_s29, %s6893_s14  ;;  %s5563_s18 = sand.u32 1, %s5398_s27  }
  0x21   : > { %p86_p5 = scmp.eq.s32.totalorder %s85_s16, 0  ;;  %s5566_s19 = sshll.u32 %s5406_s29, 4 }
  0x22   : > { %s6836_s1 = sld [smem:[#allocation38_spill]]  ;;  %s457_s24 = scalar_lea.vmem [#allocation7], %s5563_s18 }
  0x23   : > { %s5569_s20 = scalar_select %p86_p5, %s5398_s27, %s88_s15  }
  0x24   : > { %s464_s14 = sshll.u32 %s457_s24, 4  ;;  %p5578_p6 = pnand %p4633_p4, %p97_p3  ;;  %s5582_s14 = int_to_ptr.vmem [resolvable:$true] %s464_s14 }
  0x25   : > { %6835 = sst [smem:[#allocation37_spill]] %s5569_s20 }
  0x26   : > { %s6837_s16 = scalar_select %p5578_p6, 1, 0 }
  0x27   : > { %p5589_p8 = pneg %p5578_p6 }
  0x28   : > { %s5575_s23 = scalar_lea.hbm %s6836_s1, %s5566_s19  ;;  %s4923_s27 = scalar_lea.hbm %s6836_s1, 32 }
  0x29   : > { %s4918_s20 = scalar_lea.hbm %s5575_s23, 16  ;;  %p4924_p11 = scmp.lt.u32.totalorder %s5575_s23, %s6836_s1 }
  0x2a   : > { %p4919_p7 = scmp.ne.s32.totalorder %s5575_s23, %s4918_s20  ;;  %p4925_p12 = scmp.lt.u32.totalorder %s4923_s27, %s4918_s20 }
  0x2b   : > { %s6838_s21 = scalar_select %p5589_p8, 1, 0 }
  0x2c   : > { %p4921_p9 = pnand %p5589_p8, %p4919_p7  ;;  %p4926_p13 = por %p4925_p12, %p4924_p11 }
  0x2d   : > { %p4927_p0 = scmp.lt.u32.totalorder %s4918_s20, %s5575_s23 }
  0x2e   : > { %p4922_p10 = pneg %p4921_p9 }
  0x2f   : > { %p4928_p1 = por %p4927_p0, %p4926_p13 }
  0x31   : > { %p4929_p2 = pnand %p4928_p1, %p4922_p10 }
  0x33   : > { %4932 = shalt.err (!%p4929_p2)
}
  0x34   : > { %s4933_s15 = scalar_lea.vmem %s5582_s14, 16  ;;  %s5412_s22 = smov [#allocation7]  }
  0x35   : > { %p4934_p3 = scmp.ne.s32.totalorder %s5582_s14, %s4933_s15  ;;  %s4938_s24 = sshll.u32 %s5412_s22, 4  ;;  %s4939_s24 = int_to_ptr.vmem [resolvable:$false] %s4938_s24 }
  0x36   : > { %s4940_s13 = scalar_lea.vmem %s4939_s24, 32  ;;  %p4941_p7 = scmp.lt.s32.totalorder %s5582_s14, %s4939_s24 }
  0x37   : > { %p4936_p4 = pnand %p4934_p3, %p5589_p8  ;;  %p4942_p9 = scmp.lt.s32.totalorder %s4940_s13, %s4933_s15 }
  0x39   : > { %p4937_p5 = pneg %p4936_p4  ;;  %p4943_p11 = por %p4942_p9, %p4941_p7 }
  0x3b   : > { %p4944_p12 = pnand %p4943_p11, %p4937_p5 }
  0x3d   : > { %4947 = shalt.err (!%p4944_p12)
}
  0x3e   : > { %s6839_s27 = scalar_lea.sflag [#allocation8], %s5560_s17  ;;  %s6801_s28 = sshll.u32 %s5563_s18, 6 }
  0x3f   : > { %4598 = dma.hbm_to_vmem [thread:$0]  (!%p5578_p6), %s5575_s23, 16, %s5582_s14, %s6839_s27  }
  0x40   : > { %s6802_s20 = sshll.u32 %s5406_s29, 10  ;;  %s6840_s3 = sld [smem:[#allocation40_spill]] }
  0x41   : > { %s492_s13 = scalar_lea.vmem [#allocation10], %s6801_s28  ;;  %s6804_s12 = scalar_lea.sflag [#allocation11], %s5560_s17 }
  0x42   : > { %s499_s1 = sshll.u32 %s492_s13, 4  ;;  %s5625_s1 = int_to_ptr.vmem [resolvable:$true] %s499_s1 }
  0x46   : > { %s5621_s24 = scalar_lea.hbm %s6840_s3, %s6802_s20  ;;  %s4953_s27 = scalar_lea.hbm %s6840_s3, 2048 }
  0x47   : > { %s4948_s10 = scalar_lea.hbm %s5621_s24, 1024  ;;  %p4954_p1 = scmp.lt.u32.totalorder %s5621_s24, %s6840_s3 }
  0x48   : > { %p4949_p10 = scmp.ne.s32.totalorder %s5621_s24, %s4948_s10  ;;  %p4955_p2 = scmp.lt.u32.totalorder %s4953_s27, %s4948_s10 }
  0x49   : > { %p4957_p4 = scmp.lt.u32.totalorder %s4948_s10, %s5621_s24 }
  0x4a   : > { %p4951_p13 = pnand %p4949_p10, %p5589_p8  ;;  %p4956_p3 = por %p4955_p2, %p4954_p1 }
  0x4c   : > { %p4952_p0 = pneg %p4951_p13  ;;  %p4958_p5 = por %p4957_p4, %p4956_p3 }
  0x4e   : > { %p4959_p7 = pnand %p4958_p5, %p4952_p0 }
  0x50   : > { %4962 = shalt.err (!%p4959_p7)
}
  0x51   : > { %s4963_s13 = scalar_lea.vmem %s5625_s1, 1024  ;;  %s5413_s14 = smov [#allocation10]  }
  0x52   : > { %p4964_p9 = scmp.ne.s32.totalorder %s5625_s1, %s4963_s13  ;;  %s4968_s23 = sshll.u32 %s5413_s14, 4  ;;  %s4969_s23 = int_to_ptr.vmem [resolvable:$false] %s4968_s23 }
  0x53   : > { %s4970_s15 = scalar_lea.vmem %s4969_s23, 2048  ;;  %p4971_p10 = scmp.lt.s32.totalorder %s5625_s1, %s4969_s23 }
  0x54   : > { %p4966_p11 = pnand %p4964_p9, %p5589_p8  ;;  %p4972_p13 = scmp.lt.s32.totalorder %s4970_s15, %s4963_s13 }
  0x56   : > { %p4967_p12 = pneg %p4966_p11  ;;  %p4973_p1 = por %p4972_p13, %p4971_p10 }
  0x58   : > { %p4974_p2 = pnand %p4973_p1, %p4967_p12 }
  0x5a   : > { %4977 = shalt.err (!%p4974_p2)
}
  0x5b   : > { %s6805_s10 = smov 128   ;;  %s6815_s27 = smov 8  }
  0x5c   : > { %4604 = dma.hbm_to_vmem [thread:$0]  (!%p5578_p6), %s5621_s24, 1024, %s5625_s1, %s6804_s12, %s6805_s10, %s6805_s10, %s6815_s27  }
  0x5d   : > { %s4141_s22 = sshll.u32 %s5563_s18, 5  ;;  %s4253_s13 = sshll.u32 %s5406_s29, 9 }
  0x5e   : > { %s6841_s5 = sld [smem:[#allocation41_spill]]  ;;  %s532_s28 = scalar_lea.vmem [#allocation13], %s4141_s22 }
  0x5f   : > { %s539_s20 = sshll.u32 %s532_s28, 4  ;;  %s6807_s3 = scalar_lea.sflag [#allocation14], %s5560_s17  ;;  %s5661_s20 = int_to_ptr.vmem [resolvable:$true] %s539_s20 }
  0x64   : > { %s5659_s15 = scalar_lea.hbm %s6841_s5, %s4253_s13  ;;  %s4983_s14 = scalar_lea.hbm %s6841_s5, 1024 }
  0x65   : > { %s4978_s8 = scalar_lea.hbm %s5659_s15, 512  ;;  %p4984_p5 = scmp.lt.u32.totalorder %s5659_s15, %s6841_s5 }
  0x66   : > { %p4979_p0 = scmp.ne.s32.totalorder %s5659_s15, %s4978_s8  ;;  %p4985_p7 = scmp.lt.u32.totalorder %s4983_s14, %s4978_s8 }
  0x67   : > { %p4987_p11 = scmp.lt.u32.totalorder %s4978_s8, %s5659_s15 }
  0x68   : > { %p4981_p3 = pnand %p4979_p0, %p5589_p8  ;;  %p4986_p9 = por %p4985_p7, %p4984_p5 }
  0x6a   : > { %p4982_p4 = pneg %p4981_p3  ;;  %p4988_p12 = por %p4987_p11, %p4986_p9 }
  0x6c   : > { %p4989_p10 = pnand %p4988_p12, %p4982_p4 }
  0x6e   : > { %4992 = shalt.err (!%p4989_p10)
}
  0x6f   : > { %s4993_s28 = scalar_lea.vmem %s5661_s20, 512  ;;  %s5416_s22 = smov [#allocation13]  }
  0x70   : > { %p4994_p13 = scmp.ne.s32.totalorder %s5661_s20, %s4993_s28  ;;  %s4998_s1 = sshll.u32 %s5416_s22, 4  ;;  %s4999_s1 = int_to_ptr.vmem [resolvable:$false] %s4998_s1 }
  0x71   : > { %s5000_s24 = scalar_lea.vmem %s4999_s1, 1024  ;;  %p5001_p0 = scmp.lt.s32.totalorder %s5661_s20, %s4999_s1 }
  0x72   : > { %p4996_p1 = pnand %p4994_p13, %p5589_p8  ;;  %p5002_p3 = scmp.lt.s32.totalorder %s5000_s24, %s4993_s28 }
  0x74   : > { %p4997_p2 = pneg %p4996_p1  ;;  %p5003_p5 = por %p5002_p3, %p5001_p0 }
  0x76   : > { %p5004_p7 = pnand %p5003_p5, %p4997_p2 }
  0x78   : > { %5007 = shalt.err (!%p5004_p7)
}
  0x79   : > { %s6808_s8 = smov 64   ;;  %s6811_s14 = smov 4  }
  0x7a   : > { %4610 = dma.hbm_to_vmem [thread:$0]  (!%p5578_p6), %s5659_s15, 512, %s5661_s20, %s6807_s3, %s6808_s8, %s6808_s8, %s6811_s14  }
  0x7b   : > { %s6842_s7 = sld [smem:[#allocation42_spill]]  ;;  %s569_s22 = scalar_lea.vmem [#allocation16], %s5563_s18 }
  0x7c   : > { %s576_s1 = sshll.u32 %s569_s22, 4  ;;  %s6812_s24 = scalar_lea.sflag [#allocation17], %s5560_s17  ;;  %s577_s1 = int_to_ptr.vmem [resolvable:$true] %s576_s1 }
  0x81   : > { %s5694_s28 = scalar_lea.hbm %s6842_s7, %s5566_s19  ;;  %s5013_s15 = scalar_lea.hbm %s6842_s7, 32 }
  0x82   : > { %s5008_s12 = scalar_lea.hbm %s5694_s28, 16  ;;  %p5014_p12 = scmp.lt.u32.totalorder %s5694_s28, %s6842_s7 }
  0x83   : > { %p5009_p4 = scmp.ne.s32.totalorder %s5694_s28, %s5008_s12  ;;  %p5015_p10 = scmp.lt.u32.totalorder %s5013_s15, %s5008_s12 }
  0x84   : > { %p5017_p1 = scmp.lt.u32.totalorder %s5008_s12, %s5694_s28 }
  0x85   : > { %p5011_p9 = pnand %p5009_p4, %p5589_p8  ;;  %p5016_p13 = por %p5015_p10, %p5014_p12 }
  0x87   : > { %p5012_p11 = pneg %p5011_p9  ;;  %p5018_p2 = por %p5017_p1, %p5016_p13 }
  0x89   : > { %p5019_p0 = pnand %p5018_p2, %p5012_p11 }
  0x8b   : > { %5022 = shalt.err (!%p5019_p0)
}
  0x8c   : > { %s5023_s22 = scalar_lea.vmem %s577_s1, 16  ;;  %s5419_s3 = smov [#allocation16]  }
  0x8d   : > { %p5024_p3 = scmp.ne.s32.totalorder %s577_s1, %s5023_s22  ;;  %s5028_s8 = sshll.u32 %s5419_s3, 4  ;;  %s5029_s8 = int_to_ptr.vmem [resolvable:$false] %s5028_s8 }
  0x8e   : > { %s5030_s10 = scalar_lea.vmem %s5029_s8, 32  ;;  %p5031_p4 = scmp.lt.s32.totalorder %s577_s1, %s5029_s8 }
  0x8f   : > { %p5026_p5 = pnand %p5024_p3, %p5589_p8  ;;  %p5032_p9 = scmp.lt.s32.totalorder %s5030_s10, %s5023_s22 }
  0x91   : > { %p5027_p7 = pneg %p5026_p5  ;;  %p5033_p6 = por %p5032_p9, %p5031_p4 }
  0x93   : > { %p5034_p10 = pnand %p5033_p6, %p5027_p7 }
  0x95   : > { %5037 = shalt.err (!%p5034_p10)
}
  0x96   : > { %p6843_p12 = scmp.ne.s32.totalorder %s6837_s16, 0  ;;  %s6844_s12 = sshll.u32 %s5406_s29, 10 }
  0x97   : > { %s5722_s8 = scalar_lea.hbm %s6791_s9, %s6844_s12  ;;  %s6845_s15 = sshll.u32 %s5563_s18, 6 }
  0x98   : > { %4616 = dma.hbm_to_vmem [thread:$0]  (!%p6843_p12), %s5694_s28, 16, %s577_s1, %s6812_s24  }
  0x99   : > { %s604_s13 = scalar_lea.vmem [#allocation19], %s6845_s15  ;;  %s4153_s22 = sshll.u32 %s5563_s18, 7 }
  0x9a   : > { %s611_s23 = sshll.u32 %s604_s13, 4  ;;  %s6814_s10 = scalar_lea.sflag [#allocation20], %s5560_s17  ;;  %s5726_s23 = int_to_ptr.vmem [resolvable:$true] %s611_s23 }
  0x9b   : > { %s5038_s14 = scalar_lea.hbm %s5722_s8, 1024  ;;  %s5043_s12 = scalar_lea.hbm %s6791_s9, 2048 }
  0x9c   : > { %p5039_p6 = scmp.ne.s32.totalorder %s5722_s8, %s5038_s14  ;;  %p5044_p1 = scmp.lt.u32.totalorder %s5722_s8, %s6791_s9 }
  0x9d   : > { %p5045_p2 = scmp.lt.u32.totalorder %s5043_s12, %s5038_s14  ;;  %p5047_p3 = scmp.lt.u32.totalorder %s5038_s14, %s5722_s8 }
  0x9e   : > { %p5041_p11 = pnand %p5039_p6, %p5589_p8 }
  0x9f   : > { %p5046_p0 = por %p5045_p2, %p5044_p1 }
  0xa0   : > { %p5042_p13 = pneg %p5041_p11 }
  0xa1   : > { %p5048_p5 = por %p5047_p3, %p5046_p0 }
  0xa3   : > { %p5049_p7 = pnand %p5048_p5, %p5042_p13 }
  0xa5   : > { %5052 = shalt.err (!%p5049_p7)
}
  0xa6   : > { %s5053_s15 = scalar_lea.vmem %s5726_s23, 1024  ;;  %s5420_s13 = smov [#allocation19]  }
  0xa7   : > { %p5054_p4 = scmp.ne.s32.totalorder %s5726_s23, %s5053_s15  ;;  %s5058_s28 = sshll.u32 %s5420_s13, 4  ;;  %s5059_s28 = int_to_ptr.vmem [resolvable:$false] %s5058_s28 }
  0xa8   : > { %s5060_s1 = scalar_lea.vmem %s5059_s28, 2048  ;;  %p5061_p6 = scmp.lt.s32.totalorder %s5726_s23, %s5059_s28 }
  0xa9   : > { %p5056_p9 = pnand %p5054_p4, %p5589_p8  ;;  %p5062_p11 = scmp.lt.s32.totalorder %s5060_s1, %s5053_s15 }
  0xab   : > { %p5057_p10 = pneg %p5056_p9  ;;  %p5063_p1 = por %p5062_p11, %p5061_p6 }
  0xad   : > { %p5064_p2 = pnand %p5063_p1, %p5057_p10 }
  0xaf   : > { %5067 = shalt.err (!%p5064_p2)
}
  0xb0   : > { %s6846_s14 = smov 128   ;;  %s4256_s12 = sshll.u32 %s5406_s29, 11 }
  0xb1   : > { %4622 = dma.hbm_to_vmem [thread:$0]  (!%p6843_p12), %s5722_s8, 1024, %s5726_s23, %s6814_s10, %s6846_s14, %s6846_s14, %s6815_s27  }
  0xb2   : > { %s5760_s15 = scalar_lea.hbm %s6793_s11, %s4256_s12  ;;  %s644_s13 = scalar_lea.vmem [#allocation22], %s4153_s22 }
  0xb3   : > { %s651_s28 = sshll.u32 %s644_s13, 4  ;;  %s6813_s1 = scalar_lea.sflag [#allocation23], %s5560_s17  ;;  %s5764_s28 = int_to_ptr.vmem [resolvable:$true] %s651_s28 }
  0xb4   : > { %s5068_s24 = scalar_lea.hbm %s5760_s15, 2048  ;;  %s5073_s12 = scalar_lea.hbm %s6793_s11, 4096 }
  0xb5   : > { %p5069_p13 = scmp.ne.s32.totalorder %s5760_s15, %s5068_s24  ;;  %p5074_p5 = scmp.lt.u32.totalorder %s5760_s15, %s6793_s11 }
  0xb6   : > { %p5075_p7 = scmp.lt.u32.totalorder %s5073_s12, %s5068_s24  ;;  %p5077_p9 = scmp.lt.u32.totalorder %s5068_s24, %s5760_s15 }
  0xb7   : > { %p5071_p0 = pnand %p5069_p13, %p5589_p8 }
  0xb8   : > { %p5076_p4 = por %p5075_p7, %p5074_p5 }
  0xb9   : > { %p5072_p3 = pneg %p5071_p0 }
  0xba   : > { %p5078_p10 = por %p5077_p9, %p5076_p4 }
  0xbc   : > { %p5079_p6 = pnand %p5078_p10, %p5072_p3 }
  0xbe   : > { %5082 = shalt.err (!%p5079_p6)
}
  0xbf   : > { %s5083_s22 = scalar_lea.vmem %s5764_s28, 2048  ;;  %s5421_s13 = smov [#allocation22]  }
  0xc0   : > { %p5084_p11 = scmp.ne.s32.totalorder %s5764_s28, %s5083_s22  ;;  %s5088_s8 = sshll.u32 %s5421_s13, 4  ;;  %s5089_s8 = int_to_ptr.vmem [resolvable:$false] %s5088_s8 }
  0xc1   : > { %s5090_s23 = scalar_lea.vmem %s5089_s8, 4096  ;;  %p5091_p13 = scmp.lt.s32.totalorder %s5764_s28, %s5089_s8 }
  0xc2   : > { %p5086_p1 = pnand %p5084_p11, %p5589_p8  ;;  %p5092_p0 = scmp.lt.s32.totalorder %s5090_s23, %s5083_s22 }
  0xc4   : > { %p5087_p2 = pneg %p5086_p1  ;;  %p5093_p5 = por %p5092_p0, %p5091_p13 }
  0xc6   : > { %p5094_p7 = pnand %p5093_p5, %p5087_p2 }
  0xc8   : > { %5097 = shalt.err (!%p5094_p7)
}
  0xc9   : > { %s6847_s24 = smov 4   ;;  %s6848_s12 = smov 64  }
  0xca   : > { %4628 = dma.hbm_to_vmem [thread:$0]  (!%p6843_p12), %s5760_s15, 2048, %s5764_s28, %s6813_s1, %s6848_s12, %s6848_s12, %s6847_s24  }
  0xcb   : > { %s5794_s3 = sadd.s32 4294967295, %s5410_s30   ;;  %p101_p3 = scmp.ne.s32.totalorder %s5394_s26, %s5390_s25 }
  0xcc   : > { %p6816_p4 = scmp.eq.s32.totalorder %s5794_s3, 0  ;;  %p4130_p9 = scmp.ge.s32.totalorder %s5410_s30, 1 }
  0xcd   : > { %p424_p10 = scmp.lt.s32.totalorder %s5410_s30, 3  ;;  %s5422_s15 = smov [#allocation4]  }
  0xce   : > { %p5803_p6 = por %p6816_p4, %p101_p3  ;;  %s440_s28 = sshll.u32 %s5422_s15, 4  ;;  %s5813_s28 = int_to_ptr.vmem [resolvable:$true] %s440_s28 }
  0xcf   : > { %p5807_p11 = pnand %p4130_p9, %p424_p10  ;;  %s6851_s2 = sld [smem:[#allocation39_spill]] }
  0xd0   : > { %s6849_s20 = scalar_select %p5803_p6, 1, 0 }
  0xd1   : > { %s6850_s22 = scalar_select %p5807_p11, 1, 0 }
  0xd2   : > { %p4591_p1 = pneg %p5807_p11  ;;  %s474_s23 = scalar_lea.vmem [#allocation9], %s5563_s18 }
  0xd3   : > { %s481_s24 = sshll.u32 %s474_s23, 4  ;;  %s482_s24 = int_to_ptr.vmem [resolvable:$true] %s481_s24 }
  0xd4   : > { %p5824_p2 = pnand %p4591_p1, %p6816_p4 }
  0xd5   : > { %s5819_s8 = scalar_lea.hbm %s6851_s2, %s5566_s19  ;;  %s5103_s1 = scalar_lea.hbm %s6851_s2, 32 }
  0xd6   : > { %s6852_s12 = scalar_select %p5824_p2, 1, 0 }
  0xd7   : > { %s5098_s15 = scalar_lea.hbm %s5819_s8, 16  ;;  %p5104_p7 = scmp.lt.u32.totalorder %s5819_s8, %s6851_s2 }
  0xd8   : > { %p5099_p13 = scmp.ne.s32.totalorder %s5819_s8, %s5098_s15  ;;  %p5105_p3 = scmp.lt.u32.totalorder %s5103_s1, %s5098_s15 }
  0xd9   : > { %p5107_p10 = scmp.lt.u32.totalorder %s5098_s15, %s5819_s8 }
  0xda   : > { %p5101_p0 = pnand %p5099_p13, %p5589_p8  ;;  %p5106_p9 = por %p5105_p3, %p5104_p7 }
  0xdc   : > { %p5102_p5 = pneg %p5101_p0  ;;  %p5108_p1 = por %p5107_p10, %p5106_p9 }
  0xde   : > { %p5109_p4 = pnand %p5108_p1, %p5102_p5 }
  0xe0   : > { %5112 = shalt.err (!%p5109_p4)
}
  0xe1   : > { %s5113_s23 = scalar_lea.vmem %s482_s24, 16  ;;  %s5423_s5 = smov [#allocation9]  }
  0xe2   : > { %p5114_p6 = scmp.ne.s32.totalorder %s482_s24, %s5113_s23  ;;  %s5118_s7 = sshll.u32 %s5423_s5, 4  ;;  %s5119_s7 = int_to_ptr.vmem [resolvable:$false] %s5118_s7 }
  0xe3   : > { %s5120_s25 = scalar_lea.vmem %s5119_s7, 32  ;;  %p5121_p11 = scmp.lt.s32.totalorder %s482_s24, %s5119_s7 }
  0xe4   : > { %p5116_p13 = pnand %p5114_p6, %p5589_p8  ;;  %p5122_p2 = scmp.lt.s32.totalorder %s5120_s25, %s5113_s23 }
  0xe6   : > { %p5117_p0 = pneg %p5116_p13  ;;  %p5123_p12 = por %p5122_p2, %p5121_p11 }
  0xe8   : > { %p5124_p3 = pnand %p5123_p12, %p5117_p0 }
  0xea   : > { %5127 = shalt.err (!%p5124_p3)
}
  0xeb   : > { %p6853_p7 = scmp.ne.s32.totalorder %s6837_s16, 0  ;;  %s6854_s27 = scalar_lea.sflag [#allocation8], %s5560_s17 }
  0xec   : > { %s4138_s10 = sshll.u32 %s5563_s18, 1  ;;  %s5128_s5 = scalar_lea.hbm %s6782_s0, 512 }
  0xed   : > { %4601 = dma.hbm_to_vmem [thread:$0]  (!%p6853_p7), %s5819_s8, 16, %s482_s24, %s6854_s27  }
  0xee   : > { %p5129_p4 = scmp.ne.s32.totalorder %s6782_s0, %s5128_s5  ;;  %p6855_p6 = scmp.ne.s32.totalorder %s6852_s12, 0 }
  0xef   : > { %p5135_p5 = scmp.lt.u32.totalorder %s5128_s5, %s6782_s0 }
  0xf0   : > { %p5130_p12 = pneg %p6855_p6 }
  0xf2   : > { %p5131_p11 = pnand %p5130_p12, %p5129_p4 }
  0xf4   : > { %p5132_p2 = pneg %p5131_p11 }
  0xf6   : > { %p5137_p9 = pnand %p5135_p5, %p5132_p2 }
  0xf8   : > { %5140 = shalt.err (!%p5137_p9)
}
  0xf9   : > { %s5141_s8 = scalar_lea.vmem %s5813_s28, 512  ;;  %p5149_p0 = scmp.lt.s32.totalorder %s5813_s28, %s5813_s28 }
  0xfa   : > { %p5142_p10 = scmp.ne.s32.totalorder %s5813_s28, %s5141_s8  ;;  %p5150_p3 = scmp.lt.s32.totalorder %s5141_s8, %s5141_s8 }
  0xfc   : > { %p5144_p1 = pnand %p5142_p10, %p5130_p12  ;;  %p5151_p7 = por %p5150_p3, %p5149_p0 }
  0xfe   : > { %p5145_p13 = pneg %p5144_p1 }
 0x100   : > { %p5152_p8 = pnand %p5151_p7, %p5145_p13 }
 0x102   : > { %5155 = shalt.err (!%p5152_p8)
}
 0x103   : > { %s6856_s2 = smov 8   ;;  %s4252_s27 = sshll.u32 %s5406_s29, 5 }
 0x104   : > { %4594 = dma.hbm_to_vmem [thread:$0]  (!%p6855_p6), %s6782_s0, 512, %s5813_s28, [#allocation5], %s6846_s14, %s6846_s14, %s6856_s2  }
 0x105   : > { %s5878_s5 = scalar_lea.hbm %s6786_s4, %s4252_s27  ;;  %s513_s12 = scalar_lea.vmem [#allocation12], %s4138_s10 }
 0x106   : > { %s521_s13 = sshll.u32 %s513_s12, 4  ;;  %s5156_s7 = scalar_lea.hbm %s5878_s5, 32  ;;  %s522_s13 = int_to_ptr.vmem [resolvable:$true] %s521_s13 }
 0x107   : > { %p5157_p8 = scmp.ne.s32.totalorder %s5878_s5, %s5156_s7  ;;  %p6857_p7 = scmp.ne.s32.totalorder %s6838_s21, 0 }
 0x108   : > { %s5161_s23 = scalar_lea.hbm %s6786_s4, 64  ;;  %p5162_p12 = scmp.lt.u32.totalorder %s5878_s5, %s6786_s4 }
 0x109   : > { %p5159_p4 = pnand %p5157_p8, %p6857_p7  ;;  %p5163_p11 = scmp.lt.u32.totalorder %s5161_s23, %s5156_s7 }
 0x10a   : > { %p5165_p5 = scmp.lt.u32.totalorder %s5156_s7, %s5878_s5 }
 0x10b   : > { %p5160_p6 = pneg %p5159_p4  ;;  %p5164_p2 = por %p5163_p11, %p5162_p12 }
 0x10d   : > { %p5166_p9 = por %p5165_p5, %p5164_p2 }
 0x10f   : > { %p5167_p10 = pnand %p5166_p9, %p5160_p6 }
 0x111   : > { %5170 = shalt.err (!%p5167_p10)
}
 0x112   : > { %s5171_s24 = scalar_lea.vmem %s522_s13, 32  ;;  %s5424_s25 = smov [#allocation12]  }
 0x113   : > { %p5172_p1 = scmp.ne.s32.totalorder %s522_s13, %s5171_s24  ;;  %s5176_s1 = sshll.u32 %s5424_s25, 4  ;;  %s5177_s1 = int_to_ptr.vmem [resolvable:$false] %s5176_s1 }
 0x114   : > { %s5178_s15 = scalar_lea.vmem %s5177_s1, 64  ;;  %p5179_p3 = scmp.lt.s32.totalorder %s522_s13, %s5177_s1 }
 0x115   : > { %p5174_p13 = pnand %p5172_p1, %p6857_p7  ;;  %p5180_p8 = scmp.lt.s32.totalorder %s5178_s15, %s5171_s24 }
 0x117   : > { %p5175_p0 = pneg %p5174_p13  ;;  %p5181_p4 = por %p5180_p8, %p5179_p3 }
 0x119   : > { %p5182_p11 = pnand %p5181_p4, %p5175_p0 }
 0x11b   : > { %5185 = shalt.err (!%p5182_p11)
}
 0x11c   : > { %p6858_p12 = scmp.ne.s32.totalorder %s6837_s16, 0  ;;  %s6859_s12 = scalar_lea.sflag [#allocation11], %s5560_s17 }
 0x11d   : > { %s5905_s28 = scalar_lea.hbm %s6788_s6, %s5566_s19  ;;  %s552_s23 = scalar_lea.vmem [#allocation15], %s5563_s18 }
 0x11e   : > { %4607 = dma.hbm_to_vmem [thread:$0]  (!%p6858_p12), %s5878_s5, 32, %s522_s13, %s6859_s12  }
 0x11f   : > { %s559_s8 = sshll.u32 %s552_s23, 4  ;;  %s5186_s2 = scalar_lea.hbm %s5905_s28, 16  ;;  %s560_s8 = int_to_ptr.vmem [resolvable:$true] %s559_s8 }
 0x120   : > { %p5187_p6 = scmp.ne.s32.totalorder %s5905_s28, %s5186_s2  ;;  %s5191_s5 = scalar_lea.hbm %s6788_s6, 32 }
 0x121   : > { %p5192_p9 = scmp.lt.u32.totalorder %s5905_s28, %s6788_s6  ;;  %p5193_p10 = scmp.lt.u32.totalorder %s5191_s5, %s5186_s2 }
 0x122   : > { %p5189_p2 = pnand %p5187_p6, %p6857_p7  ;;  %p5195_p13 = scmp.lt.u32.totalorder %s5186_s2, %s5905_s28 }
 0x123   : > { %p5194_p1 = por %p5193_p10, %p5192_p9 }
 0x124   : > { %p5190_p5 = pneg %p5189_p2 }
 0x125   : > { %p5196_p0 = por %p5195_p13, %p5194_p1 }
 0x127   : > { %p5197_p3 = pnand %p5196_p0, %p5190_p5 }
 0x129   : > { %5200 = shalt.err (!%p5197_p3)
}
 0x12a   : > { %s5201_s15 = scalar_lea.vmem %s560_s8, 16  ;;  %s5425_s12 = smov [#allocation15]  }
 0x12b   : > { %p5202_p8 = scmp.ne.s32.totalorder %s560_s8, %s5201_s15  ;;  %s5206_s7 = sshll.u32 %s5425_s12, 4  ;;  %s5207_s7 = int_to_ptr.vmem [resolvable:$false] %s5206_s7 }
 0x12c   : > { %s5208_s14 = scalar_lea.vmem %s5207_s7, 32  ;;  %p5209_p6 = scmp.lt.s32.totalorder %s560_s8, %s5207_s7 }
 0x12d   : > { %p5204_p4 = pnand %p5202_p8, %p6857_p7  ;;  %p5210_p2 = scmp.lt.s32.totalorder %s5208_s14, %s5201_s15 }
 0x12f   : > { %p5205_p11 = pneg %p5204_p4  ;;  %p5211_p12 = por %p5210_p2, %p5209_p6 }
 0x131   : > { %p5212_p9 = pnand %p5211_p12, %p5205_p11 }
 0x133   : > { %5215 = shalt.err (!%p5212_p9)
}
 0x134   : > { %p6860_p10 = scmp.ne.s32.totalorder %s6837_s16, 0  ;;  %s6861_s23 = scalar_lea.sflag [#allocation14], %s5560_s17 }
 0x135   : > { %s6862_s25 = sld [smem:[#allocation43_spill]]  ;;  %s586_s1 = scalar_lea.vmem [#allocation18], %s5563_s18 }
 0x136   : > { %4613 = dma.hbm_to_vmem [thread:$0]  (!%p6860_p10), %s5905_s28, 16, %s560_s8, %s6861_s23  }
 0x137   : > { %s593_s15 = sshll.u32 %s586_s1, 4  ;;  %s594_s15 = int_to_ptr.vmem [resolvable:$true] %s593_s15 }
 0x13b   : > { %s6863_s5 = smov %s6862_s25  ;;  %s5931_s13 = scalar_lea.hbm %s6862_s25, %s5566_s19 }
 0x13c   : > { %s5216_s12 = scalar_lea.hbm %s5931_s13, 16  ;;  %s5221_s28 = scalar_lea.hbm %s6863_s5, 32 }
 0x13d   : > { %p5217_p12 = scmp.ne.s32.totalorder %s5931_s13, %s5216_s12  ;;  %p5222_p13 = scmp.lt.u32.totalorder %s5931_s13, %s6863_s5 }
 0x13e   : > { %p5223_p0 = scmp.lt.u32.totalorder %s5221_s28, %s5216_s12  ;;  %p5225_p8 = scmp.lt.u32.totalorder %s5216_s12, %s5931_s13 }
 0x13f   : > { %p5219_p5 = pnand %p5217_p12, %p6857_p7 }
 0x140   : > { %p5224_p3 = por %p5223_p0, %p5222_p13 }
 0x141   : > { %p5220_p1 = pneg %p5219_p5 }
 0x142   : > { %p5226_p4 = por %p5225_p8, %p5224_p3 }
 0x144   : > { %p5227_p11 = pnand %p5226_p4, %p5220_p1 }
 0x146   : > { %5230 = shalt.err (!%p5227_p11)
}
 0x147   : > { %s5231_s2 = scalar_lea.vmem %s594_s15, 16  ;;  %s5426_s24 = smov [#allocation18]  }
 0x148   : > { %p5232_p6 = scmp.ne.s32.totalorder %s594_s15, %s5231_s2  ;;  %s5236_s25 = sshll.u32 %s5426_s24, 4  ;;  %s5237_s25 = int_to_ptr.vmem [resolvable:$false] %s5236_s25 }
 0x149   : > { %s5238_s1 = scalar_lea.vmem %s5237_s25, 32  ;;  %p5239_p12 = scmp.lt.s32.totalorder %s594_s15, %s5237_s25 }
 0x14a   : > { %p5234_p2 = pnand %p5232_p6, %p6857_p7  ;;  %p5240_p5 = scmp.lt.s32.totalorder %s5238_s1, %s5231_s2 }
 0x14c   : > { %p5235_p9 = pneg %p5234_p2  ;;  %p5241_p10 = por %p5240_p5, %p5239_p12 }
 0x14e   : > { %p5242_p0 = pnand %p5241_p10, %p5235_p9 }
 0x150   : > { %5245 = shalt.err (!%p5242_p0)
}
 0x151   : > { %p6864_p13 = scmp.ne.s32.totalorder %s6837_s16, 0  ;;  %s6865_s12 = scalar_lea.sflag [#allocation17], %s5560_s17 }
 0x152   : > { %s6866_s28 = sld [smem:[#allocation44_spill]]  ;;  %s625_s2 = scalar_lea.vmem [#allocation21], %s4138_s10 }
 0x153   : > { %4619 = dma.hbm_to_vmem [thread:$0]  (!%p6864_p13), %s5931_s13, 16, %s594_s15, %s6865_s12  }
 0x154   : > { %s633_s24 = sshll.u32 %s625_s2, 4  ;;  %s634_s24 = int_to_ptr.vmem [resolvable:$true] %s633_s24 }
 0x158   : > { %s6867_s8 = smov %s6866_s28  ;;  %s5958_s23 = scalar_lea.hbm %s6866_s28, %s4252_s27 }
 0x159   : > { %s5246_s25 = scalar_lea.hbm %s5958_s23, 32  ;;  %s5251_s1 = scalar_lea.hbm %s6867_s8, 64 }
 0x15a   : > { %p5247_p10 = scmp.ne.s32.totalorder %s5958_s23, %s5246_s25  ;;  %p5252_p8 = scmp.lt.u32.totalorder %s5958_s23, %s6867_s8 }
 0x15b   : > { %p5253_p4 = scmp.lt.u32.totalorder %s5251_s1, %s5246_s25  ;;  %p5255_p6 = scmp.lt.u32.totalorder %s5246_s25, %s5958_s23 }
 0x15c   : > { %p5249_p1 = pnand %p5247_p10, %p6857_p7 }
 0x15d   : > { %p5254_p11 = por %p5253_p4, %p5252_p8 }
 0x15e   : > { %p5250_p3 = pneg %p5249_p1 }
 0x15f   : > { %p5256_p2 = por %p5255_p6, %p5254_p11 }
 0x161   : > { %p5257_p9 = pnand %p5256_p2, %p5250_p3 }
 0x163   : > { %5260 = shalt.err (!%p5257_p9)
}
 0x164   : > { %s5261_s10 = scalar_lea.vmem %s634_s24, 32  ;;  %s5427_s7 = smov [#allocation21]  }
 0x165   : > { %p5262_p12 = scmp.ne.s32.totalorder %s634_s24, %s5261_s10  ;;  %s5266_s14 = sshll.u32 %s5427_s7, 4  ;;  %s5267_s14 = int_to_ptr.vmem [resolvable:$false] %s5266_s14 }
 0x166   : > { %s5268_s28 = scalar_lea.vmem %s5267_s14, 64  ;;  %p5269_p10 = scmp.lt.s32.totalorder %s634_s24, %s5267_s14 }
 0x167   : > { %p5264_p5 = pnand %p5262_p12, %p6857_p7  ;;  %p5270_p1 = scmp.lt.s32.totalorder %s5268_s28, %s5261_s10 }
 0x169   : > { %p5265_p0 = pneg %p5264_p5  ;;  %p5271_p13 = por %p5270_p1, %p5269_p10 }
 0x16b   : > { %p5272_p4 = pnand %p5271_p13, %p5265_p0 }
 0x16d   : > { %5275 = shalt.err (!%p5272_p4)
}
 0x16e   : > { %p6868_p8 = scmp.ne.s32.totalorder %s6837_s16, 0  ;;  %s6869_s2 = scalar_lea.sflag [#allocation20], %s5560_s17 }
 0x16f   : > { %s6870_s15 = sld [smem:[#allocation45_spill]]  ;;  %s664_s12 = scalar_lea.vmem [#allocation24], %s5563_s18 }
 0x170   : > { %4625 = dma.hbm_to_vmem [thread:$0]  (!%p6868_p8), %s5958_s23, 32, %s634_s24, %s6869_s2  }
 0x171   : > { %s671_s27 = sshll.u32 %s664_s12, 4  ;;  %s672_s27 = int_to_ptr.vmem [resolvable:$true] %s671_s27 }
 0x175   : > { %s5985_s1 = scalar_lea.hbm %s6870_s15, %s5566_s19  ;;  %s5281_s23 = scalar_lea.hbm %s6870_s15, 32 }
 0x176   : > { %s5276_s10 = scalar_lea.hbm %s5985_s1, 16  ;;  %p5282_p6 = scmp.lt.u32.totalorder %s5985_s1, %s6870_s15 }
 0x177   : > { %p5277_p13 = scmp.ne.s32.totalorder %s5985_s1, %s5276_s10  ;;  %p5283_p2 = scmp.lt.u32.totalorder %s5281_s23, %s5276_s10 }
 0x178   : > { %p5285_p12 = scmp.lt.u32.totalorder %s5276_s10, %s5985_s1 }
 0x179   : > { %p5279_p3 = pnand %p5277_p13, %p6857_p7  ;;  %p5284_p9 = por %p5283_p2, %p5282_p6 }
 0x17b   : > { %p5280_p11 = pneg %p5279_p3  ;;  %p5286_p5 = por %p5285_p12, %p5284_p9 }
 0x17d   : > { %p5287_p0 = pnand %p5286_p5, %p5280_p11 }
 0x17f   : > { %5290 = shalt.err (!%p5287_p0)
}
 0x180   : > { %s5291_s18 = scalar_lea.vmem %s672_s27, 16  ;;  %s5428_s19 = smov [#allocation24]  }
 0x181   : > { %p5292_p10 = scmp.ne.s32.totalorder %s672_s27, %s5291_s18  ;;  %s5296_s2 = sshll.u32 %s5428_s19, 4  ;;  %s5297_s2 = int_to_ptr.vmem [resolvable:$false] %s5296_s2 }
 0x182   : > { %s5298_s25 = scalar_lea.vmem %s5297_s2, 32  ;;  %p5299_p13 = scmp.lt.s32.totalorder %s672_s27, %s5297_s2 }
 0x183   : > { %p5294_p1 = pnand %p5292_p10, %p6857_p7  ;;  %p5300_p3 = scmp.lt.s32.totalorder %s5298_s25, %s5291_s18 }
 0x185   : > { %p5295_p4 = pneg %p5294_p1  ;;  %p5301_p8 = por %p5300_p3, %p5299_p13 }
 0x187   : > { %p5302_p2 = pnand %p5301_p8, %p5295_p4 }
 0x189   : > { %5305 = shalt.err (!%p5302_p2)
}
 0x18a   : > { %p6871_p6 = scmp.ne.s32.totalorder %s6837_s16, 0  ;;  %s6872_s13 = scalar_lea.sflag [#allocation23], %s5560_s17 }
 0x18b   : > { %p6873_p11 = scmp.ne.s32.totalorder %s6850_s22, 0 }
 0x18c   : > { %4631 = dma.hbm_to_vmem [thread:$0]  (!%p6871_p6), %s5985_s1, 16, %s672_s27, %s6872_s13  }
 0x18d   : > { %680 = sbr.rel (%p6873_p11) target bundleno = 7012 (0x1b64), region = 72  ;;  %p6874_p7 = scmp.eq.s32.totalorder (!%p6873_p11), %s5794_s3, 0 }
 0x194   : > { %5357 = dma.done.wait (%p6874_p7), [#allocation5], 512   ;;  %p6875_p9 = pmov %p6874_p7 }
 0x195   : > { %s6014_s21 = sand.u32 1, %s5794_s3   ;;  %s6017_s16 = sand.u32 1, %s5394_s26  }
 0x196   : > { %5359 = vsyncadd (%p6875_p9), [#allocation5], 4294966784  ;;  %s687_s17 = scalar_lea.sflag [#allocation8], %s6014_s21  ;;  %s689_s1 = scalar_lea.vmem [#allocation7], %s6017_s16 }
 0x197   : > { %p6876_p8 = scmp.ne.s32.totalorder %s6849_s20, 0 }
 0x199   : > { %5361 = dma.done.wait (%p6876_p8), %s687_s17, 32  }
 0x19a   : > { %5363 = vsyncadd (%p6876_p8), %s687_s17, 4294967264  ;;  %s4159_s22 = sshll.u32 %s6017_s16, 6  ;;  %s697_s12 = scalar_lea.vmem [#allocation9], %s6017_s16 }
 0x19b   : > { %s703_s27 = scalar_lea.sflag [#allocation11], %s6014_s21  ;;  %s6028_s10 = scalar_lea.vmem [#allocation10], %s4159_s22 }
 0x19c   : > { %5365 = dma.done.wait (%p6876_p8), %s703_s27, 1056  }
 0x19d   : > { %5367 = vsyncadd (%p6876_p8), %s703_s27, 4294966240  ;;  %s4160_s7 = sshll.u32 %s6017_s16, 1  ;;  %s4161_s14 = sshll.u32 %s6017_s16, 5 }
 0x19e   : > { %s6036_s23 = scalar_lea.vmem [#allocation12], %s4160_s7  ;;  %s721_s24 = scalar_lea.sflag [#allocation14], %s6014_s21 }
 0x19f   : > { %s6039_s28 = scalar_lea.vmem [#allocation13], %s4161_s14 }
 0x1a0   : > { %5369 = dma.done.wait (%p6876_p8), %s721_s24, 528  }
 0x1a1   : > { %5371 = vsyncadd (%p6876_p8), %s721_s24, 4294966768  ;;  %s732_s18 = scalar_lea.vmem [#allocation15], %s6017_s16  ;;  %s738_s19 = scalar_lea.sflag [#allocation17], %s6014_s21 }
 0x1a2   : > { %s740_s2 = scalar_lea.vmem [#allocation16], %s6017_s16 }
 0x1a3   : > { %5373 = dma.done.wait (%p6876_p8), %s738_s19, 32  }
 0x1a4   : > { %5375 = vsyncadd (%p6876_p8), %s738_s19, 4294967264  ;;  %s754_s13 = scalar_lea.sflag [#allocation20], %s6014_s21  ;;  %s6054_s17 = scalar_lea.vmem [#allocation19], %s4159_s22 }
 0x1a5   : > { %5377 = dma.done.wait (%p6876_p8), %s754_s13, 1056  }
 0x1a6   : > { %5379 = vsyncadd (%p6876_p8), %s754_s13, 4294966240  ;;  %s4164_s27 = sshll.u32 %s6017_s16, 7  ;;  %s6061_s14 = scalar_lea.vmem [#allocation21], %s4160_s7 }
 0x1a7   : > { %s772_s24 = scalar_lea.sflag [#allocation23], %s6014_s21  ;;  %s6064_s19 = scalar_lea.vmem [#allocation22], %s4164_s27 }
 0x1a8   : > { %5381 = dma.done.wait (%p6876_p8), %s772_s24, 2064  }
 0x1a9   : > { %5383 = vsyncadd (%p6876_p8), %s772_s24, 4294965232  ;;  %s783_s22 = scalar_lea.vmem [#allocation24], %s6017_s16  ;;  %s6877_s25 = sld [smem:[#allocation35_spill]] }
 0x1af   : > { %p4165_p12 = scmp.ne.s32.totalorder %s6877_s25, 0 }
 0x1b0   : > { %v877_v0 = vld [vmem:[#allocation4] sm:$0xff] (!%p4165_p12)  ;;  %vm881_vm0 = vcmask (!%p4165_p12), 523264   ;;  %v878_v1 = vld [vmem:[#allocation4 + $0x8] sm:$0xff] (!%p4165_p12)  ;;  %v879_v2 = vld [vmem:[#allocation4 + $0x10] sm:$0xff] (!%p4165_p12) }
 0x1b1   : > { %876 = sbr.rel (%p4165_p12) target bundleno = 440 (0x1b8), region = 128  ;;  %882 = vst.msk [vmem:[#allocation2] sm:$0xff] (!%p4165_p12), %vm881_vm0, %v877_v0  ;;  %883 = vst.msk [vmem:[#allocation2 + $0x8] sm:$0xff] (!%p4165_p12), %vm881_vm0, %v878_v1  ;;  %v880_v3 = vld [vmem:[#allocation4 + $0x18] sm:$0xff] (!%p4165_p12) }
 0x1b2   : > { %884 = vst.msk [vmem:[#allocation2 + $0x10] sm:$0xff] (!%p4165_p12), %vm881_vm0, %v879_v2  ;;  %885 = vst.msk [vmem:[#allocation2 + $0x18] sm:$0xff] (!%p4165_p12), %vm881_vm0, %v880_v3 }
 0x1b8 PF: > { %v886_v4 = vld [vmem:[#allocation2] sm:$0xff]  ;;  %vm890_vm1 = vcmask 523264   ;;  %v887_v6 = vld [vmem:[#allocation2 + $0x8] sm:$0xff]  ;;  %v4715_v35 = vld [vmem:[%s6028_s10 + $0x10] ss:$8 sps:$4 sm:$0xff]   ;;  %v5429_v37 = vmov 0  }
 0x1b9   : > { %v888_v5 = vld [vmem:[#allocation2 + $0x10] sm:$0xff]  ;;  %v891_v7 = vsel %vm890_vm1, %v886_v4, 0.0  ;;  %v889_v9 = vld [vmem:[#allocation2 + $0x18] sm:$0xff]  ;;  %v894_v10 = vsel %vm890_vm1, %v887_v6, 0.0  ;;  %v4712_v33 = vld [vmem:[%s6028_s10] ss:$8 sps:$4 sm:$0xff]   ;;  %1066 = vmatprep.mubr.bf16.mxu0 %v5429_v37 }
 0x1ba   : > { %v897_v8 = vsel %vm890_vm1, %v888_v5, 0.0  ;;  %892 = vadd.xlane.f32.xlu0 %v891_v7  ;;  %v900_v11 = vsel %vm890_vm1, %v889_v9, 0.0  ;;  %v4710_v32 = vld [vmem:[%s6028_s10 + $0x4] ss:$8 sps:$4 sm:$0xff]   ;;  %v4713_v34 = vld [vmem:[%s6028_s10 + $0x14] ss:$8 sps:$4 sm:$0xff]  }
 0x1bb   : > { %898 = vadd.xlane.f32.xlu1 %v897_v8  ;;  %1034 = vmatprep.subr.bf16.mxu0 %v4710_v32  ;;  %v4716_v36 = vld [vmem:[%s6028_s10 + $0x24] ss:$8 sps:$4 sm:$0xff]   ;;  %v4718_v38 = vld [vmem:[%s6028_s10 + $0x20] ss:$8 sps:$4 sm:$0xff]   ;;  %v4719_v39 = vld [vmem:[%s6028_s10 + $0x34] ss:$8 sps:$4 sm:$0xff]  }
 0x1bc   : > { %1035 = vmatpush1.bf16.msra.mxu0 %v4712_v33  ;;  %v4721_v40 = vld [vmem:[%s6028_s10 + $0x30] ss:$8 sps:$4 sm:$0xff]   ;;  %v4166_v55 = vld [vmem:[%s689_s1] ss:$0 sm:$0xff]  ;;  %vm5431_vm2 = vmmov 0   ;;  %s5432_s20 = smov 64  }
 0x1bd   : > { %1036 = vmatprep.subr.bf16.mxu0 %v4713_v34  ;;  %v4167_v60 = vld [vmem:[%s697_s12] ss:$0 sm:$0xff]  ;;  %vm1105_vm3 = vcmask 64512   ;;  %vm1211_vm5 = vcmask 130048   ;;  %s5433_s21 = smov 56   ;;  %s5434_s1 = smov 120  }
 0x1be   : > { %895 = vadd.xlane.f32.xlu0 %v894_v10  ;;  %s5435_s12 = smov 48   ;;  %s5436_s10 = smov 112   ;;  %vm1618_vm7 = vcmask 130112   ;;  %vm1889_vm8 = vcmask 195712   ;;  %vm2160_vm9 = vcmask 261312   ;;  %vm2431_vm10 = vcmask 326912  }
 0x1bf   : > { %901 = vadd.xlane.f32.xlu1 %v900_v11  ;;  %s5437_s7 = smov 40   ;;  %s5439_s25 = smov 32   ;;  %vm2702_vm11 = vcmask 392512   ;;  %vm2973_vm12 = vcmask 458112   ;;  %vm3244_vm13 = vcmask 523712  }
 0x1c0   : > { %1037 = vmatpush1.bf16.msra.mxu0 %v4715_v35  ;;  %s5440_s13 = smov 96   ;;  %s5441_s27 = smov 24  }
 0x1c1   : > { %1038 = vmatprep.subr.bf16.mxu0 %v4716_v36  ;;  %s5442_s24 = smov 88  }
 0x1c4   : > { %1039 = vmatpush1.bf16.msra.mxu0 %v4718_v38 }
 0x1c5   : > { %1040 = vmatprep.subr.bf16.mxu0 %v4719_v39 }
 0x1c8   : > { %1041 = vmatpush1.bf16.msra.mxu0 %v4721_v40 }
 0x247   : > { %v893_v12 = vpop.xlane.xlu0 %892 }
 0x248   : > { %v899_v13 = vpop.xlane.xlu1 %898  ;;  %v904_v14 = vmul.f32 0.015625, %v893_v12  ;;  %v5430_v12 = vmov 0.0  }
 0x249   : > { %v906_v15 = vmul.f32 0.015625, %v899_v13  ;;  %4355 = vmatprep.subr.bf16.mxu0 %v5430_v12  ;;  %4361 = vmatprep.subr.bf16.mxu1 %v5430_v12  ;;  %v976_v13 = vld [vmem:[%s6036_s23] sm:$0x3]  ;;  %s5438_s23 = smov 104  }
 0x24a   : > { %v908_v16 = vsub.f32 %v886_v4, %v904_v14  ;;  %4363 = vmatprep.mubr.msk.bf16.mxu1 %vm5431_vm2, %v5430_v12 }
 0x24b   : > { %v6076_v17 = vsub.f32 %v888_v5, %v906_v15  ;;  %v896_v18 = vpop.xlane.xlu0 %895 }
 0x24c   : > { %v902_v19 = vpop.xlane.xlu1 %901  ;;  %v905_v20 = vmul.f32 0.015625, %v896_v18  ;;  %v912_v22 = vmul.f32 %v908_v16, %v908_v16 }
 0x24d   : > { %v907_v21 = vmul.f32 0.015625, %v902_v19  ;;  %v914_v23 = vmul.f32 %v6076_v17, %v6076_v17 }
 0x24e   : > { %v909_v24 = vsub.f32 %v887_v6, %v905_v20  ;;  %v916_v26 = vsel %vm890_vm1, %v912_v22, 0.0 }
 0x24f   : > { %v911_v25 = vsub.f32 %v889_v9, %v907_v21  ;;  %917 = vadd.xlane.f32.xlu0 %v916_v26  ;;  %v922_v27 = vsel %vm890_vm1, %v914_v23, 0.0  ;;  %v978_v9 = vlaneseq }
 0x250   : > { %v913_v28 = vmul.f32 %v909_v24, %v909_v24 }
 0x251   : > { %v915_v29 = vmul.f32 %v911_v25, %v911_v25  ;;  %v6101_v10 = vshrl.u32 %v978_v9, 7 }
 0x252   : > { %v919_v30 = vsel %vm890_vm1, %v913_v28, 0.0 }
 0x253   : > { %923 = vadd.xlane.f32.xlu0 %v922_v27  ;;  %920 = vadd.xlane.f32.xlu1 %v919_v30  ;;  %v925_v31 = vsel %vm890_vm1, %v915_v29, 0.0  ;;  %v980_v11 = vsub.s32 0, %v6101_v10  ;;  %v984_v14 = vsub.s32 1, %v6101_v10 }
 0x255   : > { %v981_v15 = vrot.slane %v976_v13, %v980_v11 }
 0x257   : > { %926 = vadd.xlane.f32.xlu1 %v925_v31 }
 0x2dc   : > { %v918_v41 = vpop.xlane.xlu0 %917 }
 0x2dd   : > { %v928_v42 = vmul.f32 0.015625, %v918_v41 }
 0x2df   : > { %v932_v43 = vadd.f32 1e-05, %v928_v42  ;;  %v1091_v42 = vand.u32 127, %v978_v9 }
 0x2e0   : > { %v921_v44 = vpop.xlane.xlu1 %920  ;;  %v924_v45 = vpop.xlane.xlu0 %923 }
 0x2e1   : > { %4754 = vrsqrt.f32 %v932_v43  ;;  %v929_v46 = vmul.f32 0.015625, %v921_v44  ;;  %v930_v47 = vmul.f32 0.015625, %v924_v45  ;;  %v1089_v43 = vadd.s32 8, %v6101_v10 }
 0x2e2   : > { %vm6144_vm4 = vcmp.le.s32.totalorder %v1091_v42, %v6101_v10 }
 0x2e3   : > { %v933_v48 = vadd.f32 1e-05, %v929_v46  ;;  %v934_v49 = vadd.f32 1e-05, %v930_v47  ;;  %vm6148_vm6 = vcmp.le.s32.totalorder %v1091_v42, %v1089_v43 }
 0x2e4   : > { %v927_v50 = vpop.xlane.xlu1 %926 }
 0x2e5   : > { %4756 = vrsqrt.f32 %v933_v48  ;;  %v931_v51 = vmul.f32 0.015625, %v927_v50 }
 0x2e6   : > { %4758 = vrsqrt.f32 %v934_v49 }
 0x2e7   : > { %v935_v52 = vadd.f32 1e-05, %v931_v51 }
 0x2e9   : > { %4760 = vrsqrt.f32 %v935_v52 }
 0x2eb   : > { %v4755_v53 = vpop.eup %4754 }
 0x2ec   : > { %v940_v54 = vmul.f32 %v4755_v53, %v908_v16 }
 0x2ee   : > { %v951_v58 = vmul.f32 %v4166_v55, %v940_v54 }
 0x2ef   : > { %v4757_v56 = vpop.eup %4756 }
 0x2f0   : > { %v941_v57 = vmul.f32 %v4757_v56, %v909_v24  ;;  %v4759_v59 = vpop.eup %4758  ;;  %v962_v63 = vadd.f32 %v4167_v60, %v951_v58 }
 0x2f1   : > { %v942_v1 = vmul.f32 %v4759_v59, %v6076_v17  ;;  %v985_v17 = vrot.slane %v976_v13, %v984_v14 }
 0x2f2   : > { %v952_v61 = vmul.f32 %v4166_v55, %v941_v57 }
 0x2f3   : > { %v4761_v62 = vpop.eup %4760  ;;  %v953_v5 = vmul.f32 %v4166_v55, %v942_v1 }
 0x2f4   : > { %v963_v0 = vadd.f32 %v4167_v60, %v952_v61  ;;  %v943_v2 = vmul.f32 %v4761_v62, %v911_v25 }
 0x2f5   : > { %v964_v7 = vadd.f32 %v4167_v60, %v953_v5 }
 0x2f6   : > { %v966_v3 = vpack.c.bf16 %v963_v0, %v962_v63  ;;  %v954_v4 = vmul.f32 %v4166_v55, %v943_v2 }
 0x2f8   : > { %4176 = vmatmul.mubr.msk.bf16.vlgmr.msra.gmra.mrb[0].mxu0 %vm890_vm1, %v966_v3  ;;  %v965_v6 = vadd.f32 %v4167_v60, %v954_v4 }
 0x2f9   : > { %1076 = vmatprep.mubr.bf16.mxu0 %v5429_v37 }
 0x2fa   : > { %v967_v8 = vpack.c.bf16 %v965_v6, %v964_v7 }
 0x300   : > { %4177 = vmatmul.mubr.msk.bf16.gmra.mrb[4].mxu0 %vm890_vm1, %v967_v8 }
 0x301   : > { %4357 = vmatprep.mubr.msk.bf16.mxu0 %vm5431_vm2, %v5430_v12 }
 0x3cb   : > { %v1068_v16 = vpop.f32.mrb[0].mxu0 }
 0x3cc   : > { %v1070_v18 = vpop.f32.mrb[1].mxu0  ;;  %v1069_v20 = vadd.f32 %v1068_v16, %v981_v15 }
 0x3cd   : > { %v1072_v19 = vpop.f32.mrb[2].mxu0  ;;  %v1071_v23 = vadd.f32 %v1070_v18, %v985_v17 }
 0x3ce   : > { %v1073_v21 = vadd.f32 %v1072_v19, %v981_v15  ;;  %v1074_v22 = vpop.f32.mrb[3].mxu0 }
 0x3cf   : > { %v1075_v24 = vadd.f32 %v1074_v22, %v985_v17 }
 0x3d0   : > { %v6116_v25 = vpack.c.bf16 %v1073_v21, %v1069_v20 }
 0x3d1   : > { %v6118_v26 = vpack.c.bf16 %v1075_v24, %v1071_v23 }
 0x3d2   : > { %1103 = vrot.lane.b32.xlu0 %v6116_v25, %s5432_s20 }
 0x3d3   : > { %v1078_v27 = vpop.f32.mrb[4].mxu0 }
 0x3d4   : > { %v1080_v28 = vpop.f32.mrb[5].mxu0  ;;  %v1079_v30 = vadd.f32 %v1078_v27, %v981_v15 }
 0x3d5   : > { %v1082_v29 = vpop.f32.mrb[6].mxu0  ;;  %v1081_v33 = vadd.f32 %v1080_v28, %v985_v17 }
 0x3d6   : > { %v1083_v31 = vadd.f32 %v1082_v29, %v981_v15  ;;  %v1084_v32 = vpop.f32.mrb[7].mxu0 }
 0x3d7   : > { %v1085_v34 = vadd.f32 %v1084_v32, %v985_v17 }
 0x3d8   : > { %v6121_v35 = vpack.c.bf16 %v1083_v31, %v1079_v30 }
 0x3d9   : > { %v6123_v36 = vpack.c.bf16 %v1085_v34, %v1081_v33 }
 0x3da   : > { %1154 = vrot.lane.b32.xlu1 %v6121_v35, %s5432_s20  ;;  %s5443_s20 = smov 16  }
 0x444   : > { %v1104_v38 = vpop.permute.xlu0 %1103 }
 0x445   : > { %v1110_v39 = vsel %vm1105_vm3, %v1104_v38, 0 }
 0x446   : > { %4356 = vmatpush3.bf16.xpose.msra.mxu0 %v1110_v39 }
 0x447   : > { %4373 = vmatprep.subr.bf16.mxu0 %v5430_v12 }
 0x44c   : > { %v1155_v40 = vpop.permute.xlu1 %1154 }
 0x44d   : > { %4358 = vmatmul.mubr.msk.bf16.vlgmr.msra.gmra.mrb[8].mxu0 %vm1105_vm3, %v6116_v25  ;;  %v1160_v41 = vsel %vm1105_vm3, %v1155_v40, 0 }
 0x44e   : > { %4362 = vmatpush3.bf16.xpose.msra.mxu1 %v1160_v41  ;;  %4374 = vmatpush3.bf16.msra.mxu0 %v6123_v36 }
 0x44f   : > { %4367 = vmatprep.subr.bf16.mxu1 %v5430_v12  ;;  %4375 = vmatprep.mubr.msk.bf16.mxu0 %vm5431_vm2, %v5430_v12 }
 0x450   : > { %4385 = vmatprep.subr.bf16.mxu0 %v5430_v12 }
 0x455   : > { %4364 = vmatmul.mubr.msk.bf16.vlgmr.msra.gmra.mrb[0].mxu1 %vm1105_vm3, %v6121_v35 }
 0x456   : > { %4368 = vmatpush3.bf16.msra.mxu1 %v6118_v26  ;;  %4369 = vmatprep.mubr.msk.bf16.mxu1 %vm5431_vm2, %v5430_v12 }
 0x457   : > { %4379 = vmatprep.subr.bf16.mxu1 %v5430_v12 }
 0x520   : > { %v1146_v45 = vpop.f32.mrb[8].mxu0 }
 0x521   : > { %v1203_v46 = vmul.f32 0.35355338, %v1146_v45  ;;  %v4359_v47 = vpop.f32.mrb[9].mxu0 }
 0x522   : > { %v1149_v49 = vpop.f32.mrb[10].mxu0 }
 0x523   : > { %v1204_v50 = vmul.f32 0.35355338, %v1149_v49  ;;  %v4360_v51 = vpop.f32.mrb[11].mxu0  ;;  %v1207_v52 = vsel %vm6144_vm4, %v1203_v46, -inf }
 0x524   : > { %v1212_v53 = vsel %vm1211_vm5, %v1207_v52, -inf }
 0x525   : > { %1213 = vmax.xlane.f32.xlu1 %v1212_v53  ;;  %v1208_v54 = vsel %vm6148_vm6, %v1204_v50, -inf }
 0x526   : > { %v1215_v55 = vsel %vm1211_vm5, %v1208_v54, -inf }
 0x527   : > { %1216 = vmax.xlane.f32.xlu0 %v1215_v55 }
 0x528   : > { %v1196_v56 = vpop.f32.mrb[0].mxu1 }
 0x529   : > { %v1205_v57 = vmul.f32 0.35355338, %v1196_v56  ;;  %v4365_v58 = vpop.f32.mrb[1].mxu1 }
 0x52a   : > { %v1199_v59 = vpop.f32.mrb[2].mxu1 }
 0x52b   : > { %v1206_v60 = vmul.f32 0.35355338, %v1199_v59  ;;  %v4366_v61 = vpop.f32.mrb[3].mxu1  ;;  %v1209_v62 = vsel %vm6144_vm4, %v1205_v57, -inf }
 0x52c   : > { %v1218_v63 = vsel %vm1211_vm5, %v1209_v62, -inf }
 0x52d   : > { %1219 = vmax.xlane.f32.xlu0 %v1218_v63  ;;  %v1210_v0 = vsel %vm6148_vm6, %v1206_v60, -inf }
 0x52e   : > { %v1221_v1 = vsel %vm1211_vm5, %v1210_v0, -inf }
 0x52f   : > { %1222 = vmax.xlane.f32.xlu1 %v1221_v1 }
 0x5b2   : > { %v1214_v2 = vpop.xlane.xlu1 %1213 }
 0x5b3   : > { %v1224_v3 = vsub.f32 %v1207_v52, %v1214_v2 }
 0x5b4   : > { %v1217_v4 = vpop.xlane.xlu0 %1216 }
 0x5b5   : > { %v1228_v5 = vmul.f32 1.442695, %v1224_v3  ;;  %v1225_v6 = vsub.f32 %v1208_v54, %v1217_v4 }
 0x5b7   : > { %4762 = vpow2.f32 %v1228_v5  ;;  %v1230_v7 = vmul.f32 1.442695, %v1225_v6 }
 0x5b9   : > { %4764 = vpow2.f32 %v1230_v7 }
 0x5ba   : > { %v1220_v8 = vpop.xlane.xlu0 %1219 }
 0x5bb   : > { %v1226_v9 = vsub.f32 %v1209_v62, %v1220_v8 }
 0x5bc   : > { %v1223_v21 = vpop.xlane.xlu1 %1222 }
 0x5bd   : > { %v1232_v13 = vmul.f32 1.442695, %v1226_v9  ;;  %v1227_v22 = vsub.f32 %v1210_v0, %v1223_v21 }
 0x5bf   : > { %4766 = vpow2.f32 %v1232_v13  ;;  %v1234_v23 = vmul.f32 1.442695, %v1227_v22 }
 0x5c1   : > { %v4763_v15 = vpop.eup %4762  ;;  %4768 = vpow2.f32 %v1234_v23 }
 0x5c2   : > { %v1236_v16 = vsel %vm1211_vm5, %v4763_v15, 0.0 }
 0x5c3   : > { %v4765_v17 = vpop.eup %4764  ;;  %1237 = vadd.xlane.f32.xlu0 %v1236_v16 }
 0x5c4   : > { %v1239_v18 = vsel %vm1211_vm5, %v4765_v17, 0.0 }
 0x5c5   : > { %1240 = vadd.xlane.f32.xlu1 %v1239_v18 }
 0x5c9   : > { %v4767_v19 = vpop.eup %4766 }
 0x5ca   : > { %v1242_v20 = vsel %vm1211_vm5, %v4767_v19, 0.0 }
 0x5cb   : > { %1243 = vadd.xlane.f32.xlu0 %v1242_v20  ;;  %v4769_v24 = vpop.eup %4768 }
 0x5cc   : > { %v1245_v27 = vsel %vm1211_vm5, %v4769_v24, 0.0 }
 0x5d6   : > { %1403 = vrot.lane.b32.xlu1 %v6121_v35, %s5433_s21 }
 0x5e1   : > { %1352 = vrot.lane.b32.xlu0 %v6116_v25, %s5433_s21 }
 0x5fa   : > { %1246 = vadd.xlane.f32.xlu1 %v1245_v27 }
 0x60b   : > { %1350 = vrot.lane.b32.xlu1 %v6116_v25, %s5434_s1 }
 0x60f   : > { %1401 = vrot.lane.b32.xlu1 %v6121_v35, %s5434_s1 }
 0x650   : > { %v1238_v28 = vpop.xlane.xlu0 %1237 }
 0x651   : > { %4770 = vrcp.f32 %v1238_v28 }
 0x652   : > { %v1241_v29 = vpop.xlane.xlu1 %1240 }
 0x653   : > { %4772 = vrcp.f32 %v1241_v29 }
 0x656   : > { %v1404_v41 = vpop.permute.xlu1 %1403 }
 0x657   : > { %v1409_v51 = vsel %vm1105_vm3, %v1404_v41, 0 }
 0x658   : > { %v1244_v30 = vpop.xlane.xlu0 %1243 }
 0x659   : > { %4774 = vrcp.f32 %v1244_v30 }
 0x65b   : > { %v4771_v31 = vpop.eup %4770 }
 0x65c   : > { %v1252_v33 = vmul.f32 %v4771_v31, %v4763_v15  ;;  %v1353_v38 = vpop.permute.xlu0 %1352 }
 0x65d   : > { %v4773_v32 = vpop.eup %4772  ;;  %v1358_v40 = vsel %vm1105_vm3, %v1353_v38, 0 }
 0x65e   : > { %v1253_v34 = vmul.f32 %v4773_v32, %v4765_v17 }
 0x660   : > { %v1256_v39 = vpack.c.bf16 %v1253_v34, %v1252_v33 }
 0x662   : > { %4370 = vmatmul.mubr.msk.bf16.vlgmr.msra.gmra.mrb[4].mxu1 %vm1211_vm5, %v1256_v39 }
 0x663   : > { %4380 = vmatpush3.bf16.xpose.msra.mxu1 %v1358_v40  ;;  %4381 = vmatprep.mubr.msk.bf16.mxu1 %vm5431_vm2, %v5430_v12  ;;  %v4775_v45 = vpop.eup %4774 }
 0x664   : > { %4391 = vmatprep.subr.bf16.mxu1 %v5430_v12  ;;  %v1254_v47 = vmul.f32 %v4775_v45, %v4767_v19 }
 0x687   : > { %v1247_v42 = vpop.xlane.xlu1 %1246 }
 0x688   : > { %4776 = vrcp.f32 %v1247_v42 }
 0x68b   : > { %v1351_v43 = vpop.permute.xlu1 %1350 }
 0x68c   : > { %4382 = vmatmul.mubr.msk.bf16.vlgmr.msra.gmra.mrb[8].mxu1 %vm1105_vm3, %v1351_v43 }
 0x68d   : > { %4393 = vmatprep.mubr.msk.bf16.mxu1 %vm5431_vm2, %v5430_v12 }
 0x68f   : > { %v1402_v52 = vpop.permute.xlu1 %1401 }
 0x692   : > { %v4777_v46 = vpop.eup %4776 }
 0x693   : > { %v1255_v49 = vmul.f32 %v4777_v46, %v4769_v24 }
 0x695   : > { %v1257_v50 = vpack.c.bf16 %v1255_v49, %v1254_v47 }
 0x697   : > { %4376 = vmatmul.mubr.msk.bf16.vlgmr.msra.gmra.mrb[12].mxu0 %vm1211_vm5, %v1257_v50 }
 0x698   : > { %4386 = vmatpush3.bf16.xpose.msra.mxu0 %v1409_v51  ;;  %4387 = vmatprep.mubr.msk.bf16.mxu0 %vm5431_vm2, %v5430_v12 }
 0x699   : > { %4397 = vmatprep.subr.bf16.mxu0 %v5430_v12 }
 0x69f   : > { %4388 = vmatmul.mubr.msk.bf16.vlgmr.msra.gmra.mrb[16].mxu0 %vm1105_vm3, %v1402_v52 }
 0x6a0   : > { %4399 = vmatprep.mubr.msk.bf16.mxu0 %vm5431_vm2, %v5430_v12 }
 0x735   : > { %v1295_v53 = vpop.f32.mrb[4].mxu1 }
 0x736   : > { %1346 = vst.msk [vmem:[#allocation3] sm:$0xff] %vm1105_vm3, %v1295_v53  ;;  %v4371_v54 = vpop.f32.mrb[5].mxu1 }
 0x737   : > { %v1298_v55 = vpop.f32.mrb[6].mxu1 }
 0x738   : > { %1347 = vst.msk [vmem:[#allocation3 + $0x8] sm:$0xff] %vm1105_vm3, %v1298_v55  ;;  %v4372_v56 = vpop.f32.mrb[7].mxu1 }
 0x75f   : > { %v1394_v57 = vpop.f32.mrb[8].mxu1 }
 0x760   : > { %v1452_v58 = vmul.f32 0.35355338, %v1394_v57  ;;  %v4383_v59 = vpop.f32.mrb[9].mxu1 }
 0x761   : > { %v1397_v60 = vpop.f32.mrb[10].mxu1 }
 0x762   : > { %v1453_v61 = vmul.f32 0.35355338, %v1397_v60  ;;  %v4384_v62 = vpop.f32.mrb[11].mxu1  ;;  %v1456_v63 = vsel %vm6144_vm4, %v1452_v58, -inf }
 0x763   : > { %v1460_v0 = vsel %vm1211_vm5, %v1456_v63, -inf }
 0x764   : > { %1461 = vmax.xlane.f32.xlu0 %v1460_v0  ;;  %v1457_v1 = vsel %vm6148_vm6, %v1453_v61, -inf }
 0x765   : > { %v1463_v2 = vsel %vm1211_vm5, %v1457_v1, -inf }
 0x766   : > { %1464 = vmax.xlane.f32.xlu1 %v1463_v2 }
 0x76a   : > { %v1339_v3 = vpop.f32.mrb[12].mxu0 }
 0x76b   : > { %1348 = vst.msk [vmem:[#allocation3 + $0x10] sm:$0xff] %vm1105_vm3, %v1339_v3  ;;  %v4377_v4 = vpop.f32.mrb[13].mxu0 }
 0x76c   : > { %v1342_v5 = vpop.f32.mrb[14].mxu0 }
 0x76d   : > { %1349 = vst.msk [vmem:[#allocation3 + $0x18] sm:$0xff] %vm1105_vm3, %v1342_v5  ;;  %v4378_v6 = vpop.f32.mrb[15].mxu0 }
 0x772   : > { %v1445_v7 = vpop.f32.mrb[16].mxu0 }
 0x773   : > { %v1454_v8 = vmul.f32 0.35355338, %v1445_v7  ;;  %v4389_v9 = vpop.f32.mrb[17].mxu0 }
 0x774   : > { %v1448_v13 = vpop.f32.mrb[18].mxu0 }
 0x775   : > { %v1455_v15 = vmul.f32 0.35355338, %v1448_v13  ;;  %v4390_v16 = vpop.f32.mrb[19].mxu0  ;;  %v1458_v17 = vsel %vm6144_vm4, %v1454_v8, -inf }
 0x776   : > { %v1466_v18 = vsel %vm1211_vm5, %v1458_v17, -inf }
 0x777   : > { %1467 = vmax.xlane.f32.xlu0 %v1466_v18  ;;  %v1459_v19 = vsel %vm6148_vm6, %v1455_v15, -inf }
 0x778   : > { %v1469_v20 = vsel %vm1211_vm5, %v1459_v19, -inf }
 0x77b   : > { %1470 = vmax.xlane.f32.xlu0 %v1469_v20 }
 0x7f1   : > { %v1462_v21 = vpop.xlane.xlu0 %1461 }
 0x7f2   : > { %v1472_v22 = vsub.f32 %v1456_v63, %v1462_v21 }
 0x7f3   : > { %v1465_v23 = vpop.xlane.xlu1 %1464 }
 0x7f4   : > { %v1476_v24 = vmul.f32 1.442695, %v1472_v22  ;;  %v1473_v27 = vsub.f32 %v1457_v1, %v1465_v23 }
 0x7f6   : > { %4778 = vpow2.f32 %v1476_v24  ;;  %v1478_v28 = vmul.f32 1.442695, %v1473_v27 }
 0x7f8   : > { %4780 = vpow2.f32 %v1478_v28 }
 0x800   : > { %v4779_v29 = vpop.eup %4778 }
 0x801   : > { %v1484_v30 = vsel %vm1211_vm5, %v4779_v29, 0.0 }
 0x802   : > { %v4781_v31 = vpop.eup %4780  ;;  %1485 = vadd.xlane.f32.xlu0 %v1484_v30 }
 0x803   : > { %v1487_v32 = vsel %vm1211_vm5, %v4781_v31, 0.0 }
 0x804   : > { %1488 = vadd.xlane.f32.xlu1 %v1487_v32  ;;  %v1468_v33 = vpop.xlane.xlu0 %1467 }
 0x805   : > { %v1474_v34 = vsub.f32 %v1458_v17, %v1468_v33 }
 0x807   : > { %v1480_v38 = vmul.f32 1.442695, %v1474_v34 }
 0x808   : > { %v1471_v41 = vpop.xlane.xlu0 %1470 }
 0x809   : > { %4782 = vpow2.f32 %v1480_v38  ;;  %v1475_v42 = vsub.f32 %v1459_v19, %v1471_v41 }
 0x80b   : > { %v1482_v43 = vmul.f32 1.442695, %v1475_v42 }
 0x80d   : > { %4784 = vpow2.f32 %v1482_v43 }
 0x813   : > { %v4783_v39 = vpop.eup %4782 }
 0x814   : > { %v1490_v40 = vsel %vm1211_vm5, %v4783_v39, 0.0 }
 0x815   : > { %1555 = vrot.lane.b32.xlu1 %v6123_v36, %s5434_s1  ;;  %1491 = vadd.xlane.f32.xlu0 %v1490_v40 }
 0x817   : > { %v4785_v45 = vpop.eup %4784 }
 0x818   : > { %v1493_v46 = vsel %vm1211_vm5, %v4785_v45, 0.0 }
 0x819   : > { %1625 = vrot.lane.b32.xlu1 %v6116_v25, %s5435_s12 }
 0x82b   : > { %1507 = vrot.lane.b32.xlu0 %v6118_v26, %s5434_s1  ;;  %s5444_s1 = smov 80  }
 0x82f   : > { %1623 = vrot.lane.b32.xlu0 %v6116_v25, %s5436_s10 }
 0x83d   : > { %1494 = vadd.xlane.f32.xlu1 %v1493_v46 }
 0x84e   : > { %1676 = vrot.lane.b32.xlu1 %v6121_v35, %s5435_s12 }
 0x852   : > { %1674 = vrot.lane.b32.xlu1 %v6121_v35, %s5436_s10 }
 0x88f   : > { %v1486_v50 = vpop.xlane.xlu0 %1485 }
 0x891   : > { %v1489_v47 = vpop.xlane.xlu1 %1488 }
 0x892   : > { %4786 = vrcp.f32 %v1489_v47 }
 0x893   : > { %4788 = vrcp.f32 %v1486_v50 }
 0x895   : > { %v1556_v49 = vpop.permute.xlu1 %1555 }
 0x896   : > { %4398 = vmatpush3.bf16.msra.mxu0 %v1556_v49 }
 0x897   : > { %4409 = vmatprep.subr.bf16.mxu0 %v5430_v12 }
 0x899   : > { %v1626_v58 = vpop.permute.xlu1 %1625 }
 0x89a   : > { %v1631_v59 = vsel %vm1105_vm3, %v1626_v58, 0 }
 0x89c   : > { %v4787_v51 = vpop.eup %4786 }
 0x89d   : > { %v4789_v53 = vpop.eup %4788  ;;  %v1501_v54 = vmul.f32 %v4787_v51, %v4781_v31 }
 0x89e   : > { %v1500_v55 = vmul.f32 %v4789_v53, %v4779_v29 }
 0x8a0   : > { %v1504_v57 = vpack.c.bf16 %v1501_v54, %v1500_v55 }
 0x8a2   : > { %v1492_v52 = vpop.xlane.xlu0 %1491 }
 0x8a3   : > { %4790 = vrcp.f32 %v1492_v52 }
 0x8a6   : > { %v1508_v56 = vpop.permute.xlu0 %1507 }
 0x8a7   : > { %4392 = vmatpush3.bf16.msra.mxu1 %v1508_v56 }
 0x8a8   : > { %4403 = vmatprep.subr.bf16.mxu1 %v5430_v12 }
 0x8aa   : > { %4394 = vmatmul.mubr.msk.bf16.vlgmr.msra.gmra.mrb[12].mxu1 %vm1211_vm5, %v1504_v57  ;;  %v1624_v60 = vpop.permute.xlu0 %1623 }
 0x8ab   : > { %4405 = vmatprep.mubr.msk.bf16.mxu1 %vm5431_vm2, %v5430_v12 }
 0x8ad   : > { %v4791_v62 = vpop.eup %4790 }
 0x8ae   : > { %v1502_v0 = vmul.f32 %v4791_v62, %v4783_v39 }
 0x8b0   : > { %4404 = vmatpush3.bf16.xpose.msra.mxu1 %v1631_v59 }
 0x8b1   : > { %4415 = vmatprep.subr.bf16.mxu1 %v5430_v12 }
 0x8b7   : > { %4406 = vmatmul.mubr.msk.bf16.vlgmr.msra.gmra.mrb[16].mxu1 %vm1105_vm3, %v1624_v60 }
 0x8b8   : > { %4417 = vmatprep.mubr.msk.bf16.mxu1 %vm5431_vm2, %v5430_v12 }
 0x8ca   : > { %v1495_v61 = vpop.xlane.xlu1 %1494 }
 0x8cb   : > { %4792 = vrcp.f32 %v1495_v61 }
 0x8ce   : > { %v1677_v2 = vpop.permute.xlu1 %1676 }
 0x8cf   : > { %v1682_v4 = vsel %vm1105_vm3, %v1677_v2, 0 }
 0x8d2   : > { %v1675_v5 = vpop.permute.xlu1 %1674 }
 0x8d5   : > { %v4793_v63 = vpop.eup %4792 }
 0x8d6   : > { %v1503_v1 = vmul.f32 %v4793_v63, %v4785_v45 }
 0x8d8   : > { %v1505_v3 = vpack.c.bf16 %v1503_v1, %v1502_v0 }
 0x8da   : > { %4400 = vmatmul.mubr.msk.bf16.vlgmr.msra.gmra.mrb[20].mxu0 %vm1211_vm5, %v1505_v3 }
 0x8db   : > { %4410 = vmatpush3.bf16.xpose.msra.mxu0 %v1682_v4  ;;  %4411 = vmatprep.mubr.msk.bf16.mxu0 %vm5431_vm2, %v5430_v12 }
 0x8dc   : > { %4421 = vmatprep.subr.bf16.mxu0 %v5430_v12 }
 0x8e2   : > { %4412 = vmatmul.mubr.msk.bf16.vlgmr.msra.gmra.mrb[24].mxu0 %vm1105_vm3, %v1675_v5 }
 0x8e3   : > { %4423 = vmatprep.mubr.msk.bf16.mxu0 %vm5431_vm2, %v5430_v12 }
 0x97d   : > { %v6242_v6 = vpop.f32.mrb[12].mxu1 }
 0x97e   : > { %v4395_v7 = vpop.f32.mrb[13].mxu1 }
 0x97f   : > { %v6244_v8 = vpop.f32.mrb[14].mxu1 }
 0x980   : > { %v4396_v9 = vpop.f32.mrb[15].mxu1 }
 0x98a   : > { %v1667_v13 = vpop.f32.mrb[16].mxu1 }
 0x98b   : > { %v1725_v15 = vmul.f32 0.35355338, %v1667_v13  ;;  %v4407_v16 = vpop.f32.mrb[17].mxu1 }
 0x98c   : > { %v1670_v17 = vpop.f32.mrb[18].mxu1 }
 0x98d   : > { %v1726_v18 = vmul.f32 0.35355338, %v1670_v17  ;;  %v4408_v19 = vpop.f32.mrb[19].mxu1  ;;  %v1729_v20 = vsel %vm6144_vm4, %v1725_v15, -inf }
 0x98e   : > { %v1733_v21 = vsel %vm1211_vm5, %v1729_v20, -inf }
 0x98f   : > { %1734 = vmax.xlane.f32.xlu0 %v1733_v21  ;;  %v1730_v22 = vsel %vm6148_vm6, %v1726_v18, -inf }
 0x990   : > { %v1736_v23 = vsel %vm1211_vm5, %v1730_v22, -inf }
 0x991   : > { %1737 = vmax.xlane.f32.xlu1 %v1736_v23 }
 0x9ad   : > { %v6252_v24 = vpop.f32.mrb[20].mxu0 }
 0x9ae   : > { %v4401_v27 = vpop.f32.mrb[21].mxu0 }
 0x9af   : > { %v6254_v28 = vpop.f32.mrb[22].mxu0 }
 0x9b0   : > { %v4402_v29 = vpop.f32.mrb[23].mxu0 }
 0x9b5   : > { %v1718_v30 = vpop.f32.mrb[24].mxu0 }
 0x9b6   : > { %v1727_v31 = vmul.f32 0.35355338, %v1718_v30  ;;  %v4413_v32 = vpop.f32.mrb[25].mxu0 }
 0x9b7   : > { %v1721_v33 = vpop.f32.mrb[26].mxu0 }
 0x9b8   : > { %v1728_v34 = vmul.f32 0.35355338, %v1721_v33  ;;  %v4414_v38 = vpop.f32.mrb[27].mxu0  ;;  %v1731_v39 = vsel %vm6144_vm4, %v1727_v31, -inf }
 0x9b9   : > { %v1739_v40 = vsel %vm1211_vm5, %v1731_v39, -inf }
 0x9ba   : > { %1740 = vmax.xlane.f32.xlu0 %v1739_v40  ;;  %v1732_v41 = vsel %vm6148_vm6, %v1728_v34, -inf }
 0x9bb   : > { %v1742_v42 = vsel %vm1211_vm5, %v1732_v41, -inf }
 0x9be   : > { %1743 = vmax.xlane.f32.xlu0 %v1742_v42 }
 0xa1c   : > { %v1735_v43 = vpop.xlane.xlu0 %1734 }
 0xa1d   : > { %v1745_v45 = vsub.f32 %v1729_v20, %v1735_v43 }
 0xa1e   : > { %v1738_v46 = vpop.xlane.xlu1 %1737 }
 0xa1f   : > { %v1749_v47 = vmul.f32 1.442695, %v1745_v45  ;;  %v1746_v49 = vsub.f32 %v1730_v22, %v1738_v46 }
 0xa21   : > { %4794 = vpow2.f32 %v1749_v47  ;;  %v1751_v50 = vmul.f32 1.442695, %v1746_v49 }
 0xa23   : > { %4796 = vpow2.f32 %v1751_v50 }
 0xa2b   : > { %v4795_v51 = vpop.eup %4794 }
 0xa2c   : > { %v1757_v52 = vsel %vm1211_vm5, %v4795_v51, 0.0 }
 0xa2d   : > { %v4797_v53 = vpop.eup %4796  ;;  %1758 = vadd.xlane.f32.xlu0 %v1757_v52 }
 0xa2e   : > { %v1760_v54 = vsel %vm1211_vm5, %v4797_v53, 0.0 }
 0xa2f   : > { %1761 = vadd.xlane.f32.xlu1 %v1760_v54 }
 0xa40   : > { %1826 = vrot.lane.b32.xlu1 %v6123_v36, %s5436_s10 }
 0xa44   : > { %1896 = vrot.lane.b32.xlu1 %v6116_v25, %s5437_s7 }
 0xa47   : > { %v1741_v55 = vpop.xlane.xlu0 %1740 }
 0xa48   : > { %v1747_v56 = vsub.f32 %v1731_v39, %v1741_v55 }
 0xa4a   : > { %v1753_v57 = vmul.f32 1.442695, %v1747_v56 }
 0xa4b   : > { %v1744_v58 = vpop.xlane.xlu0 %1743 }
 0xa4c   : > { %4798 = vpow2.f32 %v1753_v57  ;;  %v1748_v59 = vsub.f32 %v1732_v41, %v1744_v58 }
 0xa4e   : > { %v1755_v61 = vmul.f32 1.442695, %v1748_v59 }
 0xa50   : > { %4800 = vpow2.f32 %v1755_v61 }
 0xa56   : > { %v4799_v60 = vpop.eup %4798 }
 0xa57   : > { %v1763_v62 = vsel %vm1211_vm5, %v4799_v60, 0.0 }
 0xa58   : > { %1764 = vadd.xlane.f32.xlu0 %v1763_v62 }
 0xa5a   : > { %v4801_v63 = vpop.eup %4800 }
 0xa5b   : > { %v1766_v0 = vsel %vm1211_vm5, %v4801_v63, 0.0 }
 0xa68   : > { %1767 = vadd.xlane.f32.xlu1 %v1766_v0 }
 0xa6e   : > { %1779 = vrot.lane.b32.xlu0 %v6118_v26, %s5436_s10  ;;  %s5445_s10 = smov 8  }
 0xa72   : > { %1894 = vrot.lane.b32.xlu0 %v6116_v25, %s5438_s23 }
 0xa79   : > { %1947 = vrot.lane.b32.xlu1 %v6121_v35, %s5437_s7 }
 0xa7d   : > { %1945 = vrot.lane.b32.xlu1 %v6121_v35, %s5438_s23 }
 0xaba   : > { %v1759_v3 = vpop.xlane.xlu0 %1758 }
 0xabc   : > { %v1762_v1 = vpop.xlane.xlu1 %1761 }
 0xabd   : > { %4802 = vrcp.f32 %v1762_v1 }
 0xabe   : > { %4804 = vrcp.f32 %v1759_v3 }
 0xac0   : > { %v1827_v2 = vpop.permute.xlu1 %1826 }
 0xac1   : > { %4422 = vmatpush3.bf16.msra.mxu0 %v1827_v2 }
 0xac2   : > { %4433 = vmatprep.subr.bf16.mxu0 %v5430_v12 }
 0xac4   : > { %v1897_v17 = vpop.permute.xlu1 %1896 }
 0xac5   : > { %v1902_v18 = vsel %vm1105_vm3, %v1897_v17, 0 }
 0xac7   : > { %v4803_v4 = vpop.eup %4802 }
 0xac8   : > { %v4805_v7 = vpop.eup %4804  ;;  %v1774_v9 = vmul.f32 %v4803_v4, %v4797_v53 }
 0xac9   : > { %v1773_v13 = vmul.f32 %v4805_v7, %v4795_v51 }
 0xacb   : > { %v1777_v16 = vpack.c.bf16 %v1774_v9, %v1773_v13 }
 0xae5   : > { %v1765_v5 = vpop.xlane.xlu0 %1764 }
 0xae6   : > { %4806 = vrcp.f32 %v1765_v5 }
 0xae9   : > { %v1780_v15 = vpop.permute.xlu0 %1779 }
 0xaea   : > { %4416 = vmatpush3.bf16.msra.mxu1 %v1780_v15 }
 0xaeb   : > { %4427 = vmatprep.subr.bf16.mxu1 %v5430_v12 }
 0xaed   : > { %4418 = vmatmul.mubr.msk.bf16.vlgmr.msra.gmra.mrb[20].mxu1 %vm1211_vm5, %v1777_v16  ;;  %v1895_v20 = vpop.permute.xlu0 %1894 }
 0xaee   : > { %4429 = vmatprep.mubr.msk.bf16.mxu1 %vm5431_vm2, %v5430_v12 }
 0xaf0   : > { %v4807_v21 = vpop.eup %4806 }
 0xaf1   : > { %v1775_v23 = vmul.f32 %v4807_v21, %v4799_v60 }
 0xaf3   : > { %4428 = vmatpush3.bf16.xpose.msra.mxu1 %v1902_v18 }
 0xaf4   : > { %4439 = vmatprep.subr.bf16.mxu1 %v5430_v12 }
 0xaf5   : > { %v1768_v19 = vpop.xlane.xlu1 %1767 }
 0xaf6   : > { %4808 = vrcp.f32 %v1768_v19 }
 0xaf9   : > { %v1948_v29 = vpop.permute.xlu1 %1947 }
 0xafa   : > { %4430 = vmatmul.mubr.msk.bf16.vlgmr.msra.gmra.mrb[24].mxu1 %vm1105_vm3, %v1895_v20  ;;  %v1953_v31 = vsel %vm1105_vm3, %v1948_v29, 0 }
 0xafb   : > { %4441 = vmatprep.mubr.msk.bf16.mxu1 %vm5431_vm2, %v5430_v12 }
 0xafd   : > { %v1946_v32 = vpop.permute.xlu1 %1945 }
 0xb00   : > { %v4809_v22 = vpop.eup %4808 }
 0xb01   : > { %v1776_v27 = vmul.f32 %v4809_v22, %v4801_v63 }
 0xb03   : > { %v1778_v30 = vpack.c.bf16 %v1776_v27, %v1775_v23 }
 0xb05   : > { %4424 = vmatmul.mubr.msk.bf16.vlgmr.msra.gmra.mrb[28].mxu0 %vm1211_vm5, %v1778_v30 }
 0xb06   : > { %4434 = vmatpush3.bf16.xpose.msra.mxu0 %v1953_v31  ;;  %4435 = vmatprep.mubr.msk.bf16.mxu0 %vm5431_vm2, %v5430_v12 }
 0xb07   : > { %4445 = vmatprep.subr.bf16.mxu0 %v5430_v12 }
 0xb0d   : > { %4436 = vmatmul.mubr.msk.bf16.vlgmr.msra.gmra.mrb[32].mxu0 %vm1105_vm3, %v1946_v32 }
 0xb0e   : > { %4447 = vmatprep.mubr.msk.bf16.mxu0 %vm5431_vm2, %v5430_v12 }
 0xbc0   : > { %v6296_v33 = vpop.f32.mrb[20].mxu1 }
 0xbc1   : > { %v4419_v34 = vpop.f32.mrb[21].mxu1 }
 0xbc2   : > { %v6298_v38 = vpop.f32.mrb[22].mxu1 }
 0xbc3   : > { %v4420_v39 = vpop.f32.mrb[23].mxu1 }
 0xbcd   : > { %v1938_v40 = vpop.f32.mrb[24].mxu1 }
 0xbce   : > { %v1996_v41 = vmul.f32 0.35355338, %v1938_v40  ;;  %v4431_v42 = vpop.f32.mrb[25].mxu1 }
 0xbcf   : > { %v1941_v43 = vpop.f32.mrb[26].mxu1 }
 0xbd0   : > { %v1997_v45 = vmul.f32 0.35355338, %v1941_v43  ;;  %v4432_v46 = vpop.f32.mrb[27].mxu1  ;;  %v2000_v47 = vsel %vm6144_vm4, %v1996_v41, -inf }
 0xbd1   : > { %v2004_v49 = vsel %vm1211_vm5, %v2000_v47, -inf }
 0xbd2   : > { %2005 = vmax.xlane.f32.xlu0 %v2004_v49  ;;  %v2001_v50 = vsel %vm6148_vm6, %v1997_v45, -inf }
 0xbd3   : > { %v2007_v51 = vsel %vm1211_vm5, %v2001_v50, -inf }
 0xbd4   : > { %2008 = vmax.xlane.f32.xlu1 %v2007_v51 }
 0xbd8   : > { %v6306_v52 = vpop.f32.mrb[28].mxu0 }
 0xbd9   : > { %v4425_v53 = vpop.f32.mrb[29].mxu0 }
 0xbda   : > { %v6308_v54 = vpop.f32.mrb[30].mxu0 }
 0xbdb   : > { %v4426_v55 = vpop.f32.mrb[31].mxu0 }
 0xbe0   : > { %v1989_v56 = vpop.f32.mrb[32].mxu0 }
 0xbe1   : > { %v1998_v57 = vmul.f32 0.35355338, %v1989_v56  ;;  %v4437_v58 = vpop.f32.mrb[33].mxu0 }
 0xbe2   : > { %v1992_v59 = vpop.f32.mrb[34].mxu0 }
 0xbe3   : > { %v1999_v60 = vmul.f32 0.35355338, %v1992_v59  ;;  %v4438_v61 = vpop.f32.mrb[35].mxu0  ;;  %v2002_v62 = vsel %vm6144_vm4, %v1998_v57, -inf }
 0xbe4   : > { %v2010_v63 = vsel %vm1211_vm5, %v2002_v62, -inf }
 0xbe5   : > { %2011 = vmax.xlane.f32.xlu0 %v2010_v63  ;;  %v2003_v0 = vsel %vm6148_vm6, %v1999_v60, -inf }
 0xbe6   : > { %v2013_v1 = vsel %vm1211_vm5, %v2003_v0, -inf }
 0xbe9   : > { %2014 = vmax.xlane.f32.xlu0 %v2013_v1 }
 0xc5f   : > { %v2006_v2 = vpop.xlane.xlu0 %2005 }
 0xc60   : > { %v2016_v3 = vsub.f32 %v2000_v47, %v2006_v2 }
 0xc61   : > { %v2009_v4 = vpop.xlane.xlu1 %2008 }
 0xc62   : > { %v2020_v5 = vmul.f32 1.442695, %v2016_v3  ;;  %v2017_v7 = vsub.f32 %v2001_v50, %v2009_v4 }
 0xc64   : > { %4810 = vpow2.f32 %v2020_v5  ;;  %v2022_v9 = vmul.f32 1.442695, %v2017_v7 }
 0xc66   : > { %4812 = vpow2.f32 %v2022_v9 }
 0xc6e   : > { %v4811_v13 = vpop.eup %4810 }
 0xc6f   : > { %v2028_v15 = vsel %vm1211_vm5, %v4811_v13, 0.0 }
 0xc70   : > { %v4813_v16 = vpop.eup %4812  ;;  %2029 = vadd.xlane.f32.xlu0 %v2028_v15 }
 0xc71   : > { %v2031_v17 = vsel %vm1211_vm5, %v4813_v16, 0.0 }
 0xc72   : > { %2032 = vadd.xlane.f32.xlu1 %v2031_v17  ;;  %v2012_v18 = vpop.xlane.xlu0 %2011 }
 0xc73   : > { %v2018_v19 = vsub.f32 %v2002_v62, %v2012_v18 }
 0xc75   : > { %v2024_v20 = vmul.f32 1.442695, %v2018_v19 }
 0xc76   : > { %v2015_v23 = vpop.xlane.xlu0 %2014 }
 0xc77   : > { %4814 = vpow2.f32 %v2024_v20  ;;  %v2019_v27 = vsub.f32 %v2003_v0, %v2015_v23 }
 0xc79   : > { %v2026_v29 = vmul.f32 1.442695, %v2019_v27 }
 0xc7b   : > { %4816 = vpow2.f32 %v2026_v29 }
 0xc81   : > { %v4815_v21 = vpop.eup %4814 }
 0xc82   : > { %v2034_v22 = vsel %vm1211_vm5, %v4815_v21, 0.0 }
 0xc83   : > { %2097 = vrot.lane.b32.xlu1 %v6123_v36, %s5438_s23  ;;  %2035 = vadd.xlane.f32.xlu0 %v2034_v22 }
 0xc85   : > { %v4817_v30 = vpop.eup %4816 }
 0xc86   : > { %v2037_v31 = vsel %vm1211_vm5, %v4817_v30, 0.0 }
 0xc87   : > { %2167 = vrot.lane.b32.xlu1 %v6116_v25, %s5439_s25 }
 0xc99   : > { %2050 = vrot.lane.b32.xlu0 %v6118_v26, %s5438_s23  ;;  %s5446_s23 = smov 72  }
 0xc9d   : > { %2165 = vrot.lane.b32.xlu0 %v6116_v25, %s5440_s13 }
 0xcab   : > { %2038 = vadd.xlane.f32.xlu1 %v2037_v31 }
 0xcbc   : > { %2218 = vrot.lane.b32.xlu1 %v6121_v35, %s5439_s25 }
 0xcc0   : > { %2216 = vrot.lane.b32.xlu1 %v6121_v35, %s5440_s13 }
 0xcfd   : > { %v2030_v39 = vpop.xlane.xlu0 %2029 }
 0xcff   : > { %v2033_v32 = vpop.xlane.xlu1 %2032 }
 0xd00   : > { %4818 = vrcp.f32 %v2033_v32 }
 0xd01   : > { %4820 = vrcp.f32 %v2030_v39 }
 0xd03   : > { %v2098_v34 = vpop.permute.xlu1 %2097 }
 0xd04   : > { %4446 = vmatpush3.bf16.msra.mxu0 %v2098_v34 }
 0xd05   : > { %4457 = vmatprep.subr.bf16.mxu0 %v5430_v12 }
 0xd07   : > { %v2168_v49 = vpop.permute.xlu1 %2167 }
 0xd08   : > { %v2173_v50 = vsel %vm1105_vm3, %v2168_v49, 0 }
 0xd0a   : > { %v4819_v40 = vpop.eup %4818 }
 0xd0b   : > { %v4821_v42 = vpop.eup %4820  ;;  %v2045_v43 = vmul.f32 %v4819_v40, %v4813_v16 }
 0xd0c   : > { %v2044_v45 = vmul.f32 %v4821_v42, %v4811_v13 }
 0xd0e   : > { %v2048_v47 = vpack.c.bf16 %v2045_v43, %v2044_v45 }
 0xd10   : > { %v2036_v41 = vpop.xlane.xlu0 %2035 }
 0xd11   : > { %4822 = vrcp.f32 %v2036_v41 }
 0xd14   : > { %v2051_v46 = vpop.permute.xlu0 %2050 }
 0xd15   : > { %4440 = vmatpush3.bf16.msra.mxu1 %v2051_v46 }
 0xd16   : > { %4451 = vmatprep.subr.bf16.mxu1 %v5430_v12 }
 0xd18   : > { %4442 = vmatmul.mubr.msk.bf16.vlgmr.msra.gmra.mrb[28].mxu1 %vm1211_vm5, %v2048_v47  ;;  %v2166_v51 = vpop.permute.xlu0 %2165 }
 0xd19   : > { %4453 = vmatprep.mubr.msk.bf16.mxu1 %vm5431_vm2, %v5430_v12 }
 0xd1b   : > { %v4823_v55 = vpop.eup %4822 }
 0xd1c   : > { %v2046_v57 = vmul.f32 %v4823_v55, %v4815_v21 }
 0xd1e   : > { %4452 = vmatpush3.bf16.xpose.msra.mxu1 %v2173_v50 }
 0xd1f   : > { %4463 = vmatprep.subr.bf16.mxu1 %v5430_v12 }
 0xd25   : > { %4454 = vmatmul.mubr.msk.bf16.vlgmr.msra.gmra.mrb[32].mxu1 %vm1105_vm3, %v2166_v51 }
 0xd26   : > { %4465 = vmatprep.mubr.msk.bf16.mxu1 %vm5431_vm2, %v5430_v12 }
 0xd38   : > { %v2039_v53 = vpop.xlane.xlu1 %2038 }
 0xd39   : > { %4824 = vrcp.f32 %v2039_v53 }
 0xd3c   : > { %v2219_v59 = vpop.permute.xlu1 %2218 }
 0xd3d   : > { %v2224_v61 = vsel %vm1105_vm3, %v2219_v59, 0 }
 0xd40   : > { %v2217_v62 = vpop.permute.xlu1 %2216 }
 0xd43   : > { %v4825_v56 = vpop.eup %4824 }
 0xd44   : > { %v2047_v58 = vmul.f32 %v4825_v56, %v4817_v30 }
 0xd46   : > { %v2049_v60 = vpack.c.bf16 %v2047_v58, %v2046_v57 }
 0xd48   : > { %4448 = vmatmul.mubr.msk.bf16.vlgmr.msra.gmra.mrb[36].mxu0 %vm1211_vm5, %v2049_v60 }
 0xd49   : > { %4458 = vmatpush3.bf16.xpose.msra.mxu0 %v2224_v61  ;;  %4459 = vmatprep.mubr.msk.bf16.mxu0 %vm5431_vm2, %v5430_v12 }
 0xd4a   : > { %4469 = vmatprep.subr.bf16.mxu0 %v5430_v12 }
 0xd50   : > { %4460 = vmatmul.mubr.msk.bf16.vlgmr.msra.gmra.mrb[40].mxu0 %vm1105_vm3, %v2217_v62 }
 0xd51   : > { %4471 = vmatprep.mubr.msk.bf16.mxu0 %vm5431_vm2, %v5430_v12 }
 0xdeb   : > { %v6350_v63 = vpop.f32.mrb[28].mxu1 }
 0xdec   : > { %v4443_v0 = vpop.f32.mrb[29].mxu1 }
 0xded   : > { %v6352_v1 = vpop.f32.mrb[30].mxu1 }
 0xdee   : > { %v4444_v2 = vpop.f32.mrb[31].mxu1 }
 0xdf8   : > { %v2209_v3 = vpop.f32.mrb[32].mxu1 }
 0xdf9   : > { %v2267_v4 = vmul.f32 0.35355338, %v2209_v3  ;;  %v4455_v5 = vpop.f32.mrb[33].mxu1 }
 0xdfa   : > { %v2212_v7 = vpop.f32.mrb[34].mxu1 }
 0xdfb   : > { %v2268_v9 = vmul.f32 0.35355338, %v2212_v7  ;;  %v4456_v13 = vpop.f32.mrb[35].mxu1  ;;  %v2271_v15 = vsel %vm6144_vm4, %v2267_v4, -inf }
 0xdfc   : > { %v2275_v16 = vsel %vm1211_vm5, %v2271_v15, -inf }
 0xdfd   : > { %2276 = vmax.xlane.f32.xlu0 %v2275_v16  ;;  %v2272_v17 = vsel %vm6148_vm6, %v2268_v9, -inf }
 0xdfe   : > { %v2278_v18 = vsel %vm1211_vm5, %v2272_v17, -inf }
 0xdff   : > { %2279 = vmax.xlane.f32.xlu1 %v2278_v18 }
 0xe1b   : > { %v6360_v19 = vpop.f32.mrb[36].mxu0 }
 0xe1c   : > { %v4449_v20 = vpop.f32.mrb[37].mxu0 }
 0xe1d   : > { %v6362_v21 = vpop.f32.mrb[38].mxu0 }
 0xe1e   : > { %v4450_v22 = vpop.f32.mrb[39].mxu0 }
 0xe23   : > { %v2260_v23 = vpop.f32.mrb[40].mxu0 }
 0xe24   : > { %v2269_v27 = vmul.f32 0.35355338, %v2260_v23  ;;  %v4461_v29 = vpop.f32.mrb[41].mxu0 }
 0xe25   : > { %v2263_v30 = vpop.f32.mrb[42].mxu0 }
 0xe26   : > { %v2270_v31 = vmul.f32 0.35355338, %v2263_v30  ;;  %v4462_v32 = vpop.f32.mrb[43].mxu0  ;;  %v2273_v34 = vsel %vm6144_vm4, %v2269_v27, -inf }
 0xe27   : > { %v2281_v39 = vsel %vm1211_vm5, %v2273_v34, -inf }
 0xe28   : > { %2282 = vmax.xlane.f32.xlu0 %v2281_v39  ;;  %v2274_v40 = vsel %vm6148_vm6, %v2270_v31, -inf }
 0xe29   : > { %v2284_v41 = vsel %vm1211_vm5, %v2274_v40, -inf }
 0xe2c   : > { %2285 = vmax.xlane.f32.xlu0 %v2284_v41 }
 0xe8a   : > { %v2277_v42 = vpop.xlane.xlu0 %2276 }
 0xe8b   : > { %v2287_v43 = vsub.f32 %v2271_v15, %v2277_v42 }
 0xe8c   : > { %v2280_v45 = vpop.xlane.xlu1 %2279 }
 0xe8d   : > { %v2291_v46 = vmul.f32 1.442695, %v2287_v43  ;;  %v2288_v47 = vsub.f32 %v2272_v17, %v2280_v45 }
 0xe8f   : > { %4826 = vpow2.f32 %v2291_v46  ;;  %v2293_v49 = vmul.f32 1.442695, %v2288_v47 }
 0xe91   : > { %4828 = vpow2.f32 %v2293_v49 }
 0xe99   : > { %v4827_v50 = vpop.eup %4826 }
 0xe9a   : > { %v2299_v51 = vsel %vm1211_vm5, %v4827_v50, 0.0 }
 0xe9b   : > { %v4829_v53 = vpop.eup %4828  ;;  %2300 = vadd.xlane.f32.xlu0 %v2299_v51 }
 0xe9c   : > { %v2302_v55 = vsel %vm1211_vm5, %v4829_v53, 0.0 }
 0xe9d   : > { %2303 = vadd.xlane.f32.xlu1 %v2302_v55 }
 0xeae   : > { %2368 = vrot.lane.b32.xlu1 %v6123_v36, %s5440_s13 }
 0xeb2   : > { %2438 = vrot.lane.b32.xlu1 %v6116_v25, %s5441_s27 }
 0xeb5   : > { %v2283_v56 = vpop.xlane.xlu0 %2282 }
 0xeb6   : > { %v2289_v57 = vsub.f32 %v2273_v34, %v2283_v56 }
 0xeb8   : > { %v2295_v58 = vmul.f32 1.442695, %v2289_v57 }
 0xeb9   : > { %v2286_v59 = vpop.xlane.xlu0 %2285 }
 0xeba   : > { %4830 = vpow2.f32 %v2295_v58  ;;  %v2290_v60 = vsub.f32 %v2274_v40, %v2286_v59 }
 0xebc   : > { %v2297_v62 = vmul.f32 1.442695, %v2290_v60 }
 0xebe   : > { %4832 = vpow2.f32 %v2297_v62 }
 0xec4   : > { %v4831_v61 = vpop.eup %4830 }
 0xec5   : > { %v2305_v0 = vsel %vm1211_vm5, %v4831_v61, 0.0 }
 0xec6   : > { %2306 = vadd.xlane.f32.xlu0 %v2305_v0 }
 0xec8   : > { %v4833_v2 = vpop.eup %4832 }
 0xec9   : > { %v2308_v3 = vsel %vm1211_vm5, %v4833_v2, 0.0 }
 0xed6   : > { %2309 = vadd.xlane.f32.xlu1 %v2308_v3 }
 0xedc   : > { %2321 = vrot.lane.b32.xlu0 %v6118_v26, %s5440_s13 }
 0xee0   : > { %2436 = vrot.lane.b32.xlu0 %v6116_v25, %s5442_s24 }
 0xee7   : > { %2489 = vrot.lane.b32.xlu1 %v6121_v35, %s5441_s27 }
 0xeeb   : > { %2487 = vrot.lane.b32.xlu1 %v6121_v35, %s5442_s24 }
 0xf28   : > { %v2301_v7 = vpop.xlane.xlu0 %2300 }
 0xf2a   : > { %v2304_v4 = vpop.xlane.xlu1 %2303 }
 0xf2b   : > { %4834 = vrcp.f32 %v2304_v4 }
 0xf2c   : > { %4836 = vrcp.f32 %v2301_v7 }
 0xf2e   : > { %v2369_v5 = vpop.permute.xlu1 %2368 }
 0xf2f   : > { %4470 = vmatpush3.bf16.msra.mxu0 %v2369_v5 }
 0xf30   : > { %4481 = vmatprep.subr.bf16.mxu0 %v5430_v12 }
 0xf32   : > { %v2439_v22 = vpop.permute.xlu1 %2438 }
 0xf33   : > { %v2444_v23 = vsel %vm1105_vm3, %v2439_v22, 0 }
 0xf35   : > { %v4835_v9 = vpop.eup %4834 }
 0xf36   : > { %v4837_v15 = vpop.eup %4836  ;;  %v2316_v16 = vmul.f32 %v4835_v9, %v4829_v53 }
 0xf37   : > { %v2315_v17 = vmul.f32 %v4837_v15, %v4827_v50 }
 0xf39   : > { %v2319_v20 = vpack.c.bf16 %v2316_v16, %v2315_v17 }
 0xf53   : > { %v2307_v13 = vpop.xlane.xlu0 %2306 }
 0xf54   : > { %4838 = vrcp.f32 %v2307_v13 }
 0xf57   : > { %v2322_v18 = vpop.permute.xlu0 %2321 }
 0xf58   : > { %4464 = vmatpush3.bf16.msra.mxu1 %v2322_v18 }
 0xf59   : > { %4475 = vmatprep.subr.bf16.mxu1 %v5430_v12 }
 0xf5b   : > { %4466 = vmatmul.mubr.msk.bf16.vlgmr.msra.gmra.mrb[36].mxu1 %vm1211_vm5, %v2319_v20  ;;  %v2437_v29 = vpop.permute.xlu0 %2436 }
 0xf5c   : > { %4477 = vmatprep.mubr.msk.bf16.mxu1 %vm5431_vm2, %v5430_v12 }
 0xf5e   : > { %v4839_v30 = vpop.eup %4838 }
 0xf5f   : > { %v2317_v32 = vmul.f32 %v4839_v30, %v4831_v61 }
 0xf61   : > { %4476 = vmatpush3.bf16.xpose.msra.mxu1 %v2444_v23 }
 0xf62   : > { %4487 = vmatprep.subr.bf16.mxu1 %v5430_v12 }
 0xf63   : > { %v2310_v27 = vpop.xlane.xlu1 %2309 }
 0xf64   : > { %4840 = vrcp.f32 %v2310_v27 }
 0xf67   : > { %v2490_v39 = vpop.permute.xlu1 %2489 }
 0xf68   : > { %4478 = vmatmul.mubr.msk.bf16.vlgmr.msra.gmra.mrb[40].mxu1 %vm1105_vm3, %v2437_v29  ;;  %v2495_v41 = vsel %vm1105_vm3, %v2490_v39, 0 }
 0xf69   : > { %4489 = vmatprep.mubr.msk.bf16.mxu1 %vm5431_vm2, %v5430_v12 }
 0xf6b   : > { %v2488_v42 = vpop.permute.xlu1 %2487 }
 0xf6e   : > { %v4841_v31 = vpop.eup %4840 }
 0xf6f   : > { %v2318_v34 = vmul.f32 %v4841_v31, %v4833_v2 }
 0xf71   : > { %v2320_v40 = vpack.c.bf16 %v2318_v34, %v2317_v32 }
 0xf73   : > { %4472 = vmatmul.mubr.msk.bf16.vlgmr.msra.gmra.mrb[44].mxu0 %vm1211_vm5, %v2320_v40 }
 0xf74   : > { %4482 = vmatpush3.bf16.xpose.msra.mxu0 %v2495_v41  ;;  %4483 = vmatprep.mubr.msk.bf16.mxu0 %vm5431_vm2, %v5430_v12 }
 0xf75   : > { %4493 = vmatprep.subr.bf16.mxu0 %v5430_v12 }
 0xf7b   : > { %4484 = vmatmul.mubr.msk.bf16.vlgmr.msra.gmra.mrb[48].mxu0 %vm1105_vm3, %v2488_v42 }
 0xf7c   : > { %4495 = vmatprep.mubr.msk.bf16.mxu0 %vm5431_vm2, %v5430_v12 }
0x102e   : > { %v6404_v43 = vpop.f32.mrb[36].mxu1 }
0x102f   : > { %v4467_v45 = vpop.f32.mrb[37].mxu1 }
0x1030   : > { %v6406_v46 = vpop.f32.mrb[38].mxu1 }
0x1031   : > { %v4468_v47 = vpop.f32.mrb[39].mxu1 }
0x103b   : > { %v2480_v49 = vpop.f32.mrb[40].mxu1 }
0x103c   : > { %v2538_v50 = vmul.f32 0.35355338, %v2480_v49  ;;  %v4479_v51 = vpop.f32.mrb[41].mxu1 }
0x103d   : > { %v2483_v53 = vpop.f32.mrb[42].mxu1 }
0x103e   : > { %v2539_v55 = vmul.f32 0.35355338, %v2483_v53  ;;  %v4480_v56 = vpop.f32.mrb[43].mxu1  ;;  %v2542_v57 = vsel %vm6144_vm4, %v2538_v50, -inf }
0x103f   : > { %v2546_v58 = vsel %vm1211_vm5, %v2542_v57, -inf }
0x1040   : > { %2547 = vmax.xlane.f32.xlu0 %v2546_v58  ;;  %v2543_v59 = vsel %vm6148_vm6, %v2539_v55, -inf }
0x1041   : > { %v2549_v60 = vsel %vm1211_vm5, %v2543_v59, -inf }
0x1042   : > { %2550 = vmax.xlane.f32.xlu1 %v2549_v60 }
0x1046   : > { %v6414_v61 = vpop.f32.mrb[44].mxu0 }
0x1047   : > { %v4473_v62 = vpop.f32.mrb[45].mxu0 }
0x1048   : > { %v6416_v0 = vpop.f32.mrb[46].mxu0 }
0x1049   : > { %v4474_v2 = vpop.f32.mrb[47].mxu0 }
0x104e   : > { %v2531_v3 = vpop.f32.mrb[48].mxu0 }
0x104f   : > { %v2540_v4 = vmul.f32 0.35355338, %v2531_v3  ;;  %v4485_v5 = vpop.f32.mrb[49].mxu0 }
0x1050   : > { %v2534_v7 = vpop.f32.mrb[50].mxu0 }
0x1051   : > { %v2541_v9 = vmul.f32 0.35355338, %v2534_v7  ;;  %v4486_v13 = vpop.f32.mrb[51].mxu0  ;;  %v2544_v15 = vsel %vm6144_vm4, %v2540_v4, -inf }
0x1052   : > { %v2552_v16 = vsel %vm1211_vm5, %v2544_v15, -inf }
0x1053   : > { %2553 = vmax.xlane.f32.xlu0 %v2552_v16  ;;  %v2545_v17 = vsel %vm6148_vm6, %v2541_v9, -inf }
0x1054   : > { %v2555_v18 = vsel %vm1211_vm5, %v2545_v17, -inf }
0x1057   : > { %2556 = vmax.xlane.f32.xlu0 %v2555_v18 }
0x10cd   : > { %v2548_v20 = vpop.xlane.xlu0 %2547 }
0x10ce   : > { %v2558_v22 = vsub.f32 %v2542_v57, %v2548_v20 }
0x10cf   : > { %v2551_v23 = vpop.xlane.xlu1 %2550 }
0x10d0   : > { %v2562_v27 = vmul.f32 1.442695, %v2558_v22  ;;  %v2559_v29 = vsub.f32 %v2543_v59, %v2551_v23 }
0x10d2   : > { %4842 = vpow2.f32 %v2562_v27  ;;  %v2564_v30 = vmul.f32 1.442695, %v2559_v29 }
0x10d4   : > { %4844 = vpow2.f32 %v2564_v30 }
0x10dc   : > { %v4843_v31 = vpop.eup %4842 }
0x10dd   : > { %v2570_v32 = vsel %vm1211_vm5, %v4843_v31, 0.0 }
0x10de   : > { %v4845_v34 = vpop.eup %4844  ;;  %2571 = vadd.xlane.f32.xlu0 %v2570_v32 }
0x10df   : > { %v2573_v39 = vsel %vm1211_vm5, %v4845_v34, 0.0 }
0x10e0   : > { %2574 = vadd.xlane.f32.xlu1 %v2573_v39  ;;  %v2554_v40 = vpop.xlane.xlu0 %2553 }
0x10e1   : > { %v2560_v41 = vsub.f32 %v2544_v15, %v2554_v40 }
0x10e3   : > { %v2566_v42 = vmul.f32 1.442695, %v2560_v41 }
0x10e4   : > { %v2557_v49 = vpop.xlane.xlu0 %2556 }
0x10e5   : > { %4846 = vpow2.f32 %v2566_v42  ;;  %v2561_v50 = vsub.f32 %v2545_v17, %v2557_v49 }
0x10e7   : > { %v2568_v51 = vmul.f32 1.442695, %v2561_v50 }
0x10e9   : > { %4848 = vpow2.f32 %v2568_v51 }
0x10ef   : > { %v4847_v45 = vpop.eup %4846 }
0x10f0   : > { %v2576_v47 = vsel %vm1211_vm5, %v4847_v45, 0.0 }
0x10f1   : > { %2639 = vrot.lane.b32.xlu1 %v6123_v36, %s5442_s24  ;;  %2577 = vadd.xlane.f32.xlu0 %v2576_v47 }
0x10f3   : > { %v4849_v53 = vpop.eup %4848 }
0x10f4   : > { %v2579_v55 = vsel %vm1211_vm5, %v4849_v53, 0.0 }
0x10f5   : > { %2709 = vrot.lane.b32.xlu1 %v6116_v25, %s5443_s20 }
0x1107   : > { %2592 = vrot.lane.b32.xlu0 %v6118_v26, %s5442_s24 }
0x110b   : > { %2707 = vrot.lane.b32.xlu0 %v6116_v25, %s5444_s1 }
0x1119   : > { %2580 = vadd.xlane.f32.xlu1 %v2579_v55 }
0x112a   : > { %2760 = vrot.lane.b32.xlu1 %v6121_v35, %s5443_s20 }
0x112e   : > { %2758 = vrot.lane.b32.xlu1 %v6121_v35, %s5444_s1 }
0x116b   : > { %v2572_v58 = vpop.xlane.xlu0 %2571 }
0x116d   : > { %v2575_v56 = vpop.xlane.xlu1 %2574 }
0x116e   : > { %4850 = vrcp.f32 %v2575_v56 }
0x116f   : > { %4852 = vrcp.f32 %v2572_v58 }
0x1171   : > { %v2640_v57 = vpop.permute.xlu1 %2639 }
0x1172   : > { %4494 = vmatpush3.bf16.msra.mxu0 %v2640_v57 }
0x1173   : > { %4505 = vmatprep.subr.bf16.mxu0 %v5430_v12 }
0x1175   : > { %v2710_v7 = vpop.permute.xlu1 %2709 }
0x1176   : > { %v2715_v9 = vsel %vm1105_vm3, %v2710_v7, 0 }
0x1178   : > { %v4851_v59 = vpop.eup %4850 }
0x1179   : > { %v4853_v62 = vpop.eup %4852  ;;  %v2587_v2 = vmul.f32 %v4851_v59, %v4845_v34 }
0x117a   : > { %v2586_v3 = vmul.f32 %v4853_v62, %v4843_v31 }
0x117c   : > { %v2590_v5 = vpack.c.bf16 %v2587_v2, %v2586_v3 }
0x117e   : > { %v2578_v60 = vpop.xlane.xlu0 %2577 }
0x117f   : > { %4854 = vrcp.f32 %v2578_v60 }
0x1182   : > { %v2593_v4 = vpop.permute.xlu0 %2592 }
0x1183   : > { %4488 = vmatpush3.bf16.msra.mxu1 %v2593_v4 }
0x1184   : > { %4499 = vmatprep.subr.bf16.mxu1 %v5430_v12 }
0x1186   : > { %4490 = vmatmul.mubr.msk.bf16.vlgmr.msra.gmra.mrb[44].mxu1 %vm1211_vm5, %v2590_v5  ;;  %v2708_v13 = vpop.permute.xlu0 %2707 }
0x1187   : > { %4501 = vmatprep.mubr.msk.bf16.mxu1 %vm5431_vm2, %v5430_v12 }
0x1189   : > { %v4855_v16 = vpop.eup %4854 }
0x118a   : > { %v2588_v18 = vmul.f32 %v4855_v16, %v4847_v45 }
0x118c   : > { %4500 = vmatpush3.bf16.xpose.msra.mxu1 %v2715_v9 }
0x118d   : > { %4511 = vmatprep.subr.bf16.mxu1 %v5430_v12 }
0x1193   : > { %4502 = vmatmul.mubr.msk.bf16.vlgmr.msra.gmra.mrb[48].mxu1 %vm1105_vm3, %v2708_v13 }
0x1194   : > { %4513 = vmatprep.mubr.msk.bf16.mxu1 %vm5431_vm2, %v5430_v12 }
0x11a6   : > { %v2581_v15 = vpop.xlane.xlu1 %2580 }
0x11a7   : > { %4856 = vrcp.f32 %v2581_v15 }
0x11aa   : > { %v2761_v22 = vpop.permute.xlu1 %2760 }
0x11ab   : > { %v2766_v27 = vsel %vm1105_vm3, %v2761_v22, 0 }
0x11ae   : > { %v2759_v29 = vpop.permute.xlu1 %2758 }
0x11b1   : > { %v4857_v17 = vpop.eup %4856 }
0x11b2   : > { %v2589_v20 = vmul.f32 %v4857_v17, %v4849_v53 }
0x11b4   : > { %v2591_v23 = vpack.c.bf16 %v2589_v20, %v2588_v18 }
0x11b6   : > { %4496 = vmatmul.mubr.msk.bf16.vlgmr.msra.gmra.mrb[52].mxu0 %vm1211_vm5, %v2591_v23 }
0x11b7   : > { %4506 = vmatpush3.bf16.xpose.msra.mxu0 %v2766_v27  ;;  %4507 = vmatprep.mubr.msk.bf16.mxu0 %vm5431_vm2, %v5430_v12 }
0x11b8   : > { %4517 = vmatprep.subr.bf16.mxu0 %v5430_v12 }
0x11be   : > { %4508 = vmatmul.mubr.msk.bf16.vlgmr.msra.gmra.mrb[56].mxu0 %vm1105_vm3, %v2759_v29 }
0x11bf   : > { %4519 = vmatprep.mubr.msk.bf16.mxu0 %vm5431_vm2, %v5430_v12 }
0x1259   : > { %v6458_v30 = vpop.f32.mrb[44].mxu1 }
0x125a   : > { %v4491_v31 = vpop.f32.mrb[45].mxu1 }
0x125b   : > { %v6460_v32 = vpop.f32.mrb[46].mxu1 }
0x125c   : > { %v4492_v34 = vpop.f32.mrb[47].mxu1 }
0x1266   : > { %v2751_v39 = vpop.f32.mrb[48].mxu1 }
0x1267   : > { %v2809_v40 = vmul.f32 0.35355338, %v2751_v39  ;;  %v4503_v41 = vpop.f32.mrb[49].mxu1 }
0x1268   : > { %v2754_v42 = vpop.f32.mrb[50].mxu1 }
0x1269   : > { %v2810_v45 = vmul.f32 0.35355338, %v2754_v42  ;;  %v4504_v47 = vpop.f32.mrb[51].mxu1  ;;  %v2813_v49 = vsel %vm6144_vm4, %v2809_v40, -inf }
0x126a   : > { %v2817_v50 = vsel %vm1211_vm5, %v2813_v49, -inf }
0x126b   : > { %2818 = vmax.xlane.f32.xlu0 %v2817_v50  ;;  %v2814_v51 = vsel %vm6148_vm6, %v2810_v45, -inf }
0x126c   : > { %v2820_v53 = vsel %vm1211_vm5, %v2814_v51, -inf }
0x126d   : > { %2821 = vmax.xlane.f32.xlu1 %v2820_v53 }
0x1289   : > { %v6468_v55 = vpop.f32.mrb[52].mxu0 }
0x128a   : > { %v4497_v56 = vpop.f32.mrb[53].mxu0 }
0x128b   : > { %v6470_v57 = vpop.f32.mrb[54].mxu0 }
0x128c   : > { %v4498_v58 = vpop.f32.mrb[55].mxu0 }
0x1291   : > { %v2802_v59 = vpop.f32.mrb[56].mxu0 }
0x1292   : > { %v2811_v60 = vmul.f32 0.35355338, %v2802_v59  ;;  %v4509_v62 = vpop.f32.mrb[57].mxu0 }
0x1293   : > { %v2805_v2 = vpop.f32.mrb[58].mxu0 }
0x1294   : > { %v2812_v3 = vmul.f32 0.35355338, %v2805_v2  ;;  %v4510_v4 = vpop.f32.mrb[59].mxu0  ;;  %v2815_v5 = vsel %vm6144_vm4, %v2811_v60, -inf }
0x1295   : > { %v2823_v7 = vsel %vm1211_vm5, %v2815_v5, -inf }
0x1296   : > { %2824 = vmax.xlane.f32.xlu0 %v2823_v7  ;;  %v2816_v9 = vsel %vm6148_vm6, %v2812_v3, -inf }
0x1297   : > { %v2826_v13 = vsel %vm1211_vm5, %v2816_v9, -inf }
0x129a   : > { %2827 = vmax.xlane.f32.xlu0 %v2826_v13 }
0x12f8   : > { %v2819_v15 = vpop.xlane.xlu0 %2818 }
0x12f9   : > { %v2829_v16 = vsub.f32 %v2813_v49, %v2819_v15 }
0x12fa   : > { %v2822_v17 = vpop.xlane.xlu1 %2821 }
0x12fb   : > { %v2833_v18 = vmul.f32 1.442695, %v2829_v16  ;;  %v2830_v20 = vsub.f32 %v2814_v51, %v2822_v17 }
0x12fd   : > { %4858 = vpow2.f32 %v2833_v18  ;;  %v2835_v22 = vmul.f32 1.442695, %v2830_v20 }
0x12ff   : > { %4860 = vpow2.f32 %v2835_v22 }
0x1307   : > { %v4859_v23 = vpop.eup %4858 }
0x1308   : > { %v2841_v27 = vsel %vm1211_vm5, %v4859_v23, 0.0 }
0x1309   : > { %v4861_v29 = vpop.eup %4860  ;;  %2842 = vadd.xlane.f32.xlu0 %v2841_v27 }
0x130a   : > { %v2844_v31 = vsel %vm1211_vm5, %v4861_v29, 0.0 }
0x130b   : > { %2845 = vadd.xlane.f32.xlu1 %v2844_v31 }
0x131c   : > { %2910 = vrot.lane.b32.xlu1 %v6123_v36, %s5444_s1 }
0x1320   : > { %2980 = vrot.lane.b32.xlu1 %v6116_v25, %s5445_s10 }
0x1323   : > { %v2825_v34 = vpop.xlane.xlu0 %2824 }
0x1324   : > { %v2831_v39 = vsub.f32 %v2815_v5, %v2825_v34 }
0x1326   : > { %v2837_v40 = vmul.f32 1.442695, %v2831_v39 }
0x1327   : > { %v2828_v41 = vpop.xlane.xlu0 %2827 }
0x1328   : > { %4862 = vpow2.f32 %v2837_v40  ;;  %v2832_v42 = vsub.f32 %v2816_v9, %v2828_v41 }
0x132a   : > { %v2839_v47 = vmul.f32 1.442695, %v2832_v42 }
0x132c   : > { %4864 = vpow2.f32 %v2839_v47 }
0x1332   : > { %v4863_v45 = vpop.eup %4862 }
0x1333   : > { %v2847_v49 = vsel %vm1211_vm5, %v4863_v45, 0.0 }
0x1334   : > { %2848 = vadd.xlane.f32.xlu0 %v2847_v49 }
0x1336   : > { %v4865_v50 = vpop.eup %4864 }
0x1337   : > { %v2850_v51 = vsel %vm1211_vm5, %v4865_v50, 0.0 }
0x1344   : > { %2851 = vadd.xlane.f32.xlu1 %v2850_v51 }
0x134a   : > { %2863 = vrot.lane.b32.xlu0 %v6118_v26, %s5444_s1 }
0x134e   : > { %2978 = vrot.lane.b32.xlu0 %v6116_v25, %s5446_s23 }
0x1355   : > { %3031 = vrot.lane.b32.xlu1 %v6121_v35, %s5445_s10 }
0x1359   : > { %3029 = vrot.lane.b32.xlu1 %v6121_v35, %s5446_s23 }
0x1396   : > { %v2843_v58 = vpop.xlane.xlu0 %2842 }
0x1398   : > { %v2846_v53 = vpop.xlane.xlu1 %2845 }
0x1399   : > { %4866 = vrcp.f32 %v2846_v53 }
0x139a   : > { %4868 = vrcp.f32 %v2843_v58 }
0x139c   : > { %v2911_v56 = vpop.permute.xlu1 %2910 }
0x139d   : > { %4518 = vmatpush3.bf16.msra.mxu0 %v2911_v56 }
0x139e   : > { %4529 = vmatprep.subr.bf16.mxu0 %v5430_v12 }
0x13a0   : > { %v2981_v35 = vpop.permute.xlu1 %2980 }
0x13a1   : > { %v2986_v5 = vsel %vm1105_vm3, %v2981_v35, 0 }
0x13a3   : > { %v4867_v59 = vpop.eup %4866 }
0x13a4   : > { %v4869_v62 = vpop.eup %4868  ;;  %v2858_v2 = vmul.f32 %v4867_v59, %v4861_v29 }
0x13a5   : > { %v2857_v3 = vmul.f32 %v4869_v62, %v4859_v23 }
0x13a7   : > { %v2861_v4 = vpack.c.bf16 %v2858_v2, %v2857_v3 }
0x13c1   : > { %v2849_v60 = vpop.xlane.xlu0 %2848 }
0x13c2   : > { %4870 = vrcp.f32 %v2849_v60 }
0x13c5   : > { %v2864_v25 = vpop.permute.xlu0 %2863 }
0x13c6   : > { %4512 = vmatpush3.bf16.msra.mxu1 %v2864_v25 }
0x13c7   : > { %4523 = vmatprep.subr.bf16.mxu1 %v5430_v12 }
0x13c9   : > { %4514 = vmatmul.mubr.msk.bf16.vlgmr.msra.gmra.mrb[52].mxu1 %vm1211_vm5, %v2861_v4  ;;  %v2979_v9 = vpop.permute.xlu0 %2978 }
0x13ca   : > { %4525 = vmatprep.mubr.msk.bf16.mxu1 %vm5431_vm2, %v5430_v12 }
0x13cc   : > { %v4871_v13 = vpop.eup %4870 }
0x13cd   : > { %v2859_v16 = vmul.f32 %v4871_v13, %v4863_v45 }
0x13cf   : > { %4524 = vmatpush3.bf16.xpose.msra.mxu1 %v2986_v5 }
0x13d0   : > { %4535 = vmatprep.subr.bf16.mxu1 %v5430_v12 }
0x13d1   : > { %v2852_v7 = vpop.xlane.xlu1 %2851 }
0x13d2   : > { %4872 = vrcp.f32 %v2852_v7 }
0x13d5   : > { %v3032_v18 = vpop.permute.xlu1 %3031 }
0x13d6   : > { %4526 = vmatmul.mubr.msk.bf16.vlgmr.msra.gmra.mrb[56].mxu1 %vm1105_vm3, %v2979_v9  ;;  %v3037_v22 = vsel %vm1105_vm3, %v3032_v18, 0 }
0x13d7   : > { %4537 = vmatprep.mubr.msk.bf16.mxu1 %vm5431_vm2, %v5430_v12 }
0x13d9   : > { %v3030_v23 = vpop.permute.xlu1 %3029 }
0x13dc   : > { %v4873_v15 = vpop.eup %4872 }
0x13dd   : > { %v2860_v17 = vmul.f32 %v4873_v15, %v4865_v50 }
0x13df   : > { %v2862_v20 = vpack.c.bf16 %v2860_v17, %v2859_v16 }
0x13e1   : > { %4520 = vmatmul.mubr.msk.bf16.vlgmr.msra.gmra.mrb[60].mxu0 %vm1211_vm5, %v2862_v20 }
0x13e2   : > { %4530 = vmatpush3.bf16.xpose.msra.mxu0 %v3037_v22  ;;  %4531 = vmatprep.mubr.msk.bf16.mxu0 %vm5431_vm2, %v5430_v12 }
0x13e3   : > { %4541 = vmatprep.subr.bf16.mxu0 %v5430_v12 }
0x13e9   : > { %4532 = vmatmul.mubr.msk.bf16.vlgmr.msra.gmra.mrb[64].mxu0 %vm1105_vm3, %v3030_v23 }
0x13ea   : > { %4543 = vmatprep.mubr.msk.bf16.mxu0 %vm5431_vm2, %v5430_v12 }
0x149c   : > { %v6512_v27 = vpop.f32.mrb[52].mxu1 }
0x149d   : > { %v4515_v29 = vpop.f32.mrb[53].mxu1 }
0x149e   : > { %v6514_v31 = vpop.f32.mrb[54].mxu1 }
0x149f   : > { %v4516_v34 = vpop.f32.mrb[55].mxu1 }
0x14a9   : > { %v3022_v39 = vpop.f32.mrb[56].mxu1 }
0x14aa   : > { %v3080_v40 = vmul.f32 0.35355338, %v3022_v39  ;;  %v4527_v41 = vpop.f32.mrb[57].mxu1 }
0x14ab   : > { %v3025_v42 = vpop.f32.mrb[58].mxu1 }
0x14ac   : > { %v3084_v45 = vsel %vm6144_vm4, %v3080_v40, -inf  ;;  %v3081_v47 = vmul.f32 0.35355338, %v3025_v42  ;;  %v4528_v49 = vpop.f32.mrb[59].mxu1 }
0x14ad   : > { %v3088_v50 = vsel %vm1211_vm5, %v3084_v45, -inf }
0x14ae   : > { %v3085_v12 = vsel %vm6148_vm6, %v3081_v47, -inf  ;;  %3089 = vmax.xlane.f32.xlu0 %v3088_v50 }
0x14af   : > { %v3091_v51 = vsel %vm1211_vm5, %v3085_v12, -inf }
0x14b0   : > { %3092 = vmax.xlane.f32.xlu1 %v3091_v51 }
0x14b4   : > { %v6522_v53 = vpop.f32.mrb[60].mxu0 }
0x14b5   : > { %v4521_v56 = vpop.f32.mrb[61].mxu0 }
0x14b6   : > { %v6524_v58 = vpop.f32.mrb[62].mxu0 }
0x14b7   : > { %v4522_v59 = vpop.f32.mrb[63].mxu0 }
0x14bc   : > { %v3073_v60 = vpop.f32.mrb[64].mxu0 }
0x14bd   : > { %v3082_v62 = vmul.f32 0.35355338, %v3073_v60  ;;  %v4533_v2 = vpop.f32.mrb[65].mxu0 }
0x14be   : > { %v3076_v3 = vpop.f32.mrb[66].mxu0 }
0x14bf   : > { %v3086_v25 = vsel %vm6144_vm4, %v3082_v62, -inf  ;;  %v3083_v4 = vmul.f32 0.35355338, %v3076_v3  ;;  %v4534_v35 = vpop.f32.mrb[67].mxu0 }
0x14c0   : > { %v3094_v5 = vsel %vm1211_vm5, %v3086_v25, -inf }
0x14c1   : > { %v3087_v7 = vsel %vm6148_vm6, %v3083_v4, -inf  ;;  %3095 = vmax.xlane.f32.xlu0 %v3094_v5 }
0x14c2   : > { %v3097_v9 = vsel %vm1211_vm5, %v3087_v7, -inf }
0x14c5   : > { %3098 = vmax.xlane.f32.xlu0 %v3097_v9 }
0x153b   : > { %v3090_v13 = vpop.xlane.xlu0 %3089 }
0x153c   : > { %v3100_v15 = vsub.f32 %v3084_v45, %v3090_v13  ;;  %v4722_v13 = vld [vmem:[%s6039_s28] sm:$0xff]  }
0x153d   : > { %v3093_v16 = vpop.xlane.xlu1 %3092 }
0x153e   : > { %v3104_v17 = vmul.f32 1.442695, %v3100_v15  ;;  %v3101_v18 = vsub.f32 %v3085_v12, %v3093_v16  ;;  %v4723_v15 = vld [vmem:[%s6039_s28 + $0x8] sm:$0xff]  }
0x1540   : > { %4874 = vpow2.f32 %v3104_v17  ;;  %v3106_v20 = vmul.f32 1.442695, %v3101_v18 }
0x1542   : > { %4876 = vpow2.f32 %v3106_v20  ;;  %v4724_v20 = vld [vmem:[%s6039_s28 + $0x10] sm:$0xff]  }
0x154a   : > { %v4875_v44 = vpop.eup %4874 }
0x154b   : > { %v3112_v22 = vsel %vm1211_vm5, %v4875_v44, 0.0 }
0x154c   : > { %v4877_v23 = vpop.eup %4876  ;;  %3113 = vadd.xlane.f32.xlu0 %v3112_v22  ;;  %v4725_v22 = vld [vmem:[%s6039_s28 + $0x18] sm:$0xff]   ;;  %s6882_s28 = scalar_lea.vmem [#allocation18], %s6017_s16  ;;  %s6883_s16 = sld [smem:[#allocation35_spill]] }
0x154d   : > { %v3115_v48 = vsel %vm1211_vm5, %v4877_v23, 0.0 }
0x154e   : > { %3116 = vadd.xlane.f32.xlu1 %v3115_v48  ;;  %v3096_v29 = vpop.xlane.xlu0 %3095 }
0x154f   : > { %v3102_v34 = vsub.f32 %v3086_v25, %v3096_v29 }
0x1551   : > { %v3108_v39 = vmul.f32 1.442695, %v3102_v34 }
0x1552   : > { %v3099_v40 = vpop.xlane.xlu0 %3098  ;;  %p4246_p5 = scmp.ne.s32.totalorder %s6883_s16, 1 }
0x1553   : > { %4878 = vpow2.f32 %v3108_v39  ;;  %v3103_v41 = vsub.f32 %v3087_v7, %v3099_v40 }
0x1555   : > { %v3110_v42 = vmul.f32 1.442695, %v3103_v41 }
0x1557   : > { %4880 = vpow2.f32 %v3110_v42 }
0x155d   : > { %v4879_v45 = vpop.eup %4878 }
0x155e   : > { %v3118_v47 = vsel %vm1211_vm5, %v4879_v45, 0.0 }
0x155f   : > { %3119 = vadd.xlane.f32.xlu0 %v3118_v47 }
0x1561   : > { %v4881_v49 = vpop.eup %4880 }
0x1562   : > { %v3121_v50 = vsel %vm1211_vm5, %v4881_v49, 0.0 }
0x1563   : > { %3122 = vadd.xlane.f32.xlu1 %v3121_v50 }
0x1574   : > { %3181 = vrot.lane.b32.xlu1 %v6123_v36, %s5446_s23 }
0x1575   : > { %3134 = vrot.lane.b32.xlu0 %v6118_v26, %s5446_s23 }
0x1578   : > { %1606 = vrot.lane.b32.xlu1 %v6242_v6, %s5445_s10 }
0x1579   : > { %1610 = vrot.lane.b32.xlu0 %v6252_v24, %s5445_s10 }
0x157c   : > { %1608 = vrot.lane.b32.xlu1 %v6244_v8, %s5445_s10 }
0x157d   : > { %1877 = vrot.lane.b32.xlu0 %v6296_v33, %s5443_s20 }
0x1580   : > { %1612 = vrot.lane.b32.xlu1 %v6254_v28, %s5445_s10 }
0x1581   : > { %1881 = vrot.lane.b32.xlu0 %v6306_v52, %s5443_s20 }
0x1584   : > { %1879 = vrot.lane.b32.xlu1 %v6298_v38, %s5443_s20 }
0x1585   : > { %2148 = vrot.lane.b32.xlu0 %v6350_v63, %s5441_s27 }
0x1588   : > { %1883 = vrot.lane.b32.xlu1 %v6308_v54, %s5443_s20 }
0x1589   : > { %2152 = vrot.lane.b32.xlu0 %v6360_v19, %s5441_s27 }
0x158c   : > { %2150 = vrot.lane.b32.xlu1 %v6352_v1, %s5441_s27 }
0x158d   : > { %2419 = vrot.lane.b32.xlu0 %v6404_v43, %s5439_s25 }
0x1590   : > { %2154 = vrot.lane.b32.xlu1 %v6362_v21, %s5441_s27 }
0x1591   : > { %2423 = vrot.lane.b32.xlu0 %v6414_v61, %s5439_s25 }
0x1594   : > { %2421 = vrot.lane.b32.xlu1 %v6406_v46, %s5439_s25 }
0x1595   : > { %2690 = vrot.lane.b32.xlu0 %v6458_v30, %s5437_s7 }
0x1598   : > { %2425 = vrot.lane.b32.xlu1 %v6416_v0, %s5439_s25 }
0x1599   : > { %2694 = vrot.lane.b32.xlu0 %v6468_v55, %s5437_s7 }
0x159c   : > { %2692 = vrot.lane.b32.xlu1 %v6460_v32, %s5437_s7 }
0x159d   : > { %2961 = vrot.lane.b32.xlu0 %v6512_v27, %s5435_s12 }
0x15a0   : > { %2696 = vrot.lane.b32.xlu1 %v6470_v57, %s5437_s7 }
0x15a1   : > { %2965 = vrot.lane.b32.xlu0 %v6522_v53, %s5435_s12 }
0x15a4   : > { %2963 = vrot.lane.b32.xlu1 %v6514_v31, %s5435_s12 }
0x15a8   : > { %2967 = vrot.lane.b32.xlu1 %v6524_v58, %s5435_s12 }
0x15d9   : > { %v3114_v36 = vpop.xlane.xlu0 %3113 }
0x15db   : > { %v3117_v26 = vpop.xlane.xlu1 %3116 }
0x15dc   : > { %4882 = vrcp.f32 %v3117_v26 }
0x15dd   : > { %4884 = vrcp.f32 %v3114_v36 }
0x15e6   : > { %v4883_v6 = vpop.eup %4882 }
0x15e7   : > { %v4885_v24 = vpop.eup %4884  ;;  %v3129_v28 = vmul.f32 %v4883_v6, %v4877_v23  ;;  %v4210_v6 = vld [vmem:[%s732_s18] ss:$0 sm:$0xff] }
0x15e8   : > { %v3128_v33 = vmul.f32 %v4885_v24, %v4875_v44 }
0x15ea   : > { %v3132_v54 = vpack.c.bf16 %v3129_v28, %v3128_v33 }
0x15ec   : > { %v3120_v8 = vpop.xlane.xlu0 %3119 }
0x15ed   : > { %4886 = vrcp.f32 %v3120_v8 }
0x15f0   : > { %v3123_v38 = vpop.xlane.xlu1 %3122  ;;  %v3135_v52 = vpop.permute.xlu0 %3134 }
0x15f1   : > { %4888 = vrcp.f32 %v3123_v38  ;;  %4536 = vmatpush3.bf16.msra.mxu1 %v3135_v52 }
0x15f2   : > { %4547 = vmatprep.subr.bf16.mxu1 %v4722_v13 }
0x15f4   : > { %v3182_v63 = vpop.permute.xlu1 %3181  ;;  %4538 = vmatmul.mubr.msk.bf16.vlgmr.msra.gmra.mrb[60].mxu1 %vm1211_vm5, %v3132_v54  ;;  %v1611_v1 = vpop.permute.xlu0 %1610  ;;  %v4914_v54 = vld [vmem:[#allocation2] sm:$0xff] }
0x15f5   : > { %1621 = vst.msk [vmem:[#allocation3 + $0x10] sm:$0xff] %vm1618_vm7, %v1611_v1  ;;  %4542 = vmatpush3.bf16.msra.mxu0 %v3182_v63  ;;  %4548 = vmatpush3.bf16.msra.mxu1 %v4722_v13 }
0x15f6   : > { %4549 = vmatprep.subr.bf16.mxu1 %v4723_v15 }
0x15f7   : > { %v4887_v43 = vpop.eup %4886 }
0x15f8   : > { %v1607_v19 = vpop.permute.xlu1 %1606  ;;  %v1878_v21 = vpop.permute.xlu0 %1877  ;;  %v3130_v61 = vmul.f32 %v4887_v43, %v4879_v45 }
0x15f9   : > { %1619 = vst.msk [vmem:[#allocation3] sm:$0xff] %vm1618_vm7, %v1607_v19  ;;  %4550 = vmatpush3.bf16.msra.mxu1 %v4723_v15  ;;  %v4915_v19 = vld [vmem:[#allocation2 + $0x10] sm:$0xff] }
0x15fa   : > { %1890 = vst.msk [vmem:[#allocation3] sm:$0xff] %vm1889_vm8, %v1878_v21  ;;  %4551 = vmatprep.subr.bf16.mxu1 %v4724_v20 }
0x15fb   : > { %v4889_v46 = vpop.eup %4888 }
0x15fc   : > { %v3131_v0 = vmul.f32 %v4889_v46, %v4881_v49  ;;  %v1609_v30 = vpop.permute.xlu1 %1608  ;;  %v1882_v32 = vpop.permute.xlu0 %1881  ;;  %v4916_v46 = vld [vmem:[#allocation2 + $0x8] sm:$0xff] }
0x15fd   : > { %1620 = vst.msk [vmem:[#allocation3 + $0x8] sm:$0xff] %vm1618_vm7, %v1609_v30  ;;  %4552 = vmatpush3.bf16.msra.mxu1 %v4724_v20  ;;  %v4731_v20 = vld [vmem:[%s6054_s17 + $0x14] ss:$8 sps:$4 sm:$0xff]  }
0x15fe   : > { %1892 = vst.msk [vmem:[#allocation3 + $0x10] sm:$0xff] %vm1889_vm8, %v1882_v32  ;;  %v3133_v55 = vpack.c.bf16 %v3131_v0, %v3130_v61  ;;  %4553 = vmatprep.subr.bf16.mxu1 %v4725_v22  ;;  %v4917_v32 = vld [vmem:[#allocation2 + $0x18] sm:$0xff] }
0x1600   : > { %v1613_v57 = vpop.permute.xlu1 %1612  ;;  %4544 = vmatmul.mubr.msk.bf16.vlgmr.msra.gmra.mrb[68].mxu0 %vm1211_vm5, %v3133_v55  ;;  %v2149_v27 = vpop.permute.xlu0 %2148 }
0x1601   : > { %1622 = vst.msk [vmem:[#allocation3 + $0x18] sm:$0xff] %vm1618_vm7, %v1613_v57  ;;  %3527 = vmatprep.mubr.bf16.mxu0 %v5429_v37  ;;  %4554 = vmatpush3.bf16.msra.mxu1 %v4725_v22  ;;  %v4734_v22 = vld [vmem:[%s6054_s17 + $0x24] ss:$8 sps:$4 sm:$0xff]  }
0x1602   : > { %2161 = vst.msk [vmem:[#allocation3] sm:$0xff] %vm2160_vm9, %v2149_v27 }
0x1604   : > { %v1880_v31 = vpop.permute.xlu1 %1879  ;;  %v2153_v12 = vpop.permute.xlu0 %2152 }
0x1605   : > { %1891 = vst.msk [vmem:[#allocation3 + $0x8] sm:$0xff] %vm1889_vm8, %v1880_v31 }
0x1606   : > { %2163 = vst.msk [vmem:[#allocation3 + $0x10] sm:$0xff] %vm2160_vm9, %v2153_v12 }
0x1608   : > { %v1884_v51 = vpop.permute.xlu1 %1883  ;;  %v2420_v53 = vpop.permute.xlu0 %2419 }
0x1609   : > { %1893 = vst.msk [vmem:[#allocation3 + $0x18] sm:$0xff] %vm1889_vm8, %v1884_v51 }
0x160a   : > { %2432 = vst.msk [vmem:[#allocation3] sm:$0xff] %vm2431_vm10, %v2420_v53 }
0x160c   : > { %v2151_v56 = vpop.permute.xlu1 %2150  ;;  %v2424_v58 = vpop.permute.xlu0 %2423 }
0x160d   : > { %2162 = vst.msk [vmem:[#allocation3 + $0x8] sm:$0xff] %vm2160_vm9, %v2151_v56 }
0x160e   : > { %2434 = vst.msk [vmem:[#allocation3 + $0x10] sm:$0xff] %vm2431_vm10, %v2424_v58 }
0x1610   : > { %v2155_v59 = vpop.permute.xlu1 %2154  ;;  %v2691_v60 = vpop.permute.xlu0 %2690 }
0x1611   : > { %2164 = vst.msk [vmem:[#allocation3 + $0x18] sm:$0xff] %vm2160_vm9, %v2155_v59 }
0x1612   : > { %2703 = vst.msk [vmem:[#allocation3] sm:$0xff] %vm2702_vm11, %v2691_v60 }
0x1614   : > { %v2422_v62 = vpop.permute.xlu1 %2421  ;;  %v2695_v2 = vpop.permute.xlu0 %2694 }
0x1615   : > { %2433 = vst.msk [vmem:[#allocation3 + $0x8] sm:$0xff] %vm2431_vm10, %v2422_v62 }
0x1616   : > { %2705 = vst.msk [vmem:[#allocation3 + $0x10] sm:$0xff] %vm2702_vm11, %v2695_v2 }
0x1618   : > { %v2426_v3 = vpop.permute.xlu1 %2425  ;;  %v2962_v25 = vpop.permute.xlu0 %2961 }
0x1619   : > { %2435 = vst.msk [vmem:[#allocation3 + $0x18] sm:$0xff] %vm2431_vm10, %v2426_v3 }
0x161a   : > { %2974 = vst.msk [vmem:[#allocation3] sm:$0xff] %vm2973_vm12, %v2962_v25 }
0x161c   : > { %v2693_v4 = vpop.permute.xlu1 %2692  ;;  %v2966_v35 = vpop.permute.xlu0 %2965 }
0x161d   : > { %2704 = vst.msk [vmem:[#allocation3 + $0x8] sm:$0xff] %vm2702_vm11, %v2693_v4 }
0x161e   : > { %2976 = vst.msk [vmem:[#allocation3 + $0x10] sm:$0xff] %vm2973_vm12, %v2966_v35 }
0x1620   : > { %v2697_v5 = vpop.permute.xlu1 %2696 }
0x1621   : > { %2706 = vst.msk [vmem:[#allocation3 + $0x18] sm:$0xff] %vm2702_vm11, %v2697_v5 }
0x1624   : > { %v2964_v7 = vpop.permute.xlu1 %2963 }
0x1625   : > { %2975 = vst.msk [vmem:[#allocation3 + $0x8] sm:$0xff] %vm2973_vm12, %v2964_v7 }
0x1628   : > { %v2968_v9 = vpop.permute.xlu1 %2967 }
0x1629   : > { %2977 = vst.msk [vmem:[#allocation3 + $0x18] sm:$0xff] %vm2973_vm12, %v2968_v9 }
0x16c7   : > { %v3174_v16 = vpop.f32.mrb[60].mxu1 }
0x16c8   : > { %3232 = vrot.lane.b32.xlu0 %v3174_v16, %s5433_s21  ;;  %v4539_v17 = vpop.f32.mrb[61].mxu1 }
0x16c9   : > { %v3177_v18 = vpop.f32.mrb[62].mxu1  ;;  %v4728_v17 = vld [vmem:[%s6054_s17 + $0x4] ss:$8 sps:$4 sm:$0xff]  }
0x16ca   : > { %3234 = vrot.lane.b32.xlu1 %v3177_v18, %s5433_s21  ;;  %v4540_v44 = vpop.f32.mrb[63].mxu1  ;;  %v4726_v18 = vld [vmem:[%s6054_s17] ss:$8 sps:$4 sm:$0xff]   ;;  %3495 = vmatprep.subr.bf16.mxu0 %v4728_v17 }
0x16cb   : > { %3496 = vmatpush1.bf16.msra.mxu0 %v4726_v18  ;;  %v4729_v44 = vld [vmem:[%s6054_s17 + $0x10] ss:$8 sps:$4 sm:$0xff]  }
0x16cc   : > { %3497 = vmatprep.subr.bf16.mxu0 %v4731_v20 }
0x16cf   : > { %3498 = vmatpush1.bf16.msra.mxu0 %v4729_v44 }
0x16d0   : > { %3499 = vmatprep.subr.bf16.mxu0 %v4734_v22 }
0x16d3   : > { %v3221_v23 = vpop.f32.mrb[68].mxu0 }
0x16d4   : > { %3236 = vrot.lane.b32.xlu0 %v3221_v23, %s5433_s21  ;;  %v4545_v48 = vpop.f32.mrb[69].mxu0  ;;  %v4732_v23 = vld [vmem:[%s6054_s17 + $0x20] ss:$8 sps:$4 sm:$0xff]  }
0x16d5   : > { %v3224_v29 = vpop.f32.mrb[70].mxu0  ;;  %3500 = vmatpush1.bf16.msra.mxu0 %v4732_v23  ;;  %v4737_v48 = vld [vmem:[%s6054_s17 + $0x34] ss:$8 sps:$4 sm:$0xff]  }
0x16d6   : > { %3238 = vrot.lane.b32.xlu1 %v3224_v29, %s5433_s21  ;;  %v4546_v34 = vpop.f32.mrb[71].mxu0  ;;  %v4735_v29 = vld [vmem:[%s6054_s17 + $0x30] ss:$8 sps:$4 sm:$0xff]   ;;  %3501 = vmatprep.subr.bf16.mxu0 %v4737_v48 }
0x16d9   : > { %3502 = vmatpush1.bf16.msra.mxu0 %v4735_v29 }
0x173a   : > { %v3233_v39 = vpop.permute.xlu0 %3232 }
0x173b   : > { %3245 = vst.msk [vmem:[#allocation3] sm:$0xff] %vm3244_vm13, %v3233_v39 }
0x173c   : > { %v3235_v40 = vpop.permute.xlu1 %3234 }
0x173d   : > { %3246 = vst.msk [vmem:[#allocation3 + $0x8] sm:$0xff] %vm3244_vm13, %v3235_v40 }
0x1742   : > { %v3249_v41 = vld [vmem:[#allocation3] sm:$0xff] }
0x1744   : > { %v3250_v42 = vld [vmem:[#allocation3 + $0x8] sm:$0xff] }
0x1745   : > { %v3253_v45 = vpack.c.bf16 %v3250_v42, %v3249_v41 }
0x1746   : > { %v3237_v47 = vpop.permute.xlu0 %3236 }
0x1747   : > { %3247 = vst.msk [vmem:[#allocation3 + $0x10] sm:$0xff] %vm3244_vm13, %v3237_v47  ;;  %4555 = vmatprep.mubr.msk.bf16.mxu1 %vm890_vm1, %v3253_v45 }
0x1748   : > { %v3239_v49 = vpop.permute.xlu1 %3238 }
0x1749   : > { %3248 = vst.msk [vmem:[#allocation3 + $0x18] sm:$0xff] %vm3244_vm13, %v3239_v49 }
0x174e   : > { %v3251_v50 = vld [vmem:[#allocation3 + $0x10] sm:$0xff] }
0x1750   : > { %v3252_v26 = vld [vmem:[#allocation3 + $0x18] sm:$0xff] }
0x1751   : > { %v3254_v36 = vpack.c.bf16 %v3252_v26, %v3251_v50 }
0x1753   : > { %4556 = vmatmul.mubr.msk.bf16.vlgmr.msra.gmra.mrb[64].mxu1 %vm890_vm1, %v3254_v36 }
0x1826   : > { %v4557_v8 = vpop.f32.mrb[64].mxu1 }
0x1827   : > { %v3334_v24 = vpop.f32.mrb[65].mxu1  ;;  %v3343_v28 = vadd.f32 %v4557_v8, %v4210_v6 }
0x1828   : > { %v3335_v33 = vadd.f32 %v4210_v6, %v3334_v24  ;;  %v4558_v38 = vpop.f32.mrb[66].mxu1  ;;  %v4217_v24 = vld [vmem:[%s740_s2] ss:$0 sm:$0xff] }
0x1829   : > { %v3337_v52 = vpop.f32.mrb[67].mxu1  ;;  %v6625_v21 = vadd.f32 %v4915_v19, %v3343_v28  ;;  %v3346_v43 = vadd.f32 %v4558_v38, %v4210_v6 }
0x182a   : > { %v6623_v63 = vadd.f32 %v4914_v54, %v3335_v33  ;;  %v3338_v1 = vadd.f32 %v4210_v6, %v3337_v52 }
0x182b   : > { %v6633_v55 = vadd.f32 %v4917_v32, %v3346_v43  ;;  %v3359_v57 = vsel %vm890_vm1, %v6625_v21, 0.0 }
0x182c   : > { %v6627_v61 = vadd.f32 %v4916_v46, %v3338_v1  ;;  %v3353_v0 = vsel %vm890_vm1, %v6623_v63, 0.0  ;;  %v4218_v1 = vld [vmem:[%s6882_s28] ss:$0 sm:$0xff] }
0x182d   : > { %3354 = vadd.xlane.f32.xlu0 %v3353_v0  ;;  %v3362_v27 = vsel %vm890_vm1, %v6633_v55, 0.0 }
0x182e   : > { %v3356_v30 = vsel %vm890_vm1, %v6627_v61, 0.0 }
0x182f   : > { %3357 = vadd.xlane.f32.xlu1 %v3356_v30 }
0x1831   : > { %3360 = vadd.xlane.f32.xlu0 %v3359_v57 }
0x1835   : > { %3363 = vadd.xlane.f32.xlu0 %v3362_v27 }
0x18ba   : > { %v3355_v31 = vpop.xlane.xlu0 %3354 }
0x18bb   : > { %v3365_v12 = vmul.f32 0.015625, %v3355_v31 }
0x18bc   : > { %v3358_v51 = vpop.xlane.xlu1 %3357 }
0x18bd   : > { %v3369_v53 = vsub.f32 %v6623_v63, %v3365_v12  ;;  %v3366_v56 = vmul.f32 0.015625, %v3358_v51 }
0x18be   : > { %v3361_v58 = vpop.xlane.xlu0 %3360 }
0x18bf   : > { %v3370_v59 = vsub.f32 %v6627_v61, %v3366_v56  ;;  %v3367_v60 = vmul.f32 0.015625, %v3361_v58  ;;  %v3373_v62 = vmul.f32 %v3369_v53, %v3369_v53  ;;  %v4738_v56 = vld [vmem:[%s6064_s19 + $0x40] sm:$0xff]  }
0x18c0   : > { %v4739_v58 = vld [vmem:[%s6064_s19] sm:$0xff]   ;;  %4327 = vmatprep.subr.bf16.mxu1 %v4738_v56 }
0x18c1   : > { %v3371_v2 = vsub.f32 %v6625_v21, %v3367_v60  ;;  %v3377_v3 = vsel %vm890_vm1, %v3373_v62, 0.0  ;;  %v3374_v25 = vmul.f32 %v3370_v59, %v3370_v59  ;;  %4328 = vmatpush3.bf16.msra.mxu1 %v4739_v58  ;;  %v4741_v60 = vld [vmem:[%s6064_s19 + $0x8] sm:$0xff]   ;;  %v4743_v62 = vld [vmem:[%s6064_s19 + $0x10] sm:$0xff]  }
0x18c2   : > { %3378 = vadd.xlane.f32.xlu0 %v3377_v3  ;;  %v3364_v4 = vpop.xlane.xlu0 %3363  ;;  %v4745_v3 = vld [vmem:[%s6064_s19 + $0x18] sm:$0xff]  }
0x18c3   : > { %v3368_v35 = vmul.f32 0.015625, %v3364_v4  ;;  %v3380_v5 = vsel %vm890_vm1, %v3374_v25, 0.0  ;;  %v3375_v7 = vmul.f32 %v3371_v2, %v3371_v2  ;;  %v4746_v25 = vld [vmem:[%s6064_s19 + $0x60] sm:$0xff]  }
0x18c4   : > { %3381 = vadd.xlane.f32.xlu1 %v3380_v5  ;;  %v4747_v4 = vld [vmem:[%s6064_s19 + $0x20] sm:$0xff]   ;;  %v4749_v5 = vld [vmem:[%s6064_s19 + $0x28] sm:$0xff]  }
0x18c5   : > { %v3372_v9 = vsub.f32 %v6633_v55, %v3368_v35  ;;  %v3383_v13 = vsel %vm890_vm1, %v3375_v7, 0.0  ;;  %v4748_v35 = vld [vmem:[%s6064_s19 + $0x68] sm:$0xff]   ;;  %v4750_v7 = vld [vmem:[%s6064_s19 + $0x70] sm:$0xff]  }
0x18c6   : > { %3384 = vadd.xlane.f32.xlu0 %v3383_v13  ;;  %v4752_v13 = vld [vmem:[%s6064_s19 + $0x78] sm:$0xff]  }
0x18c7   : > { %v3376_v15 = vmul.f32 %v3372_v9, %v3372_v9 }
0x18c9   : > { %v3386_v16 = vsel %vm890_vm1, %v3376_v15, 0.0  ;;  %v4753_v15 = vld [vmem:[%s6064_s19 + $0x38] sm:$0xff]  }
0x18ca   : > { %3387 = vadd.xlane.f32.xlu1 %v3386_v16  ;;  %v3437_v16 = vld [vmem:[%s6061_s14] sm:$0x3] }
0x18cb   : > { %v3442_v17 = vrot.slane %v3437_v16, %v980_v11  ;;  %v3446_v18 = vrot.slane %v3437_v16, %v984_v14 }
0x194f   : > { %v3379_v34 = vpop.xlane.xlu0 %3378 }
0x1950   : > { %v3389_v39 = vmul.f32 0.015625, %v3379_v34 }
0x1951   : > { %v3382_v40 = vpop.xlane.xlu1 %3381 }
0x1952   : > { %v3393_v41 = vadd.f32 1e-05, %v3389_v39  ;;  %v3390_v42 = vmul.f32 0.015625, %v3382_v40 }
0x1953   : > { %v3385_v45 = vpop.xlane.xlu0 %3384 }
0x1954   : > { %4890 = vrsqrt.f32 %v3393_v41  ;;  %v3394_v47 = vadd.f32 1e-05, %v3390_v42  ;;  %v3391_v49 = vmul.f32 0.015625, %v3385_v45 }
0x1956   : > { %4892 = vrsqrt.f32 %v3394_v47  ;;  %v3395_v50 = vadd.f32 1e-05, %v3391_v49 }
0x1957   : > { %v3388_v26 = vpop.xlane.xlu1 %3387 }
0x1958   : > { %4894 = vrsqrt.f32 %v3395_v50  ;;  %v3392_v36 = vmul.f32 0.015625, %v3388_v26 }
0x195a   : > { %v3396_v6 = vadd.f32 1e-05, %v3392_v36 }
0x195c   : > { %4896 = vrsqrt.f32 %v3396_v6 }
0x195e   : > { %v4891_v8 = vpop.eup %4890 }
0x195f   : > { %v3401_v28 = vmul.f32 %v4891_v8, %v3369_v53 }
0x1960   : > { %v4893_v33 = vpop.eup %4892 }
0x1961   : > { %v3412_v38 = vmul.f32 %v4217_v24, %v3401_v28  ;;  %v3402_v52 = vmul.f32 %v4893_v33, %v3370_v59  ;;  %v4740_v59 = vld [vmem:[%s6064_s19 + $0x48] sm:$0xff]  }
0x1962   : > { %v4895_v54 = vpop.eup %4894  ;;  %4329 = vmatprep.subr.bf16.mxu1 %v4740_v59 }
0x1963   : > { %v3413_v19 = vmul.f32 %v4217_v24, %v3402_v52  ;;  %v3403_v43 = vmul.f32 %v4895_v54, %v3371_v2  ;;  %v3423_v46 = vadd.f32 %v4218_v1, %v3412_v38  ;;  %4330 = vmatpush3.bf16.msra.mxu1 %v4741_v60  ;;  %v4744_v2 = vld [vmem:[%s6064_s19 + $0x58] sm:$0xff]  }
0x1965   : > { %v3424_v0 = vadd.f32 %v4218_v1, %v3413_v19  ;;  %v3414_v27 = vmul.f32 %v4217_v24, %v3403_v43 }
0x1966   : > { %v4897_v30 = vpop.eup %4896 }
0x1967   : > { %v3404_v32 = vmul.f32 %v4897_v30, %v3372_v9  ;;  %v3427_v57 = vpack.c.bf16 %v3424_v0, %v3423_v46  ;;  %v3425_v51 = vadd.f32 %v4218_v1, %v3414_v27  ;;  %v4751_v9 = vld [vmem:[%s6064_s19 + $0x30] sm:$0xff]  }
0x1969   : > { %4227 = vmatmul.mubr.msk.bf16.vlgmr.msra.gmra.mrb[72].mxu0 %vm890_vm1, %v3427_v57  ;;  %v3415_v31 = vmul.f32 %v4217_v24, %v3404_v32 }
0x196a   : > { %3537 = vmatprep.mubr.bf16.mxu0 %v5429_v37  ;;  %v4742_v37 = vld [vmem:[%s6064_s19 + $0x50] sm:$0xff]  }
0x196b   : > { %v3426_v12 = vadd.f32 %v4218_v1, %v3415_v31  ;;  %4331 = vmatprep.subr.bf16.mxu1 %v4742_v37 }
0x196c   : > { %4332 = vmatpush3.bf16.msra.mxu1 %v4743_v62 }
0x196d   : > { %v3428_v53 = vpack.c.bf16 %v3426_v12, %v3425_v51  ;;  %4333 = vmatprep.subr.bf16.mxu1 %v4744_v2 }
0x1970   : > { %4334 = vmatpush3.bf16.msra.mxu1 %v4745_v3 }
0x1971   : > { %4228 = vmatmul.mubr.msk.bf16.gmra.mrb[76].mxu0 %vm890_vm1, %v3428_v53  ;;  %4335 = vmatprep.subr.bf16.mxu1 %v4746_v25 }
0x1974   : > { %4336 = vmatpush3.bf16.msra.mxu1 %v4747_v4 }
0x1975   : > { %4337 = vmatprep.subr.bf16.mxu1 %v4748_v35 }
0x1978   : > { %4338 = vmatpush3.bf16.msra.mxu1 %v4749_v5 }
0x1979   : > { %4339 = vmatprep.subr.bf16.mxu1 %v4750_v7 }
0x197c   : > { %4340 = vmatpush3.bf16.msra.mxu1 %v4751_v9 }
0x197d   : > { %4341 = vmatprep.subr.bf16.mxu1 %v4752_v13 }
0x1980   : > { %4342 = vmatpush3.bf16.msra.mxu1 %v4753_v15 }
0x1a3c   : > { %v3529_v20 = vpop.f32.mrb[72].mxu0 }
0x1a3d   : > { %v6683_v44 = vadd.f32 %v3529_v20, %v3442_v17  ;;  %v3531_v22 = vpop.f32.mrb[73].mxu0 }
0x1a3e   : > { %v6685_v23 = vadd.f32 %v3531_v22, %v3446_v18  ;;  %v3533_v48 = vpop.f32.mrb[74].mxu0 }
0x1a3f   : > { %v3556_v29 = vmul.f32 0.044715, %v6683_v44  ;;  %v6688_v34 = vadd.f32 %v3533_v48, %v3442_v17  ;;  %v3535_v39 = vpop.f32.mrb[75].mxu0  ;;  %v3548_v48 = vmul.f32 0.5, %v6683_v44 }
0x1a40   : > { %v3557_v40 = vmul.f32 0.044715, %v6685_v23  ;;  %v6691_v41 = vadd.f32 %v3535_v39, %v3446_v18 }
0x1a41   : > { %v3564_v11 = vmul.f32 %v3556_v29, %v6683_v44  ;;  %v3558_v10 = vmul.f32 0.044715, %v6688_v34  ;;  %v3550_v29 = vmul.f32 0.5, %v6688_v34 }
0x1a42   : > { %v3565_v14 = vmul.f32 %v3557_v40, %v6685_v23  ;;  %v3559_v42 = vmul.f32 0.044715, %v6691_v41  ;;  %v3549_v40 = vmul.f32 0.5, %v6685_v23 }
0x1a43   : > { %v3572_v45 = vmul.f32 %v3564_v11, %v6683_v44  ;;  %v3566_v47 = vmul.f32 %v3558_v10, %v6688_v34  ;;  %v3551_v11 = vmul.f32 0.5, %v6691_v41 }
0x1a44   : > { %v3573_v49 = vmul.f32 %v3565_v14, %v6685_v23  ;;  %v3567_v50 = vmul.f32 %v3559_v42, %v6691_v41  ;;  %v3539_v26 = vpop.f32.mrb[76].mxu0 }
0x1a45   : > { %v3580_v36 = vadd.f32 %v3572_v45, %v6683_v44  ;;  %v3574_v6 = vmul.f32 %v3566_v47, %v6688_v34  ;;  %v6703_v8 = vadd.f32 %v3539_v26, %v3442_v17  ;;  %v3541_v24 = vpop.f32.mrb[77].mxu0 }
0x1a46   : > { %v3575_v28 = vmul.f32 %v3567_v50, %v6691_v41  ;;  %v6706_v33 = vadd.f32 %v3541_v24, %v3446_v18  ;;  %v3543_v38 = vpop.f32.mrb[78].mxu0  ;;  %v3581_v52 = vadd.f32 %v3573_v49, %v6685_v23 }
0x1a47   : > { %v3588_v54 = vmul.f32 0.7978846, %v3580_v36  ;;  %v3582_v1 = vadd.f32 %v3574_v6, %v6688_v34  ;;  %v3560_v19 = vmul.f32 0.044715, %v6703_v8  ;;  %v3544_v43 = vadd.f32 %v3543_v38, %v3442_v17  ;;  %v3545_v46 = vpop.f32.mrb[79].mxu0 }
0x1a48   : > { %v3561_v0 = vmul.f32 0.044715, %v6706_v33  ;;  %v3546_v30 = vadd.f32 %v3545_v46, %v3446_v18  ;;  %v3583_v32 = vadd.f32 %v3575_v28, %v6691_v41  ;;  %v3589_v57 = vmul.f32 0.7978846, %v3581_v52 }
0x1a49   : > { %4898 = vtanh.f32 %v3588_v54  ;;  %v3590_v27 = vmul.f32 0.7978846, %v3582_v1  ;;  %v3568_v31 = vmul.f32 %v3560_v19, %v6703_v8  ;;  %v3562_v12 = vmul.f32 0.044715, %v3544_v43 }
0x1a4a   : > { %v3569_v51 = vmul.f32 %v3561_v0, %v6706_v33  ;;  %v3563_v53 = vmul.f32 0.044715, %v3546_v30  ;;  %v3591_v56 = vmul.f32 0.7978846, %v3583_v32  ;;  %4900 = vtanh.f32 %v3589_v57 }
0x1a4b   : > { %4902 = vtanh.f32 %v3590_v27  ;;  %v3576_v58 = vmul.f32 %v3568_v31, %v6703_v8  ;;  %v3570_v59 = vmul.f32 %v3562_v12, %v3544_v43  ;;  %v3552_v23 = vmul.f32 0.5, %v6703_v8  ;;  %v4229_v31 = vld [vmem:[%s783_s22] ss:$0 sm:$0xff] }
0x1a4c   : > { %v3577_v60 = vmul.f32 %v3569_v51, %v6706_v33  ;;  %v3571_v37 = vmul.f32 %v3563_v53, %v3546_v30  ;;  %4904 = vtanh.f32 %v3591_v56  ;;  %v3554_v34 = vmul.f32 0.5, %v3544_v43 }
0x1a4d   : > { %v3578_v62 = vmul.f32 %v3570_v59, %v3544_v43  ;;  %v3584_v2 = vadd.f32 %v3576_v58, %v6703_v8  ;;  %v3553_v38 = vmul.f32 0.5, %v6706_v33  ;;  %v3555_v52 = vmul.f32 0.5, %v3546_v30 }
0x1a4e   : > { %v3579_v3 = vmul.f32 %v3571_v37, %v3546_v30  ;;  %v3585_v25 = vadd.f32 %v3577_v60, %v6706_v33 }
0x1a4f   : > { %v3586_v4 = vadd.f32 %v3578_v62, %v3544_v43  ;;  %v3592_v35 = vmul.f32 0.7978846, %v3584_v2 }
0x1a50   : > { %v3587_v5 = vadd.f32 %v3579_v3, %v3546_v30  ;;  %v3593_v7 = vmul.f32 0.7978846, %v3585_v25 }
0x1a51   : > { %v3594_v9 = vmul.f32 0.7978846, %v3586_v4  ;;  %4906 = vtanh.f32 %v3592_v35 }
0x1a52   : > { %v3595_v13 = vmul.f32 0.7978846, %v3587_v5  ;;  %4908 = vtanh.f32 %v3593_v7 }
0x1a53   : > { %v4899_v15 = vpop.eup %4898  ;;  %4910 = vtanh.f32 %v3594_v9 }
0x1a54   : > { %v4901_v16 = vpop.eup %4900  ;;  %v3604_v17 = vadd.f32 1.0, %v4899_v15  ;;  %4912 = vtanh.f32 %v3595_v13 }
0x1a55   : > { %v4903_v18 = vpop.eup %4902  ;;  %v3605_v20 = vadd.f32 1.0, %v4901_v16 }
0x1a56   : > { %v4905_v22 = vpop.eup %4904  ;;  %v3606_v39 = vadd.f32 1.0, %v4903_v18  ;;  %v3612_v14 = vmul.f32 %v3604_v17, %v3548_v48 }
0x1a57   : > { %v3607_v10 = vadd.f32 1.0, %v4905_v22  ;;  %v3613_v45 = vmul.f32 %v3605_v20, %v3549_v40 }
0x1a58   : > { %v3614_v42 = vmul.f32 %v3606_v39, %v3550_v29 }
0x1a59   : > { %v3615_v47 = vmul.f32 %v3607_v10, %v3551_v11 }
0x1a5a   : > { %v3620_v49 = vpack.c.bf16 %v3614_v42, %v3612_v14 }
0x1a5b   : > { %v4907_v50 = vpop.eup %4906  ;;  %v3621_v26 = vpack.c.bf16 %v3615_v47, %v3613_v45 }
0x1a5c   : > { %v4909_v36 = vpop.eup %4908  ;;  %v3608_v6 = vadd.f32 1.0, %v4907_v50 }
0x1a5d   : > { %v4911_v24 = vpop.eup %4910  ;;  %3791 = vmatprep.mubr.bf16.mxu1 %v3621_v26  ;;  %v3609_v44 = vadd.f32 1.0, %v4909_v36 }
0x1a5e   : > { %v4913_v28 = vpop.eup %4912  ;;  %3792 = vmatmul.mubr.bf16.vlgmr.msra.gmra.mrb[68].mxu1 %v3620_v49  ;;  %v3610_v41 = vadd.f32 1.0, %v4911_v24  ;;  %v3616_v1 = vmul.f32 %v3608_v6, %v3552_v23 }
0x1a5f   : > { %v3611_v54 = vadd.f32 1.0, %v4913_v28  ;;  %v3617_v46 = vmul.f32 %v3609_v44, %v3553_v38 }
0x1a60   : > { %v3618_v19 = vmul.f32 %v3610_v41, %v3554_v34 }
0x1a61   : > { %v3619_v0 = vmul.f32 %v3611_v54, %v3555_v52 }
0x1a62   : > { %v3622_v32 = vpack.c.bf16 %v3618_v19, %v3616_v1 }
0x1a63   : > { %v3623_v57 = vpack.c.bf16 %v3619_v0, %v3617_v46 }
0x1a65   : > { %3799 = vmatprep.mubr.bf16.mxu1 %v3623_v57 }
0x1a66   : > { %3800 = vmatmul.mubr.bf16.gmra.mrb[72].mxu1 %v3622_v32 }
0x1b31   : > { %v4343_v27 = vpop.f32.mrb[68].mxu1 }
0x1b32   : > { %v4344_v12 = vpop.f32.mrb[69].mxu1 }
0x1b33   : > { %v4345_v51 = vadd.f32 %v4344_v12, %v4343_v27  ;;  %v4346_v8 = vpop.f32.mrb[70].mxu1 }
0x1b34   : > { %v4347_v43 = vpop.f32.mrb[71].mxu1 }
0x1b35   : > { %v3794_v53 = vadd.f32 %v4345_v51, %v4229_v31  ;;  %v4348_v56 = vadd.f32 %v4347_v43, %v4346_v8 }
0x1b37   : > { %v3808_v33 = vadd.f32 %v3794_v53, %v6623_v63  ;;  %v3797_v30 = vadd.f32 %v4348_v56, %v4229_v31 }
0x1b39   : > { %3812 = vst.msk [vmem:[#allocation2] sm:$0xff] %vm890_vm1, %v3808_v33  ;;  %v3809_v58 = vadd.f32 %v3797_v30, %v6627_v61  ;;  %v4349_v59 = vpop.f32.mrb[72].mxu1  ;;  %3820 = vst.msk [vmem:[#allocation25] sm:$0xff] (!%p4246_p5), %vm890_vm1, %v3808_v33 }
0x1b3a   : > { %v4350_v60 = vpop.f32.mrb[73].mxu1 }
0x1b3b   : > { %3813 = vst.msk [vmem:[#allocation2 + $0x8] sm:$0xff] %vm890_vm1, %v3809_v58  ;;  %v4351_v37 = vadd.f32 %v4350_v60, %v4349_v59  ;;  %v4352_v62 = vpop.f32.mrb[74].mxu1  ;;  %3821 = vst.msk [vmem:[#allocation25 + $0x8] sm:$0xff] (!%p4246_p5), %vm890_vm1, %v3809_v58 }
0x1b3c   : > { %v4353_v2 = vpop.f32.mrb[75].mxu1 }
0x1b3d   : > { %v3802_v3 = vadd.f32 %v4351_v37, %v4229_v31  ;;  %v4354_v25 = vadd.f32 %v4353_v2, %v4352_v62  ;;  %3819 = sbr.rel (%p4246_p5) target bundleno = 6980 (0x1b44), region = 132 }
0x1b3f   : > { %v3810_v4 = vadd.f32 %v3802_v3, %v6625_v21  ;;  %v3805_v35 = vadd.f32 %v4354_v25, %v4229_v31 }
0x1b41   : > { %3814 = vst.msk [vmem:[#allocation2 + $0x10] sm:$0xff] %vm890_vm1, %v3810_v4  ;;  %v3811_v63 = vadd.f32 %v3805_v35, %v6633_v55  ;;  %3822 = vst.msk [vmem:[#allocation25 + $0x10] sm:$0xff] (!%p4246_p5), %vm890_vm1, %v3810_v4 }
0x1b43   : > { %3815 = vst.msk [vmem:[#allocation2 + $0x18] sm:$0xff] %vm890_vm1, %v3811_v63  ;;  %3823 = vst.msk [vmem:[#allocation25 + $0x18] sm:$0xff] (!%p4246_p5), %vm890_vm1, %v3811_v63 }
0x1b44 PF: > { %p4635_p0 = scmp.eq.s32.totalorder %s5794_s3, 1  ;;  %s5447_s18 = smov [#allocation25]  }
0x1b45   : > { %s3834_s2 = sshll.u32 %s5447_s18, 4  ;;  %s3835_s2 = int_to_ptr.vmem [resolvable:$true] %s3834_s2 }
0x1b46   : > { %s5306_s17 = scalar_lea.vmem %s3835_s2, 512  ;;  %p5313_p13 = scmp.lt.s32.totalorder %s3835_s2, %s3835_s2 }
0x1b47   : > { %p5307_p10 = scmp.ne.s32.totalorder %s3835_s2, %s5306_s17  ;;  %p5314_p3 = scmp.lt.s32.totalorder %s5306_s17, %s5306_s17 }
0x1b49   : > { %p5308_p1 = pnand %p5307_p10, %p4635_p0  ;;  %p5315_p2 = por %p5314_p3, %p5313_p13 }
0x1b4b   : > { %p5309_p4 = pneg %p5308_p1 }
0x1b4d   : > { %p5316_p6 = pnand %p5315_p2, %p5309_p4 }
0x1b4f   : > { %5319 = shalt.err (!%p5316_p6)
}
0x1b50   : > { %s6884_s22 = sld [smem:[#allocation46_spill]] }
0x1b56   : > { %s5320_s21 = scalar_lea.hbm %s6884_s22, 512 }
0x1b57   : > { %p5321_p11 = scmp.ne.s32.totalorder %s6884_s22, %s5320_s21  ;;  %p5326_p8 = scmp.lt.u32.totalorder %s5320_s21, %s6884_s22 }
0x1b59   : > { %p5322_p7 = pnand %p5321_p11, %p4635_p0 }
0x1b5b   : > { %p5323_p9 = pneg %p5322_p7 }
0x1b5d   : > { %p5328_p12 = pnand %p5326_p8, %p5323_p9 }
0x1b5f   : > { %5331 = shalt.err (!%p5328_p12)
}
0x1b60   : > { %s5448_s27 = smov 128  }
0x1b61   : > { %4588 = dma.vmem_to_hbm [thread:$0]  (%p4635_p0), %s3835_s2, 512, %s6884_s22, [#allocation6], %s5448_s27, %s5448_s27, %s5445_s10  }
0x1b62   : > { %5385 = dma.done.wait (%p4635_p0), [#allocation6], 512  }
0x1b63   : > { %5387 = vsyncadd (%p4635_p0), [#allocation6], 4294966784 }
0x1b64 PF: > { %s43_s30 = sadd.s32 1, %s5410_s30   ;;  %s6885_s1 = sld [smem:[#allocation34_spill]] }
0x1b65   : > { %p40_p5 = scmp.ge.s32.totalorder %s43_s30, 4   ;;  %s6886_s27 = sld [smem:[#allocation37_spill]] }
0x1b66   : > { %s6887_s23 = sld [smem:[#allocation36_spill]]  ;;  %s6888_s25 = smov %s5394_s26 }
0x1b67   : > { %s6890_s28 = smov %s5406_s29  ;;  %42 = sbr.rel (!%p40_p5) target bundleno = 26 (0x1a), region = 255 }
0x1b6a   : > { %s6889_s26 = smov %s6885_s1 }
0x1b6c   : > { %s6891_s29 = smov %s6887_s23 }
0x1b6e   :  { %3850 = vsyncpa [#allocation5], 1 }
0x1b6f   :  { %3852 = vsyncpa [#allocation5 + $0x1], 1 }
0x1b70   :  { %3853 = vsyncpa [#allocation8], 1 }
0x1b71   :  { %3855 = vsyncpa [#allocation8 + $0x1], 1 }
0x1b72   :  { %3856 = vsyncpa [#allocation11], 1 }
0x1b73   :  { %3858 = vsyncpa [#allocation11 + $0x1], 1 }
0x1b74   :  { %3859 = vsyncpa [#allocation14], 1 }
0x1b75   :  { %3861 = vsyncpa [#allocation14 + $0x1], 1 }
0x1b76   :  { %3862 = vsyncpa [#allocation17], 1 }
0x1b77   :  { %3864 = vsyncpa [#allocation17 + $0x1], 1 }
0x1b78   :  { %3865 = vsyncpa [#allocation20], 1 }
0x1b79   :  { %3867 = vsyncpa [#allocation20 + $0x1], 1 }
0x1b7a   :  { %3868 = vsyncpa [#allocation23], 1 }
0x1b7b   :  { %3870 = vsyncpa [#allocation23 + $0x1], 1 }
0x1b7c   :  { %3871 = vsyncpa [#allocation6], 1 }
0x1b7d   :  { %3873 = vsyncpa [#allocation6 + $0x1], 1 }

</bundles_post_ra>
